<compile_context>
chip_gen: v7x
topology: tpu7x:2x2x1
jax: 0.10.0
libtpu: 0.0.40
codegen_flags: <defaults>
</compile_context>

<pallas_src>
import functools

import jax
import jax.numpy as jnp
from jax.experimental import pallas as pl
from jax.experimental.pallas import tpu as pltpu


# ------------------------- per-generation configuration ----------------------


@functools.lru_cache(maxsize=None)
def _chip_config():
    """VMEM budget and tile caps per TPU generation (conservative fallback)."""
    vmem_bytes = 64 * 1024 * 1024  # assume v7x (64 MiB / TC) if query fails
    try:
        info = pltpu.get_tpu_info()
        v = getattr(info, "vmem_capacity_bytes", None)
        if isinstance(v, (int, float)) and v > 0:
            vmem_bytes = int(v)
    except Exception:
        pass
    if vmem_bytes >= 100 * 1024 * 1024:
        # v5e / v6e: 128 MiB VMEM -> large tiles cut weight re-streaming.
        return {"vmem_limit": 96 * 1024 * 1024, "row_cap": 512,
                "col_cap": 512, "tq_cap": 256}
    # v7x: 64 MiB VMEM -> keep double-buffering without spilling.
    return {"vmem_limit": 48 * 1024 * 1024, "row_cap": 256,
            "col_cap": 512, "tq_cap": 128}


# ------------------------------ tile helpers --------------------------------


def _round_up(x, m):
    return ((x + m - 1) // m) * m


def _largest_aligned_divisor(n, cap, align=8):
    """Largest multiple of `align` dividing n that is <= cap (0 if none)."""
    best = 0
    d = align
    lim = min(n, cap)
    while d <= lim:
        if n % d == 0:
            best = d
        d += align
    return best


def _row_tiling(batch, seq, cap):
    """Pick (S_pad, M_pad, tm) so that tm | batch*S_pad with minimal padding."""
    s8 = _round_up(seq, 8)
    if batch * s8 <= cap:  # tiny shapes: single row tile, no extra padding
        return s8, batch * s8, batch * s8
    for align in (8, 64, 128, 256):
        s_pad = _round_up(seq, align)
        m_pad = batch * s_pad
        tm = _largest_aligned_divisor(m_pad, cap)
        if tm >= min(cap, 128):
            return s_pad, m_pad, tm
    s_pad = _round_up(seq, cap)
    return s_pad, batch * s_pad, cap


def _pick_col_tile(n, cap):
    """Lane tile: multiple of 128 dividing n, <= cap; else the full dim."""
    for c in (1024, 512, 256, 128):
        if c <= cap and n % c == 0:
            return c
    return n


def _pick_heads_per_block(num_heads, head_dim):
    """Smallest head group whose lane width is a multiple of 128."""
    for g in range(1, num_heads + 1):
        if num_heads % g == 0 and (g * head_dim) % 128 == 0:
            return g
    # TODO(synk): head_dim values with no 128-multiple grouping would need a
    # padded head layout; not needed for DINOv2 (head_dim = 64).
    return num_heads


# ------------------------------ LayerNorm (norm1) -----------------------------


def _layernorm_kernel(x_ref, g_ref, b_ref, o_ref, *, eps):
    x = x_ref[...].astype(jnp.float32)
    mean = jnp.mean(x, axis=-1, keepdims=True)
    xc = x - mean
    var = jnp.mean(xc * xc, axis=-1, keepdims=True)
    inv = jax.lax.rsqrt(var + eps)
    y = xc * inv * g_ref[...].astype(jnp.float32) + b_ref[...].astype(jnp.float32)
    o_ref[...] = y.astype(o_ref.dtype)


def layernorm(x2d, gamma, beta, *, tm, vmem_limit, eps=1e-6, out_dtype=jnp.bfloat16):
    M, D = x2d.shape
    assert M % tm == 0
    return pl.pallas_call(
        functools.partial(_layernorm_kernel, eps=eps),
        out_shape=jax.ShapeDtypeStruct((M, D), out_dtype),
        grid_spec=pltpu.PrefetchScalarGridSpec(
            num_scalar_prefetch=0,
            grid=(M // tm,),
            in_specs=[
                pl.BlockSpec((tm, D), lambda i: (i, 0)),
                pl.BlockSpec((1, D), lambda i: (0, 0)),
                pl.BlockSpec((1, D), lambda i: (0, 0)),
            ],
            out_specs=pl.BlockSpec((tm, D), lambda i: (i, 0)),
        ),
        compiler_params=pltpu.CompilerParams(
            dimension_semantics=("parallel",), vmem_limit_bytes=vmem_limit
        ),
    )(x2d, gamma.reshape(1, D), beta.reshape(1, D))


# -------------------------- Linear (bias epilogue) ---------------------------


def _matmul_bias_kernel(x_ref, w_ref, b_ref, o_ref, acc_ref):
    @pl.when(pl.program_id(2) == 0)
    def _():
        acc_ref[...] = jnp.zeros_like(acc_ref)

    acc_ref[...] += jnp.dot(x_ref[...], w_ref[...], preferred_element_type=jnp.float32)

    @pl.when(pl.program_id(2) == pl.num_programs(2) - 1)
    def _():
        o_ref[...] = (acc_ref[...] + b_ref[...].astype(jnp.float32)).astype(o_ref.dtype)


def linear_bias(x2d, w, b, *, tm, col_cap, vmem_limit, out_dtype=jnp.bfloat16):
    """out = x @ w + b   (bf16 operands, fp32 accumulation)."""
    M, K = x2d.shape
    _, N = w.shape
    assert M % tm == 0
    tn = _pick_col_tile(N, col_cap)
    tk = _pick_col_tile(K, col_cap)
    return pl.pallas_call(
        _matmul_bias_kernel,
        out_shape=jax.ShapeDtypeStruct((M, N), out_dtype),
        grid_spec=pltpu.PrefetchScalarGridSpec(
            num_scalar_prefetch=0,
            grid=(M // tm, N // tn, K // tk),
            in_specs=[
                pl.BlockSpec((tm, tk), lambda i, j, k: (i, k)),
                pl.BlockSpec((tk, tn), lambda i, j, k: (k, j)),
                pl.BlockSpec((1, tn), lambda i, j, k: (0, j)),
            ],
            out_specs=pl.BlockSpec((tm, tn), lambda i, j, k: (i, j)),
            scratch_shapes=[pltpu.VMEM((tm, tn), jnp.float32)],
        ),
        compiler_params=pltpu.CompilerParams(
            dimension_semantics=("parallel", "parallel", "arbitrary"),
            vmem_limit_bytes=vmem_limit,
        ),
    )(x2d, w, b.reshape(1, N))


# ---- Out-projection with fused LayerScale + residual + LayerNorm epilogue ----


def _matmul_scale_res_norm_kernel(x_ref, w_ref, b_ref, ls_ref, res_ref,
                                  ng_ref, nb_ref, res_o_ref, norm_o_ref,
                                  acc_ref, *, eps):
    @pl.when(pl.program_id(1) == 0)
    def _():
        acc_ref[...] = jnp.zeros_like(acc_ref)

    acc_ref[...] += jnp.dot(x_ref[...], w_ref[...], preferred_element_type=jnp.float32)

    @pl.when(pl.program_id(1) == pl.num_programs(1) - 1)
    def _():
        y = (acc_ref[...] + b_ref[...].astype(jnp.float32)) * ls_ref[...].astype(jnp.float32)
        y = y + res_ref[...].astype(jnp.float32)
        res_o_ref[...] = y.astype(res_o_ref.dtype)
        mu = jnp.mean(y, axis=-1, keepdims=True)
        yc = y - mu
        var = jnp.mean(yc * yc, axis=-1, keepdims=True)
        inv = jax.lax.rsqrt(var + eps)
        n = yc * inv * ng_ref[...].astype(jnp.float32) + nb_ref[...].astype(jnp.float32)
        norm_o_ref[...] = n.astype(norm_o_ref.dtype)


def linear_scale_residual_norm(x2d, w, b, ls, res2d, ng, nb, *, tm, col_cap,
                               vmem_limit, eps=1e-6):
    """residual = (x@w + b) * ls + res ; normed = LayerNorm(residual).

    The whole output row (N = D) is kept in the fp32 accumulator so the second
    LayerNorm is computed in the epilogue -> saves a full M x D HBM round trip.
    """
    M, K = x2d.shape
    _, N = w.shape
    assert M % tm == 0
    tk = _pick_col_tile(K, col_cap)
    return pl.pallas_call(
        functools.partial(_matmul_scale_res_norm_kernel, eps=eps),
        out_shape=(jax.ShapeDtypeStruct((M, N), jnp.float32),
                   jax.ShapeDtypeStruct((M, N), jnp.bfloat16)),
        grid_spec=pltpu.PrefetchScalarGridSpec(
            num_scalar_prefetch=0,
            grid=(M // tm, K // tk),
            in_specs=[
                pl.BlockSpec((tm, tk), lambda i, k: (i, k)),
                pl.BlockSpec((tk, N), lambda i, k: (k, 0)),
                pl.BlockSpec((1, N), lambda i, k: (0, 0)),
                pl.BlockSpec((1, N), lambda i, k: (0, 0)),
                pl.BlockSpec((tm, N), lambda i, k: (i, 0)),
                pl.BlockSpec((1, N), lambda i, k: (0, 0)),
                pl.BlockSpec((1, N), lambda i, k: (0, 0)),
            ],
            out_specs=[pl.BlockSpec((tm, N), lambda i, k: (i, 0)),
                       pl.BlockSpec((tm, N), lambda i, k: (i, 0))],
            scratch_shapes=[pltpu.VMEM((tm, N), jnp.float32)],
        ),
        compiler_params=pltpu.CompilerParams(
            dimension_semantics=("parallel", "arbitrary"),
            vmem_limit_bytes=vmem_limit,
        ),
    )(x2d, w, b.reshape(1, N), ls.reshape(1, N), res2d,
      ng.reshape(1, N), nb.reshape(1, N))


# ------------- Down-projection with fused LayerScale + residual ---------------


def _matmul_scale_residual_kernel(x_ref, w_ref, b_ref, ls_ref, res_ref, o_ref, acc_ref):
    @pl.when(pl.program_id(2) == 0)
    def _():
        acc_ref[...] = jnp.zeros_like(acc_ref)

    acc_ref[...] += jnp.dot(x_ref[...], w_ref[...], preferred_element_type=jnp.float32)

    @pl.when(pl.program_id(2) == pl.num_programs(2) - 1)
    def _():
        y = (acc_ref[...] + b_ref[...].astype(jnp.float32)) * ls_ref[...].astype(jnp.float32)
        o_ref[...] = (y + res_ref[...].astype(jnp.float32)).astype(o_ref.dtype)


def linear_scale_residual(x2d, w, b, ls, res2d, *, tm, col_cap, vmem_limit):
    """out = (x @ w + b) * ls + res ; residual buffer reused in place."""
    M, K = x2d.shape
    _, N = w.shape
    assert M % tm == 0
    tn = _pick_col_tile(N, col_cap)
    tk = _pick_col_tile(K, col_cap)
    return pl.pallas_call(
        _matmul_scale_residual_kernel,
        out_shape=jax.ShapeDtypeStruct((M, N), jnp.float32),
        grid_spec=pltpu.PrefetchScalarGridSpec(
            num_scalar_prefetch=0,
            grid=(M // tm, N // tn, K // tk),
            in_specs=[
                pl.BlockSpec((tm, tk), lambda i, j, k: (i, k)),
                pl.BlockSpec((tk, tn), lambda i, j, k: (k, j)),
                pl.BlockSpec((1, tn), lambda i, j, k: (0, j)),
                pl.BlockSpec((1, tn), lambda i, j, k: (0, j)),
                pl.BlockSpec((tm, tn), lambda i, j, k: (i, j)),
            ],
            out_specs=pl.BlockSpec((tm, tn), lambda i, j, k: (i, j)),
            scratch_shapes=[pltpu.VMEM((tm, tn), jnp.float32)],
        ),
        # The residual input is dead after this op -> reuse its HBM buffer.
        input_output_aliases={4: 0},
        compiler_params=pltpu.CompilerParams(
            dimension_semantics=("parallel", "parallel", "arbitrary"),
            vmem_limit_bytes=vmem_limit,
        ),
    )(x2d, w, b.reshape(1, N), ls.reshape(1, N), res2d)


# ---------------- SwiGLU up-projection with fused gate epilogue --------------


def _gated_matmul_kernel(x_ref, w1_ref, b1_ref, w2_ref, b2_ref, o_ref, acc1_ref, acc2_ref):
    @pl.when(pl.program_id(2) == 0)
    def _():
        acc1_ref[...] = jnp.zeros_like(acc1_ref)
        acc2_ref[...] = jnp.zeros_like(acc2_ref)

    x = x_ref[...]
    acc1_ref[...] += jnp.dot(x, w1_ref[...], preferred_element_type=jnp.float32)
    acc2_ref[...] += jnp.dot(x, w2_ref[...], preferred_element_type=jnp.float32)

    @pl.when(pl.program_id(2) == pl.num_programs(2) - 1)
    def _():
        x1 = acc1_ref[...] + b1_ref[...].astype(jnp.float32)
        x2 = acc2_ref[...] + b2_ref[...].astype(jnp.float32)
        o_ref[...] = (x1 * jax.nn.sigmoid(x1) * x2).astype(o_ref.dtype)


def swiglu_linear(x2d, w1, b1, w2, b2, *, tm, col_cap, vmem_limit,
                  out_dtype=jnp.bfloat16):
    """out = silu(x @ w1 + b1) * (x @ w2 + b2)."""
    M, K = x2d.shape
    _, F = w1.shape
    assert M % tm == 0
    tn = _pick_col_tile(F, col_cap)
    tk = _pick_col_tile(K, col_cap)
    return pl.pallas_call(
        _gated_matmul_kernel,
        out_shape=jax.ShapeDtypeStruct((M, F), out_dtype),
        grid_spec=pltpu.PrefetchScalarGridSpec(
            num_scalar_prefetch=0,
            grid=(M // tm, F // tn, K // tk),
            in_specs=[
                pl.BlockSpec((tm, tk), lambda i, j, k: (i, k)),
                pl.BlockSpec((tk, tn), lambda i, j, k: (k, j)),
                pl.BlockSpec((1, tn), lambda i, j, k: (0, j)),
                pl.BlockSpec((tk, tn), lambda i, j, k: (k, j)),
                pl.BlockSpec((1, tn), lambda i, j, k: (0, j)),
            ],
            out_specs=pl.BlockSpec((tm, tn), lambda i, j, k: (i, j)),
            scratch_shapes=[
                pltpu.VMEM((tm, tn), jnp.float32),
                pltpu.VMEM((tm, tn), jnp.float32),
            ],
        ),
        compiler_params=pltpu.CompilerParams(
            dimension_semantics=("parallel", "parallel", "arbitrary"),
            vmem_limit_bytes=vmem_limit,
        ),
    )(x2d, w1, b1.reshape(1, F), w2, b2.reshape(1, F))


# ----------------------------- Self attention --------------------------------


def _attention_kernel(q_ref, k_ref, v_ref, o_ref, *, heads, head_dim, s_valid):
    # Blocks are (1, tq, bw) / (1, S_pad, bw) lane-dense views of the fused QKV
    # output, selected per (batch, head-group, q-tile) by BlockSpec index_maps.
    # The softmax scale is already folded into the query projection weights.
    q_all = q_ref[0]           # (tq, bw) bf16
    k_all = k_ref[0]           # (S_pad, bw) bf16
    v_all = v_ref[0]
    s_pad = k_all.shape[0]
    mask = None
    if s_valid < s_pad:        # static: mask zero-padded key positions
        col = jax.lax.broadcasted_iota(jnp.int32, (1, s_pad), 1)
        mask = col < s_valid
    outs = []
    for h in range(heads):
        lo, hi = h * head_dim, (h + 1) * head_dim
        q = q_all[:, lo:hi]
        k = k_all[:, lo:hi]
        v = v_all[:, lo:hi]
        s = jnp.dot(q, k.T, preferred_element_type=jnp.float32)   # (tq, S_pad)
        if mask is not None:
            s = jnp.where(mask, s, jnp.float32(-1e30))
        m = jnp.max(s, axis=-1, keepdims=True)
        p = jnp.exp(s - m)
        inv = 1.0 / jnp.sum(p, axis=-1, keepdims=True)
        p = (p * inv).astype(jnp.bfloat16)
        outs.append(jnp.dot(p, v, preferred_element_type=jnp.float32))
    o_ref[0] = jnp.concatenate(outs, axis=-1).astype(o_ref.dtype)


def attention(qkv, *, num_heads, head_dim, heads_per_block, tq, s_valid, vmem_limit):
    """qkv: (B, S_pad, 3*D) bf16 (q | k | v concatenated) -> context (B, S_pad, D)."""
    B, S_pad, threeD = qkv.shape
    D = threeD // 3
    G = num_heads // heads_per_block
    bw = heads_per_block * head_dim
    assert S_pad % tq == 0 and G * bw == D
    kern = functools.partial(_attention_kernel, heads=heads_per_block,
                             head_dim=head_dim, s_valid=s_valid)
    q_blk = (1, tq, bw)
    kv_blk = (1, S_pad, bw)
    return pl.pallas_call(
        kern,
        out_shape=jax.ShapeDtypeStruct((B, S_pad, D), jnp.bfloat16),
        grid_spec=pltpu.PrefetchScalarGridSpec(
            num_scalar_prefetch=0,
            grid=(B, G, S_pad // tq),          # q-tile innermost: K/V stay resident
            in_specs=[
                pl.BlockSpec(q_blk, lambda b, g, qi: (b, qi, g)),           # q
                pl.BlockSpec(kv_blk, lambda b, g, qi: (b, 0, G + g)),       # k
                pl.BlockSpec(kv_blk, lambda b, g, qi: (b, 0, 2 * G + g)),   # v
            ],
            out_specs=pl.BlockSpec(q_blk, lambda b, g, qi: (b, qi, g)),
        ),
        compiler_params=pltpu.CompilerParams(
            dimension_semantics=("parallel", "parallel", "parallel"),
            vmem_limit_bytes=vmem_limit,
        ),
    )(qkv, qkv, qkv)


# ------------------------------- Layer glue ----------------------------------


def dinov2_layer_forward(hidden, p, *, num_heads):
    """Dinov2Layer forward. Expects params prepared with fold_softmax_scale."""
    B, S, D = hidden.shape
    cfg = _chip_config()
    vmem = cfg["vmem_limit"]
    col_cap = cfg["col_cap"]
    head_dim = D // num_heads
    heads_per_block = _pick_heads_per_block(num_heads, head_dim)

    S_pad, M_pad, tm = _row_tiling(B, S, cfg["row_cap"])
    tq = _largest_aligned_divisor(S_pad, cfg["tq_cap"]) or S_pad

    if S_pad != S:
        hidden = jnp.pad(hidden, ((0, 0), (0, S_pad - S), (0, 0)))
    h2d = hidden.reshape(M_pad, D).astype(jnp.float32)   # fp32 residual stream

    # Attention block: LN -> fused QKV (scale pre-folded) -> MHSA ->
    #                  out-proj + LayerScale + residual + fused norm2.
    normed1 = layernorm(h2d, p["norm1_g"], p["norm1_b"], tm=tm, vmem_limit=vmem)
    qkv = linear_bias(normed1, p["w_qkv"], p["b_qkv"], tm=tm, col_cap=col_cap,
                      vmem_limit=vmem)
    ctx = attention(qkv.reshape(B, S_pad, 3 * D), num_heads=num_heads,
                    head_dim=head_dim, heads_per_block=heads_per_block,
                    tq=tq, s_valid=S, vmem_limit=vmem)
    h2d, normed2 = linear_scale_residual_norm(
        ctx.reshape(M_pad, D), p["wo"], p["bo"], p["ls1"], h2d,
        p["norm2_g"], p["norm2_b"], tm=tm, col_cap=col_cap, vmem_limit=vmem)

    # MLP block: fused (up-proj + SwiGLU gate) -> down-proj + LayerScale + residual.
    mid = swiglu_linear(normed2, p["w_in1"], p["b_in1"], p["w_in2"], p["b_in2"],
                        tm=tm, col_cap=col_cap, vmem_limit=vmem)
    out2d = linear_scale_residual(mid, p["w_out"], p["b_out"], p["ls2"], h2d,
                                  tm=tm, col_cap=col_cap, vmem_limit=vmem)

    out = out2d.reshape(B, S_pad, D)
    return out[:, :S, :] if S_pad != S else out


def fold_softmax_scale(params, num_heads):
    """Host-side param prep: fold 1/sqrt(head_dim) into the query columns of
    the fused QKV projection (removes the per-step scale from the kernel)."""
    D = params["norm1_g"].shape[0]
    head_dim = D // num_heads
    scale = float(head_dim) ** -0.5
    w, b = params["w_qkv"], params["b_qkv"]
    w_q = (w[:, :D].astype(jnp.float32) * scale).astype(w.dtype)
    b_q = (b[:D].astype(jnp.float32) * scale).astype(b.dtype)
    out = dict(params)
    out["w_qkv"] = jnp.concatenate([w_q, w[:, D:]], axis=1)
    out["b_qkv"] = jnp.concatenate([b_q, b[D:]], axis=0)
    return out


def init_layer_params(key, hidden_size, ffn_hidden, num_heads):
    D, F = hidden_size, ffn_hidden
    ks = jax.random.split(key, 18)
    std = 0.02

    def w(k, shape):  # weights stored bf16 (MXU-native, half HBM traffic)
        return (std * jax.random.normal(k, shape, dtype=jnp.float32)).astype(jnp.bfloat16)

    def b(k, n):
        return 0.02 * jax.random.normal(k, (n,), dtype=jnp.float32)

    wq, wk, wv = w(ks[0], (D, D)), w(ks[1], (D, D)), w(ks[2], (D, D))
    w_in = w(ks[3], (D, 2 * F))
    return {
        "norm1_g": 1.0 + 0.1 * jax.random.normal(ks[4], (D,), dtype=jnp.float32),
        "norm1_b": b(ks[5], D),
        "w_qkv": jnp.concatenate([wq, wk, wv], axis=1),   # fused (D, 3D)
        "b_qkv": b(ks[6], 3 * D),
        "wo": w(ks[7], (D, D)),
        "bo": b(ks[8], D),
        "ls1": 1.0 + 0.1 * jax.random.normal(ks[9], (D,), dtype=jnp.float32),
        "norm2_g": 1.0 + 0.1 * jax.random.normal(ks[10], (D,), dtype=jnp.float32),
        "norm2_b": b(ks[11], D),
        "w_in1": w_in[:, :F],
        "b_in1": b(ks[12], F),
        "w_in2": w_in[:, F:],
        "b_in2": b(ks[13], F),
        "w_out": w(ks[14], (F, D)),
        "b_out": b(ks[15], D),
        "ls2": 1.0 + 0.1 * jax.random.normal(ks[16], (D,), dtype=jnp.float32),
    }


# ------------------------------ JAX reference --------------------------------


def _reference_forward(hidden, p, num_heads):
    f32 = lambda t: t.astype(jnp.float32)

    def ln(x, g, b):
        mu = x.mean(-1, keepdims=True)
        var = ((x - mu) ** 2).mean(-1, keepdims=True)
        return (x - mu) / jnp.sqrt(var + 1e-6) * g + b

    B, S, D = hidden.shape
    Dh = D // num_heads
    scale = float(Dh) ** -0.5

    n1 = ln(hidden, p["norm1_g"], p["norm1_b"])
    qkv = n1 @ f32(p["w_qkv"]) + p["b_qkv"]
    q, k, v = jnp.split(qkv, 3, axis=-1)
    heads = lambda t: t.reshape(B, S, num_heads, Dh).transpose(0, 2, 1, 3)
    q, k, v = heads(q), heads(k), heads(v)
    s = jnp.einsum("bhqd,bhkd->bhqk", q, k) * scale
    w = jax.nn.softmax(s, axis=-1)
    ctx = jnp.einsum("bhqk,bhkd->bhqd", w, v).transpose(0, 2, 1, 3).reshape(B, S, D)
    attn = ctx @ f32(p["wo"]) + p["bo"]
    hidden = attn * p["ls1"] + hidden

    n2 = ln(hidden, p["norm2_g"], p["norm2_b"])
    x1 = n2 @ f32(p["w_in1"]) + p["b_in1"]
    x2 = n2 @ f32(p["w_in2"]) + p["b_in2"]
    mid = jax.nn.silu(x1) * x2
    mlp = mid @ f32(p["w_out"]) + p["b_out"]
    hidden = mlp * p["ls2"] + hidden
    return hidden


# ---------------------------------- main --------------------------------------


if __name__ == "__main__":
    # Small shapes consistent with the module structure: head_dim = 64 like the
    # real model (1536 / 24), SwiGLU inner projection = 2 * ffn_hidden.
    B, S = 2, 16
    hidden_size = 256
    num_heads = 4
    ffn_hidden = 512

    key = jax.random.PRNGKey(0)
    kx, kp = jax.random.split(key)
    x = jax.random.normal(kx, (B, S, hidden_size), dtype=jnp.float32)
    params = init_layer_params(kp, hidden_size, ffn_hidden, num_heads)
    kparams = fold_softmax_scale(params, num_heads)   # host-side param prep

    fwd = jax.jit(functools.partial(dinov2_layer_forward, num_heads=num_heads))
    out = jax.block_until_ready(fwd(x, kparams))

    ref = _reference_forward(x, params, num_heads)
    assert out.shape == (B, S, hidden_size)
    max_err = float(jnp.max(jnp.abs(out - ref)))
    assert jnp.allclose(out, ref, rtol=2e-2, atol=2e-2), (
        f"mismatch vs reference (max abs err {max_err})")

    print("KERNEL_OK")
</pallas_src>

<mosaic_0001>
module attributes {stable_mosaic.version = 11 : i64} {
  func.func @_layernorm_kernel(%arg0: i32, %arg1: memref<32x256xf32, #tpu.memory_space<vmem>>, %arg2: memref<1x256xf32, #tpu.memory_space<vmem>>, %arg3: memref<1x256xf32, #tpu.memory_space<vmem>>, %arg4: memref<32x256xbf16, #tpu.memory_space<vmem>>) attributes {dimension_semantics = [#tpu.dimension_semantics<parallel>], iteration_bounds = array<i64: 1>, scalar_prefetch = 0 : i64, scratch_operands = 0 : i64, tpu.core_type = #tpu.core_type<tc>, window_params = [{transform_indices = @transform_0, window_bounds = array<i64: 32, 256>}, {pipeline_mode = #tpu.pipeline_mode<synchronous>, transform_indices = @transform_1, window_bounds = array<i64: 1, 256>}, {pipeline_mode = #tpu.pipeline_mode<synchronous>, transform_indices = @transform_2, window_bounds = array<i64: 1, 256>}, {transform_indices = @transform_3, window_bounds = array<i64: 32, 256>}]} {
    %c0 = arith.constant 0 : index
    %c0_0 = arith.constant 0 : index
    %0 = vector.load %arg1[%c0, %c0_0] : memref<32x256xf32, #tpu.memory_space<vmem>>, vector<32x256xf32>
    %cst = arith.constant dense<0.000000e+00> : vector<32xf32>
    %1 = vector.multi_reduction <add>, %0, %cst [1] : vector<32x256xf32> to vector<32xf32>
    %2 = vector.shape_cast %1 : vector<32xf32> to vector<32x1xf32>
    %cst_1 = arith.constant 2.560000e+02 : f32
    %3 = vector.broadcast %cst_1 : f32 to vector<32x1xf32>
    %4 = arith.divf %2, %3 : vector<32x1xf32>
    %5 = vector.broadcast %4 : vector<32x1xf32> to vector<32x256xf32>
    %6 = arith.subf %0, %5 : vector<32x256xf32>
    %7 = arith.mulf %6, %6 : vector<32x256xf32>
    %cst_2 = arith.constant dense<0.000000e+00> : vector<32xf32>
    %8 = vector.multi_reduction <add>, %7, %cst_2 [1] : vector<32x256xf32> to vector<32xf32>
    %9 = vector.shape_cast %8 : vector<32xf32> to vector<32x1xf32>
    %cst_3 = arith.constant 2.560000e+02 : f32
    %10 = vector.broadcast %cst_3 : f32 to vector<32x1xf32>
    %11 = arith.divf %9, %10 : vector<32x1xf32>
    %cst_4 = arith.constant 9.99999997E-7 : f32
    %12 = vector.broadcast %cst_4 : f32 to vector<32x1xf32>
    %13 = arith.addf %11, %12 : vector<32x1xf32>
    %14 = math.rsqrt %13 : vector<32x1xf32>
    %15 = vector.broadcast %14 : vector<32x1xf32> to vector<32x256xf32>
    %16 = arith.mulf %6, %15 : vector<32x256xf32>
    %c0_5 = arith.constant 0 : index
    %c0_6 = arith.constant 0 : index
    %17 = vector.load %arg2[%c0_5, %c0_6] : memref<1x256xf32, #tpu.memory_space<vmem>>, vector<1x256xf32>
    %18 = vector.broadcast %17 : vector<1x256xf32> to vector<32x256xf32>
    %19 = arith.mulf %16, %18 : vector<32x256xf32>
    %c0_7 = arith.constant 0 : index
    %c0_8 = arith.constant 0 : index
    %20 = vector.load %arg3[%c0_7, %c0_8] : memref<1x256xf32, #tpu.memory_space<vmem>>, vector<1x256xf32>
    %21 = vector.broadcast %20 : vector<1x256xf32> to vector<32x256xf32>
    %22 = arith.addf %19, %21 : vector<32x256xf32>
    %23 = arith.truncf %22 : vector<32x256xf32> to vector<32x256xbf16>
    %c0_9 = arith.constant 0 : index
    %c0_10 = arith.constant 0 : index
    %24 = vector.load %arg4[%c0_9, %c0_10] : memref<32x256xbf16, #tpu.memory_space<vmem>>, vector<32x256xbf16>
    tpu.vector_store %arg4[%c0_9, %c0_10], %23 {strides = array<i32>} : memref<32x256xbf16, #tpu.memory_space<vmem>>, vector<32x256xbf16>,
    return
  }
  func.func @transform_0(%arg0: i32) -> (i32, i32) {
    %c0_i32 = arith.constant 0 : i32
    %c0_i32_0 = arith.constant 0 : i32
    return %arg0, %c0_i32 : i32, i32
  }
  func.func @transform_1(%arg0: i32) -> (i32, i32) {
    %c0_i32 = arith.constant 0 : i32
    %c0_i32_0 = arith.constant 0 : i32
    %c0_i32_1 = arith.constant 0 : i32
    return %c0_i32, %c0_i32_0 : i32, i32
  }
  func.func @transform_2(%arg0: i32) -> (i32, i32) {
    %c0_i32 = arith.constant 0 : i32
    %c0_i32_0 = arith.constant 0 : i32
    %c0_i32_1 = arith.constant 0 : i32
    return %c0_i32, %c0_i32_0 : i32, i32
  }
  func.func @transform_3(%arg0: i32) -> (i32, i32) {
    %c0_i32 = arith.constant 0 : i32
    %c0_i32_0 = arith.constant 0 : i32
    return %arg0, %c0_i32 : i32, i32
  }
}

module attributes {stable_mosaic.version = 11 : i64} {
  func.func @_matmul_bias_kernel(%arg0: i32, %arg1: i32, %arg2: i32, %arg3: memref<32x256xbf16, #tpu.memory_space<vmem>>, %arg4: memref<256x256xbf16, #tpu.memory_space<vmem>>, %arg5: memref<1x256xf32, #tpu.memory_space<vmem>>, %arg6: memref<32x256xbf16, #tpu.memory_space<vmem>>, %arg7: memref<32x256xf32, #tpu.memory_space<vmem>>) attributes {dimension_semantics = [#tpu.dimension_semantics<parallel>, #tpu.dimension_semantics<parallel>, #tpu.dimension_semantics<arbitrary>], iteration_bounds = array<i64: 1, 3, 1>, scalar_prefetch = 0 : i64, scratch_operands = 1 : i64, tpu.core_type = #tpu.core_type<tc>, window_params = [{transform_indices = @transform_0, window_bounds = array<i64: 32, 256>}, {transform_indices = @transform_1, window_bounds = array<i64: 256, 256>}, {transform_indices = @transform_2, window_bounds = array<i64: 1, 256>}, {transform_indices = @transform_3, window_bounds = array<i64: 32, 256>}]} {
    %c0_i32 = arith.constant 0 : i32
    %0 = arith.cmpi eq, %arg2, %c0_i32 : i32
    %1 = arith.extui %0 : i1 to i32
    %c0_i32_0 = arith.constant 0 : i32
    %2 = arith.cmpi ne, %1, %c0_i32_0 : i32
    scf.if %2 {
      %cst_10 = arith.constant 0.000000e+00 : f32
      %12 = vector.broadcast %cst_10 : f32 to vector<32x256xf32>
      %c0_11 = arith.constant 0 : index
      %c0_12 = arith.constant 0 : index
      %13 = vector.load %arg7[%c0_11, %c0_12] : memref<32x256xf32, #tpu.memory_space<vmem>>, vector<32x256xf32>
      tpu.vector_store %arg7[%c0_11, %c0_12], %12 {strides = array<i32>} : memref<32x256xf32, #tpu.memory_space<vmem>>, vector<32x256xf32>,
    } else {
    }
    %c0 = arith.constant 0 : index
    %c0_1 = arith.constant 0 : index
    %3 = vector.load %arg7[%c0, %c0_1] : memref<32x256xf32, #tpu.memory_space<vmem>>, vector<32x256xf32>
    %c0_2 = arith.constant 0 : index
    %c0_3 = arith.constant 0 : index
    %4 = vector.load %arg3[%c0_2, %c0_3] : memref<32x256xbf16, #tpu.memory_space<vmem>>, vector<32x256xbf16>
    %c0_4 = arith.constant 0 : index
    %c0_5 = arith.constant 0 : index
    %5 = vector.load %arg4[%c0_4, %c0_5] : memref<256x256xbf16, #tpu.memory_space<vmem>>, vector<256x256xbf16>
    %cst = arith.constant dense<0.000000e+00> : vector<32x256xf32>
    %6 = tpu.matmul %4, %5, %cst {dimension_numbers = #tpu.dot_dimension_numbers<[1], [0], [0], [1], [0, 0, 1, 1], [], []>} : vector<32x256xbf16>, vector<256x256xbf16>, vector<32x256xf32> -> vector<32x256xf32>
    %7 = arith.addf %3, %6 : vector<32x256xf32>
    %c0_6 = arith.constant 0 : index
    %c0_7 = arith.constant 0 : index
    %8 = vector.load %arg7[%c0_6, %c0_7] : memref<32x256xf32, #tpu.memory_space<vmem>>, vector<32x256xf32>
    tpu.vector_store %arg7[%c0_6, %c0_7], %7 {strides = array<i32>} : memref<32x256xf32, #tpu.memory_space<vmem>>, vector<32x256xf32>,
    %c0_i32_8 = arith.constant 0 : i32
    %9 = arith.cmpi eq, %arg2, %c0_i32_8 : i32
    %10 = arith.extui %9 : i1 to i32
    %c0_i32_9 = arith.constant 0 : i32
    %11 = arith.cmpi ne, %10, %c0_i32_9 : i32
    scf.if %11 {
      %c0_10 = arith.constant 0 : index
      %c0_11 = arith.constant 0 : index
      %12 = vector.load %arg7[%c0_10, %c0_11] : memref<32x256xf32, #tpu.memory_space<vmem>>, vector<32x256xf32>
      %c0_12 = arith.constant 0 : index
      %c0_13 = arith.constant 0 : index
      %13 = vector.load %arg5[%c0_12, %c0_13] : memref<1x256xf32, #tpu.memory_space<vmem>>, vector<1x256xf32>
      %14 = vector.broadcast %13 : vector<1x256xf32> to vector<32x256xf32>
      %15 = arith.addf %12, %14 : vector<32x256xf32>
      %16 = arith.truncf %15 : vector<32x256xf32> to vector<32x256xbf16>
      %c0_14 = arith.constant 0 : index
      %c0_15 = arith.constant 0 : index
      %17 = vector.load %arg6[%c0_14, %c0_15] : memref<32x256xbf16, #tpu.memory_space<vmem>>, vector<32x256xbf16>
      tpu.vector_store %arg6[%c0_14, %c0_15], %16 {strides = array<i32>} : memref<32x256xbf16, #tpu.memory_space<vmem>>, vector<32x256xbf16>,
    } else {
    }
    return
  }
  func.func @transform_0(%arg0: i32, %arg1: i32, %arg2: i32) -> (i32, i32) {
    %c0_i32 = arith.constant 0 : i32
    return %arg0, %arg2 : i32, i32
  }
  func.func @transform_1(%arg0: i32, %arg1: i32, %arg2: i32) -> (i32, i32) {
    %c0_i32 = arith.constant 0 : i32
    return %arg2, %arg1 : i32, i32
  }
  func.func @transform_2(%arg0: i32, %arg1: i32, %arg2: i32) -> (i32, i32) {
    %c0_i32 = arith.constant 0 : i32
    %c0_i32_0 = arith.constant 0 : i32
    return %c0_i32, %arg1 : i32, i32
  }
  func.func @transform_3(%arg0: i32, %arg1: i32, %arg2: i32) -> (i32, i32) {
    %c0_i32 = arith.constant 0 : i32
    return %arg0, %arg1 : i32, i32
  }
}

module attributes {stable_mosaic.version = 11 : i64} {
  func.func @_attention_kernel(%arg0: i32, %arg1: i32, %arg2: i32, %arg3: memref<1x16x128xbf16, #tpu.memory_space<vmem>>, %arg4: memref<1x16x128xbf16, #tpu.memory_space<vmem>>, %arg5: memref<1x16x128xbf16, #tpu.memory_space<vmem>>, %arg6: memref<1x16x128xbf16, #tpu.memory_space<vmem>>) attributes {dimension_semantics = [#tpu.dimension_semantics<parallel>, #tpu.dimension_semantics<parallel>, #tpu.dimension_semantics<parallel>], iteration_bounds = array<i64: 2, 2, 1>, scalar_prefetch = 0 : i64, scratch_operands = 0 : i64, tpu.core_type = #tpu.core_type<tc>, window_params = [{transform_indices = @transform_0, window_bounds = array<i64: 1, 16, 128>}, {transform_indices = @transform_1, window_bounds = array<i64: 1, 16, 128>}, {transform_indices = @transform_2, window_bounds = array<i64: 1, 16, 128>}, {transform_indices = @transform_3, window_bounds = array<i64: 1, 16, 128>}]} {
    %c0 = arith.constant 0 : index
    %c0_0 = arith.constant 0 : index
    %c0_1 = arith.constant 0 : index
    %0 = vector.load %arg3[%c0, %c0_0, %c0_1] : memref<1x16x128xbf16, #tpu.memory_space<vmem>>, vector<1x16x128xbf16>
    %1 = vector.shape_cast %0 : vector<1x16x128xbf16> to vector<16x128xbf16>
    %c0_2 = arith.constant 0 : index
    %c0_3 = arith.constant 0 : index
    %c0_4 = arith.constant 0 : index
    %2 = vector.load %arg4[%c0_2, %c0_3, %c0_4] : memref<1x16x128xbf16, #tpu.memory_space<vmem>>, vector<1x16x128xbf16>
    %3 = vector.shape_cast %2 : vector<1x16x128xbf16> to vector<16x128xbf16>
    %c0_5 = arith.constant 0 : index
    %c0_6 = arith.constant 0 : index
    %c0_7 = arith.constant 0 : index
    %4 = vector.load %arg5[%c0_5, %c0_6, %c0_7] : memref<1x16x128xbf16, #tpu.memory_space<vmem>>, vector<1x16x128xbf16>
    %5 = vector.shape_cast %4 : vector<1x16x128xbf16> to vector<16x128xbf16>
    %6 = vector.extract_strided_slice %1 {offsets = [0, 0], sizes = [16, 64], strides = [1, 1]} : vector<16x128xbf16> to vector<16x64xbf16>
    %7 = vector.extract_strided_slice %3 {offsets = [0, 0], sizes = [16, 64], strides = [1, 1]} : vector<16x128xbf16> to vector<16x64xbf16>
    %8 = vector.extract_strided_slice %5 {offsets = [0, 0], sizes = [16, 64], strides = [1, 1]} : vector<16x128xbf16> to vector<16x64xbf16>
    %9 = tpu.transpose %7, [1, 0] : vector<16x64xbf16> -> vector<64x16xbf16>
    %cst = arith.constant dense<0.000000e+00> : vector<16x16xf32>
    %10 = tpu.matmul %6, %9, %cst {dimension_numbers = #tpu.dot_dimension_numbers<[1], [0], [0], [1], [0, 0, 1, 1], [], []>} : vector<16x64xbf16>, vector<64x16xbf16>, vector<16x16xf32> -> vector<16x16xf32>
    %cst_8 = arith.constant dense<0xFF800000> : vector<16xf32>
    %11 = vector.multi_reduction <maximumf>, %10, %cst_8 [1] : vector<16x16xf32> to vector<16xf32>
    %12 = vector.shape_cast %11 : vector<16xf32> to vector<16x1xf32>
    %13 = vector.broadcast %12 : vector<16x1xf32> to vector<16x16xf32>
    %14 = arith.subf %10, %13 : vector<16x16xf32>
    %15 = math.exp %14 : vector<16x16xf32>
    %cst_9 = arith.constant dense<0.000000e+00> : vector<16xf32>
    %16 = vector.multi_reduction <add>, %15, %cst_9 [1] : vector<16x16xf32> to vector<16xf32>
    %17 = vector.shape_cast %16 : vector<16xf32> to vector<16x1xf32>
    %cst_10 = arith.constant 1.000000e+00 : f32
    %18 = vector.broadcast %cst_10 : f32 to vector<16x1xf32>
    %19 = arith.divf %18, %17 : vector<16x1xf32>
    %20 = vector.broadcast %19 : vector<16x1xf32> to vector<16x16xf32>
    %21 = arith.mulf %15, %20 : vector<16x16xf32>
    %22 = arith.truncf %21 : vector<16x16xf32> to vector<16x16xbf16>
    %cst_11 = arith.constant dense<0.000000e+00> : vector<16x64xf32>
    %23 = tpu.matmul %22, %8, %cst_11 {dimension_numbers = #tpu.dot_dimension_numbers<[1], [0], [0], [1], [0, 0, 1, 1], [], []>} : vector<16x16xbf16>, vector<16x64xbf16>, vector<16x64xf32> -> vector<16x64xf32>
    %24 = vector.extract_strided_slice %1 {offsets = [0, 64], sizes = [16, 64], strides = [1, 1]} : vector<16x128xbf16> to vector<16x64xbf16>
    %25 = vector.extract_strided_slice %3 {offsets = [0, 64], sizes = [16, 64], strides = [1, 1]} : vector<16x128xbf16> to vector<16x64xbf16>
    %26 = vector.extract_strided_slice %5 {offsets = [0, 64], sizes = [16, 64], strides = [1, 1]} : vector<16x128xbf16> to vector<16x64xbf16>
    %27 = tpu.transpose %25, [1, 0] : vector<16x64xbf16> -> vector<64x16xbf16>
    %cst_12 = arith.constant dense<0.000000e+00> : vector<16x16xf32>
    %28 = tpu.matmul %24, %27, %cst_12 {dimension_numbers = #tpu.dot_dimension_numbers<[1], [0], [0], [1], [0, 0, 1, 1], [], []>} : vector<16x64xbf16>, vector<64x16xbf16>, vector<16x16xf32> -> vector<16x16xf32>
    %cst_13 = arith.constant dense<0xFF800000> : vector<16xf32>
    %29 = vector.multi_reduction <maximumf>, %28, %cst_13 [1] : vector<16x16xf32> to vector<16xf32>
    %30 = vector.shape_cast %29 : vector<16xf32> to vector<16x1xf32>
    %31 = vector.broadcast %30 : vector<16x1xf32> to vector<16x16xf32>
    %32 = arith.subf %28, %31 : vector<16x16xf32>
    %33 = math.exp %32 : vector<16x16xf32>
    %cst_14 = arith.constant dense<0.000000e+00> : vector<16xf32>
    %34 = vector.multi_reduction <add>, %33, %cst_14 [1] : vector<16x16xf32> to vector<16xf32>
    %35 = vector.shape_cast %34 : vector<16xf32> to vector<16x1xf32>
    %cst_15 = arith.constant 1.000000e+00 : f32
    %36 = vector.broadcast %cst_15 : f32 to vector<16x1xf32>
    %37 = arith.divf %36, %35 : vector<16x1xf32>
    %38 = vector.broadcast %37 : vector<16x1xf32> to vector<16x16xf32>
    %39 = arith.mulf %33, %38 : vector<16x16xf32>
    %40 = arith.truncf %39 : vector<16x16xf32> to vector<16x16xbf16>
    %cst_16 = arith.constant dense<0.000000e+00> : vector<16x64xf32>
    %41 = tpu.matmul %40, %26, %cst_16 {dimension_numbers = #tpu.dot_dimension_numbers<[1], [0], [0], [1], [0, 0, 1, 1], [], []>} : vector<16x16xbf16>, vector<16x64xbf16>, vector<16x64xf32> -> vector<16x64xf32>
    %42 = tpu.concatenate %23, %41 in 1 : vector<16x64xf32>, vector<16x64xf32> -> vector<16x128xf32>
    %43 = arith.truncf %42 : vector<16x128xf32> to vector<16x128xbf16>
    %c0_17 = arith.constant 0 : index
    %c0_18 = arith.constant 0 : index
    %c0_19 = arith.constant 0 : index
    %44 = vector.load %arg6[%c0_17, %c0_18, %c0_19] : memref<1x16x128xbf16, #tpu.memory_space<vmem>>, vector<1x16x128xbf16>
    %45 = vector.shape_cast %44 : vector<1x16x128xbf16> to vector<16x128xbf16>
    %46 = vector.shape_cast %43 : vector<16x128xbf16> to vector<1x16x128xbf16>
    tpu.vector_store %arg6[%c0_17, %c0_18, %c0_19], %46 {strides = array<i32>} : memref<1x16x128xbf16, #tpu.memory_space<vmem>>, vector<1x16x128xbf16>,
    return
  }
  func.func @transform_0(%arg0: i32, %arg1: i32, %arg2: i32) -> (i32, i32, i32) {
    %c0_i32 = arith.constant 0 : i32
    return %arg0, %arg2, %arg1 : i32, i32, i32
  }
  func.func @transform_1(%arg0: i32, %arg1: i32, %arg2: i32) -> (i32, i32, i32) {
    %c2_i32 = arith.constant 2 : i32
    %0 = arith.addi %c2_i32, %arg1 : i32
    %c0_i32 = arith.constant 0 : i32
    %c0_i32_0 = arith.constant 0 : i32
    return %arg0, %c0_i32, %0 : i32, i32, i32
  }
  func.func @transform_2(%arg0: i32, %arg1: i32, %arg2: i32) -> (i32, i32, i32) {
    %c4_i32 = arith.constant 4 : i32
    %0 = arith.addi %c4_i32, %arg1 : i32
    %c0_i32 = arith.constant 0 : i32
    %c0_i32_0 = arith.constant 0 : i32
    return %arg0, %c0_i32, %0 : i32, i32, i32
  }
  func.func @transform_3(%arg0: i32, %arg1: i32, %arg2: i32) -> (i32, i32, i32) {
    %c0_i32 = arith.constant 0 : i32
    return %arg0, %arg2, %arg1 : i32, i32, i32
  }
}

module attributes {stable_mosaic.version = 11 : i64} {
  func.func @_matmul_scale_res_norm_kernel(%arg0: i32, %arg1: i32, %arg2: memref<32x256xbf16, #tpu.memory_space<vmem>>, %arg3: memref<256x256xbf16, #tpu.memory_space<vmem>>, %arg4: memref<1x256xf32, #tpu.memory_space<vmem>>, %arg5: memref<1x256xf32, #tpu.memory_space<vmem>>, %arg6: memref<32x256xf32, #tpu.memory_space<vmem>>, %arg7: memref<1x256xf32, #tpu.memory_space<vmem>>, %arg8: memref<1x256xf32, #tpu.memory_space<vmem>>, %arg9: memref<32x256xf32, #tpu.memory_space<vmem>>, %arg10: memref<32x256xbf16, #tpu.memory_space<vmem>>, %arg11: memref<32x256xf32, #tpu.memory_space<vmem>>) attributes {dimension_semantics = [#tpu.dimension_semantics<parallel>, #tpu.dimension_semantics<arbitrary>], iteration_bounds = array<i64: 1, 1>, scalar_prefetch = 0 : i64, scratch_operands = 1 : i64, tpu.core_type = #tpu.core_type<tc>, window_params = [{transform_indices = @transform_0, window_bounds = array<i64: 32, 256>}, {transform_indices = @transform_1, window_bounds = array<i64: 256, 256>}, {pipeline_mode = #tpu.pipeline_mode<synchronous>, transform_indices = @transform_2, window_bounds = array<i64: 1, 256>}, {pipeline_mode = #tpu.pipeline_mode<synchronous>, transform_indices = @transform_3, window_bounds = array<i64: 1, 256>}, {transform_indices = @transform_4, window_bounds = array<i64: 32, 256>}, {pipeline_mode = #tpu.pipeline_mode<synchronous>, transform_indices = @transform_5, window_bounds = array<i64: 1, 256>}, {pipeline_mode = #tpu.pipeline_mode<synchronous>, transform_indices = @transform_6, window_bounds = array<i64: 1, 256>}, {transform_indices = @transform_7, window_bounds = array<i64: 32, 256>}, {transform_indices = @transform_8, window_bounds = array<i64: 32, 256>}]} {
    %c0_i32 = arith.constant 0 : i32
    %0 = arith.cmpi eq, %arg1, %c0_i32 : i32
    %1 = arith.extui %0 : i1 to i32
    %c0_i32_0 = arith.constant 0 : i32
    %2 = arith.cmpi ne, %1, %c0_i32_0 : i32
    scf.if %2 {
      %cst_10 = arith.constant 0.000000e+00 : f32
      %12 = vector.broadcast %cst_10 : f32 to vector<32x256xf32>
      %c0_11 = arith.constant 0 : index
      %c0_12 = arith.constant 0 : index
      %13 = vector.load %arg11[%c0_11, %c0_12] : memref<32x256xf32, #tpu.memory_space<vmem>>, vector<32x256xf32>
      tpu.vector_store %arg11[%c0_11, %c0_12], %12 {strides = array<i32>} : memref<32x256xf32, #tpu.memory_space<vmem>>, vector<32x256xf32>,
    } else {
    }
    %c0 = arith.constant 0 : index
    %c0_1 = arith.constant 0 : index
    %3 = vector.load %arg11[%c0, %c0_1] : memref<32x256xf32, #tpu.memory_space<vmem>>, vector<32x256xf32>
    %c0_2 = arith.constant 0 : index
    %c0_3 = arith.constant 0 : index
    %4 = vector.load %arg2[%c0_2, %c0_3] : memref<32x256xbf16, #tpu.memory_space<vmem>>, vector<32x256xbf16>
    %c0_4 = arith.constant 0 : index
    %c0_5 = arith.constant 0 : index
    %5 = vector.load %arg3[%c0_4, %c0_5] : memref<256x256xbf16, #tpu.memory_space<vmem>>, vector<256x256xbf16>
    %cst = arith.constant dense<0.000000e+00> : vector<32x256xf32>
    %6 = tpu.matmul %4, %5, %cst {dimension_numbers = #tpu.dot_dimension_numbers<[1], [0], [0], [1], [0, 0, 1, 1], [], []>} : vector<32x256xbf16>, vector<256x256xbf16>, vector<32x256xf32> -> vector<32x256xf32>
    %7 = arith.addf %3, %6 : vector<32x256xf32>
    %c0_6 = arith.constant 0 : index
    %c0_7 = arith.constant 0 : index
    %8 = vector.load %arg11[%c0_6, %c0_7] : memref<32x256xf32, #tpu.memory_space<vmem>>, vector<32x256xf32>
    tpu.vector_store %arg11[%c0_6, %c0_7], %7 {strides = array<i32>} : memref<32x256xf32, #tpu.memory_space<vmem>>, vector<32x256xf32>,
    %c0_i32_8 = arith.constant 0 : i32
    %9 = arith.cmpi eq, %arg1, %c0_i32_8 : i32
    %10 = arith.extui %9 : i1 to i32
    %c0_i32_9 = arith.constant 0 : i32
    %11 = arith.cmpi ne, %10, %c0_i32_9 : i32
    scf.if %11 {
      %c0_10 = arith.constant 0 : index
      %c0_11 = arith.constant 0 : index
      %12 = vector.load %arg11[%c0_10, %c0_11] : memref<32x256xf32, #tpu.memory_space<vmem>>, vector<32x256xf32>
      %c0_12 = arith.constant 0 : index
      %c0_13 = arith.constant 0 : index
      %13 = vector.load %arg4[%c0_12, %c0_13] : memref<1x256xf32, #tpu.memory_space<vmem>>, vector<1x256xf32>
      %14 = vector.broadcast %13 : vector<1x256xf32> to vector<32x256xf32>
      %15 = arith.addf %12, %14 : vector<32x256xf32>
      %c0_14 = arith.constant 0 : index
      %c0_15 = arith.constant 0 : index
      %16 = vector.load %arg5[%c0_14, %c0_15] : memref<1x256xf32, #tpu.memory_space<vmem>>, vector<1x256xf32>
      %17 = vector.broadcast %16 : vector<1x256xf32> to vector<32x256xf32>
      %18 = arith.mulf %15, %17 : vector<32x256xf32>
      %c0_16 = arith.constant 0 : index
      %c0_17 = arith.constant 0 : index
      %19 = vector.load %arg6[%c0_16, %c0_17] : memref<32x256xf32, #tpu.memory_space<vmem>>, vector<32x256xf32>
      %20 = arith.addf %18, %19 : vector<32x256xf32>
      %c0_18 = arith.constant 0 : index
      %c0_19 = arith.constant 0 : index
      %21 = vector.load %arg9[%c0_18, %c0_19] : memref<32x256xf32, #tpu.memory_space<vmem>>, vector<32x256xf32>
      tpu.vector_store %arg9[%c0_18, %c0_19], %20 {strides = array<i32>} : memref<32x256xf32, #tpu.memory_space<vmem>>, vector<32x256xf32>,
      %cst_20 = arith.constant dense<0.000000e+00> : vector<32xf32>
      %22 = vector.multi_reduction <add>, %20, %cst_20 [1] : vector<32x256xf32> to vector<32xf32>
      %23 = vector.shape_cast %22 : vector<32xf32> to vector<32x1xf32>
      %cst_21 = arith.constant 2.560000e+02 : f32
      %24 = vector.broadcast %cst_21 : f32 to vector<32x1xf32>
      %25 = arith.divf %23, %24 : vector<32x1xf32>
      %26 = vector.broadcast %25 : vector<32x1xf32> to vector<32x256xf32>
      %27 = arith.subf %20, %26 : vector<32x256xf32>
      %28 = arith.mulf %27, %27 : vector<32x256xf32>
      %cst_22 = arith.constant dense<0.000000e+00> : vector<32xf32>
      %29 = vector.multi_reduction <add>, %28, %cst_22 [1] : vector<32x256xf32> to vector<32xf32>
      %30 = vector.shape_cast %29 : vector<32xf32> to vector<32x1xf32>
      %cst_23 = arith.constant 2.560000e+02 : f32
      %31 = vector.broadcast %cst_23 : f32 to vector<32x1xf32>
      %32 = arith.divf %30, %31 : vector<32x1xf32>
      %cst_24 = arith.constant 9.99999997E-7 : f32
      %33 = vector.broadcast %cst_24 : f32 to vector<32x1xf32>
      %34 = arith.addf %32, %33 : vector<32x1xf32>
      %35 = math.rsqrt %34 : vector<32x1xf32>
      %36 = vector.broadcast %35 : vector<32x1xf32> to vector<32x256xf32>
      %37 = arith.mulf %27, %36 : vector<32x256xf32>
      %c0_25 = arith.constant 0 : index
      %c0_26 = arith.constant 0 : index
      %38 = vector.load %arg7[%c0_25, %c0_26] : memref<1x256xf32, #tpu.memory_space<vmem>>, vector<1x256xf32>
      %39 = vector.broadcast %38 : vector<1x256xf32> to vector<32x256xf32>
      %40 = arith.mulf %37, %39 : vector<32x256xf32>
      %c0_27 = arith.constant 0 : index
      %c0_28 = arith.constant 0 : index
      %41 = vector.load %arg8[%c0_27, %c0_28] : memref<1x256xf32, #tpu.memory_space<vmem>>, vector<1x256xf32>
      %42 = vector.broadcast %41 : vector<1x256xf32> to vector<32x256xf32>
      %43 = arith.addf %40, %42 : vector<32x256xf32>
      %44 = arith.truncf %43 : vector<32x256xf32> to vector<32x256xbf16>
      %c0_29 = arith.constant 0 : index
      %c0_30 = arith.constant 0 : index
      %45 = vector.load %arg10[%c0_29, %c0_30] : memref<32x256xbf16, #tpu.memory_space<vmem>>, vector<32x256xbf16>
      tpu.vector_store %arg10[%c0_29, %c0_30], %44 {strides = array<i32>} : memref<32x256xbf16, #tpu.memory_space<vmem>>, vector<32x256xbf16>,
    } else {
    }
    return
  }
  func.func @transform_0(%arg0: i32, %arg1: i32) -> (i32, i32) {
    %c0_i32 = arith.constant 0 : i32
    return %arg0, %arg1 : i32, i32
  }
  func.func @transform_1(%arg0: i32, %arg1: i32) -> (i32, i32) {
    %c0_i32 = arith.constant 0 : i32
    %c0_i32_0 = arith.constant 0 : i32
    return %arg1, %c0_i32 : i32, i32
  }
  func.func @transform_2(%arg0: i32, %arg1: i32) -> (i32, i32) {
    %c0_i32 = arith.constant 0 : i32
    %c0_i32_0 = arith.constant 0 : i32
    %c0_i32_1 = arith.constant 0 : i32
    return %c0_i32, %c0_i32_0 : i32, i32
  }
  func.func @transform_3(%arg0: i32, %arg1: i32) -> (i32, i32) {
    %c0_i32 = arith.constant 0 : i32
    %c0_i32_0 = arith.constant 0 : i32
    %c0_i32_1 = arith.constant 0 : i32
    return %c0_i32, %c0_i32_0 : i32, i32
  }
  func.func @transform_4(%arg0: i32, %arg1: i32) -> (i32, i32) {
    %c0_i32 = arith.constant 0 : i32
    %c0_i32_0 = arith.constant 0 : i32
    return %arg0, %c0_i32 : i32, i32
  }
  func.func @transform_5(%arg0: i32, %arg1: i32) -> (i32, i32) {
    %c0_i32 = arith.constant 0 : i32
    %c0_i32_0 = arith.constant 0 : i32
    %c0_i32_1 = arith.constant 0 : i32
    return %c0_i32, %c0_i32_0 : i32, i32
  }
  func.func @transform_6(%arg0: i32, %arg1: i32) -> (i32, i32) {
    %c0_i32 = arith.constant 0 : i32
    %c0_i32_0 = arith.constant 0 : i32
    %c0_i32_1 = arith.constant 0 : i32
    return %c0_i32, %c0_i32_0 : i32, i32
  }
  func.func @transform_7(%arg0: i32, %arg1: i32) -> (i32, i32) {
    %c0_i32 = arith.constant 0 : i32
    %c0_i32_0 = arith.constant 0 : i32
    return %arg0, %c0_i32 : i32, i32
  }
  func.func @transform_8(%arg0: i32, %arg1: i32) -> (i32, i32) {
    %c0_i32 = arith.constant 0 : i32
    %c0_i32_0 = arith.constant 0 : i32
    return %arg0, %c0_i32 : i32, i32
  }
}

module attributes {stable_mosaic.version = 11 : i64} {
  func.func @_gated_matmul_kernel(%arg0: i32, %arg1: i32, %arg2: i32, %arg3: memref<32x256xbf16, #tpu.memory_space<vmem>>, %arg4: memref<256x512xbf16, #tpu.memory_space<vmem>>, %arg5: memref<1x512xf32, #tpu.memory_space<vmem>>, %arg6: memref<256x512xbf16, #tpu.memory_space<vmem>>, %arg7: memref<1x512xf32, #tpu.memory_space<vmem>>, %arg8: memref<32x512xbf16, #tpu.memory_space<vmem>>, %arg9: memref<32x512xf32, #tpu.memory_space<vmem>>, %arg10: memref<32x512xf32, #tpu.memory_space<vmem>>) attributes {dimension_semantics = [#tpu.dimension_semantics<parallel>, #tpu.dimension_semantics<parallel>, #tpu.dimension_semantics<arbitrary>], iteration_bounds = array<i64: 1, 1, 1>, scalar_prefetch = 0 : i64, scratch_operands = 2 : i64, tpu.core_type = #tpu.core_type<tc>, window_params = [{transform_indices = @transform_0, window_bounds = array<i64: 32, 256>}, {transform_indices = @transform_1, window_bounds = array<i64: 256, 512>}, {transform_indices = @transform_2, window_bounds = array<i64: 1, 512>}, {transform_indices = @transform_3, window_bounds = array<i64: 256, 512>}, {transform_indices = @transform_4, window_bounds = array<i64: 1, 512>}, {transform_indices = @transform_5, window_bounds = array<i64: 32, 512>}]} {
    %c0_i32 = arith.constant 0 : i32
    %0 = arith.cmpi eq, %arg2, %c0_i32 : i32
    %1 = arith.extui %0 : i1 to i32
    %c0_i32_0 = arith.constant 0 : i32
    %2 = arith.cmpi ne, %1, %c0_i32_0 : i32
    scf.if %2 {
      %cst_17 = arith.constant 0.000000e+00 : f32
      %17 = vector.broadcast %cst_17 : f32 to vector<32x512xf32>
      %c0_18 = arith.constant 0 : index
      %c0_19 = arith.constant 0 : index
      %18 = vector.load %arg9[%c0_18, %c0_19] : memref<32x512xf32, #tpu.memory_space<vmem>>, vector<32x512xf32>
      tpu.vector_store %arg9[%c0_18, %c0_19], %17 {strides = array<i32>} : memref<32x512xf32, #tpu.memory_space<vmem>>, vector<32x512xf32>,
      %cst_20 = arith.constant 0.000000e+00 : f32
      %19 = vector.broadcast %cst_20 : f32 to vector<32x512xf32>
      %c0_21 = arith.constant 0 : index
      %c0_22 = arith.constant 0 : index
      %20 = vector.load %arg10[%c0_21, %c0_22] : memref<32x512xf32, #tpu.memory_space<vmem>>, vector<32x512xf32>
      tpu.vector_store %arg10[%c0_21, %c0_22], %19 {strides = array<i32>} : memref<32x512xf32, #tpu.memory_space<vmem>>, vector<32x512xf32>,
    } else {
    }
    %c0 = arith.constant 0 : index
    %c0_1 = arith.constant 0 : index
    %3 = vector.load %arg3[%c0, %c0_1] : memref<32x256xbf16, #tpu.memory_space<vmem>>, vector<32x256xbf16>
    %c0_2 = arith.constant 0 : index
    %c0_3 = arith.constant 0 : index
    %4 = vector.load %arg9[%c0_2, %c0_3] : memref<32x512xf32, #tpu.memory_space<vmem>>, vector<32x512xf32>
    %c0_4 = arith.constant 0 : index
    %c0_5 = arith.constant 0 : index
    %5 = vector.load %arg4[%c0_4, %c0_5] : memref<256x512xbf16, #tpu.memory_space<vmem>>, vector<256x512xbf16>
    %cst = arith.constant dense<0.000000e+00> : vector<32x512xf32>
    %6 = tpu.matmul %3, %5, %cst {dimension_numbers = #tpu.dot_dimension_numbers<[1], [0], [0], [1], [0, 0, 1, 1], [], []>} : vector<32x256xbf16>, vector<256x512xbf16>, vector<32x512xf32> -> vector<32x512xf32>
    %7 = arith.addf %4, %6 : vector<32x512xf32>
    %c0_6 = arith.constant 0 : index
    %c0_7 = arith.constant 0 : index
    %8 = vector.load %arg9[%c0_6, %c0_7] : memref<32x512xf32, #tpu.memory_space<vmem>>, vector<32x512xf32>
    tpu.vector_store %arg9[%c0_6, %c0_7], %7 {strides = array<i32>} : memref<32x512xf32, #tpu.memory_space<vmem>>, vector<32x512xf32>,
    %c0_8 = arith.constant 0 : index
    %c0_9 = arith.constant 0 : index
    %9 = vector.load %arg10[%c0_8, %c0_9] : memref<32x512xf32, #tpu.memory_space<vmem>>, vector<32x512xf32>
    %c0_10 = arith.constant 0 : index
    %c0_11 = arith.constant 0 : index
    %10 = vector.load %arg6[%c0_10, %c0_11] : memref<256x512xbf16, #tpu.memory_space<vmem>>, vector<256x512xbf16>
    %cst_12 = arith.constant dense<0.000000e+00> : vector<32x512xf32>
    %11 = tpu.matmul %3, %10, %cst_12 {dimension_numbers = #tpu.dot_dimension_numbers<[1], [0], [0], [1], [0, 0, 1, 1], [], []>} : vector<32x256xbf16>, vector<256x512xbf16>, vector<32x512xf32> -> vector<32x512xf32>
    %12 = arith.addf %9, %11 : vector<32x512xf32>
    %c0_13 = arith.constant 0 : index
    %c0_14 = arith.constant 0 : index
    %13 = vector.load %arg10[%c0_13, %c0_14] : memref<32x512xf32, #tpu.memory_space<vmem>>, vector<32x512xf32>
    tpu.vector_store %arg10[%c0_13, %c0_14], %12 {strides = array<i32>} : memref<32x512xf32, #tpu.memory_space<vmem>>, vector<32x512xf32>,
    %c0_i32_15 = arith.constant 0 : i32
    %14 = arith.cmpi eq, %arg2, %c0_i32_15 : i32
    %15 = arith.extui %14 : i1 to i32
    %c0_i32_16 = arith.constant 0 : i32
    %16 = arith.cmpi ne, %15, %c0_i32_16 : i32
    scf.if %16 {
      %c0_17 = arith.constant 0 : index
      %c0_18 = arith.constant 0 : index
      %17 = vector.load %arg9[%c0_17, %c0_18] : memref<32x512xf32, #tpu.memory_space<vmem>>, vector<32x512xf32>
      %c0_19 = arith.constant 0 : index
      %c0_20 = arith.constant 0 : index
      %18 = vector.load %arg5[%c0_19, %c0_20] : memref<1x512xf32, #tpu.memory_space<vmem>>, vector<1x512xf32>
      %19 = vector.broadcast %18 : vector<1x512xf32> to vector<32x512xf32>
      %20 = arith.addf %17, %19 : vector<32x512xf32>
      %c0_21 = arith.constant 0 : index
      %c0_22 = arith.constant 0 : index
      %21 = vector.load %arg10[%c0_21, %c0_22] : memref<32x512xf32, #tpu.memory_space<vmem>>, vector<32x512xf32>
      %c0_23 = arith.constant 0 : index
      %c0_24 = arith.constant 0 : index
      %22 = vector.load %arg7[%c0_23, %c0_24] : memref<1x512xf32, #tpu.memory_space<vmem>>, vector<1x512xf32>
      %23 = vector.broadcast %22 : vector<1x512xf32> to vector<32x512xf32>
      %24 = arith.addf %21, %23 : vector<32x512xf32>
      %25 = arith.negf %20 : vector<32x512xf32>
      %26 = math.exp %25 : vector<32x512xf32>
      %cst_25 = arith.constant 1.000000e+00 : f32
      %27 = vector.broadcast %cst_25 : f32 to vector<32x512xf32>
      %28 = arith.addf %27, %26 : vector<32x512xf32>
      %29 = arith.divf %27, %28 : vector<32x512xf32>
      %30 = arith.mulf %20, %29 : vector<32x512xf32>
      %31 = arith.mulf %30, %24 : vector<32x512xf32>
      %32 = arith.truncf %31 : vector<32x512xf32> to vector<32x512xbf16>
      %c0_26 = arith.constant 0 : index
      %c0_27 = arith.constant 0 : index
      %33 = vector.load %arg8[%c0_26, %c0_27] : memref<32x512xbf16, #tpu.memory_space<vmem>>, vector<32x512xbf16>
      tpu.vector_store %arg8[%c0_26, %c0_27], %32 {strides = array<i32>} : memref<32x512xbf16, #tpu.memory_space<vmem>>, vector<32x512xbf16>,
    } else {
    }
    return
  }
  func.func @transform_0(%arg0: i32, %arg1: i32, %arg2: i32) -> (i32, i32) {
    %c0_i32 = arith.constant 0 : i32
    return %arg0, %arg2 : i32, i32
  }
  func.func @transform_1(%arg0: i32, %arg1: i32, %arg2: i32) -> (i32, i32) {
    %c0_i32 = arith.constant 0 : i32
    return %arg2, %arg1 : i32, i32
  }
  func.func @transform_2(%arg0: i32, %arg1: i32, %arg2: i32) -> (i32, i32) {
    %c0_i32 = arith.constant 0 : i32
    %c0_i32_0 = arith.constant 0 : i32
    return %c0_i32, %arg1 : i32, i32
  }
  func.func @transform_3(%arg0: i32, %arg1: i32, %arg2: i32) -> (i32, i32) {
    %c0_i32 = arith.constant 0 : i32
    return %arg2, %arg1 : i32, i32
  }
  func.func @transform_4(%arg0: i32, %arg1: i32, %arg2: i32) -> (i32, i32) {
    %c0_i32 = arith.constant 0 : i32
    %c0_i32_0 = arith.constant 0 : i32
    return %c0_i32, %arg1 : i32, i32
  }
  func.func @transform_5(%arg0: i32, %arg1: i32, %arg2: i32) -> (i32, i32) {
    %c0_i32 = arith.constant 0 : i32
    return %arg0, %arg1 : i32, i32
  }
}

module attributes {stable_mosaic.version = 11 : i64} {
  func.func @_matmul_scale_residual_kernel(%arg0: i32, %arg1: i32, %arg2: i32, %arg3: memref<32x512xbf16, #tpu.memory_space<vmem>>, %arg4: memref<512x256xbf16, #tpu.memory_space<vmem>>, %arg5: memref<1x256xf32, #tpu.memory_space<vmem>>, %arg6: memref<1x256xf32, #tpu.memory_space<vmem>>, %arg7: memref<32x256xf32, #tpu.memory_space<vmem>>, %arg8: memref<32x256xf32, #tpu.memory_space<vmem>>, %arg9: memref<32x256xf32, #tpu.memory_space<vmem>>) attributes {dimension_semantics = [#tpu.dimension_semantics<parallel>, #tpu.dimension_semantics<parallel>, #tpu.dimension_semantics<arbitrary>], iteration_bounds = array<i64: 1, 1, 1>, scalar_prefetch = 0 : i64, scratch_operands = 1 : i64, tpu.core_type = #tpu.core_type<tc>, window_params = [{transform_indices = @transform_0, window_bounds = array<i64: 32, 512>}, {transform_indices = @transform_1, window_bounds = array<i64: 512, 256>}, {transform_indices = @transform_2, window_bounds = array<i64: 1, 256>}, {transform_indices = @transform_3, window_bounds = array<i64: 1, 256>}, {transform_indices = @transform_4, window_bounds = array<i64: 32, 256>}, {transform_indices = @transform_5, window_bounds = array<i64: 32, 256>}]} {
    %c0_i32 = arith.constant 0 : i32
    %0 = arith.cmpi eq, %arg2, %c0_i32 : i32
    %1 = arith.extui %0 : i1 to i32
    %c0_i32_0 = arith.constant 0 : i32
    %2 = arith.cmpi ne, %1, %c0_i32_0 : i32
    scf.if %2 {
      %cst_10 = arith.constant 0.000000e+00 : f32
      %12 = vector.broadcast %cst_10 : f32 to vector<32x256xf32>
      %c0_11 = arith.constant 0 : index
      %c0_12 = arith.constant 0 : index
      %13 = vector.load %arg9[%c0_11, %c0_12] : memref<32x256xf32, #tpu.memory_space<vmem>>, vector<32x256xf32>
      tpu.vector_store %arg9[%c0_11, %c0_12], %12 {strides = array<i32>} : memref<32x256xf32, #tpu.memory_space<vmem>>, vector<32x256xf32>,
    } else {
    }
    %c0 = arith.constant 0 : index
    %c0_1 = arith.constant 0 : index
    %3 = vector.load %arg9[%c0, %c0_1] : memref<32x256xf32, #tpu.memory_space<vmem>>, vector<32x256xf32>
    %c0_2 = arith.constant 0 : index
    %c0_3 = arith.constant 0 : index
    %4 = vector.load %arg3[%c0_2, %c0_3] : memref<32x512xbf16, #tpu.memory_space<vmem>>, vector<32x512xbf16>
    %c0_4 = arith.constant 0 : index
    %c0_5 = arith.constant 0 : index
    %5 = vector.load %arg4[%c0_4, %c0_5] : memref<512x256xbf16, #tpu.memory_space<vmem>>, vector<512x256xbf16>
    %cst = arith.constant dense<0.000000e+00> : vector<32x256xf32>
    %6 = tpu.matmul %4, %5, %cst {dimension_numbers = #tpu.dot_dimension_numbers<[1], [0], [0], [1], [0, 0, 1, 1], [], []>} : vector<32x512xbf16>, vector<512x256xbf16>, vector<32x256xf32> -> vector<32x256xf32>
    %7 = arith.addf %3, %6 : vector<32x256xf32>
    %c0_6 = arith.constant 0 : index
    %c0_7 = arith.constant 0 : index
    %8 = vector.load %arg9[%c0_6, %c0_7] : memref<32x256xf32, #tpu.memory_space<vmem>>, vector<32x256xf32>
    tpu.vector_store %arg9[%c0_6, %c0_7], %7 {strides = array<i32>} : memref<32x256xf32, #tpu.memory_space<vmem>>, vector<32x256xf32>,
    %c0_i32_8 = arith.constant 0 : i32
    %9 = arith.cmpi eq, %arg2, %c0_i32_8 : i32
    %10 = arith.extui %9 : i1 to i32
    %c0_i32_9 = arith.constant 0 : i32
    %11 = arith.cmpi ne, %10, %c0_i32_9 : i32
    scf.if %11 {
      %c0_10 = arith.constant 0 : index
      %c0_11 = arith.constant 0 : index
      %12 = vector.load %arg9[%c0_10, %c0_11] : memref<32x256xf32, #tpu.memory_space<vmem>>, vector<32x256xf32>
      %c0_12 = arith.constant 0 : index
      %c0_13 = arith.constant 0 : index
      %13 = vector.load %arg5[%c0_12, %c0_13] : memref<1x256xf32, #tpu.memory_space<vmem>>, vector<1x256xf32>
      %14 = vector.broadcast %13 : vector<1x256xf32> to vector<32x256xf32>
      %15 = arith.addf %12, %14 : vector<32x256xf32>
      %c0_14 = arith.constant 0 : index
      %c0_15 = arith.constant 0 : index
      %16 = vector.load %arg6[%c0_14, %c0_15] : memref<1x256xf32, #tpu.memory_space<vmem>>, vector<1x256xf32>
      %17 = vector.broadcast %16 : vector<1x256xf32> to vector<32x256xf32>
      %18 = arith.mulf %15, %17 : vector<32x256xf32>
      %c0_16 = arith.constant 0 : index
      %c0_17 = arith.constant 0 : index
      %19 = vector.load %arg7[%c0_16, %c0_17] : memref<32x256xf32, #tpu.memory_space<vmem>>, vector<32x256xf32>
      %20 = arith.addf %18, %19 : vector<32x256xf32>
      %c0_18 = arith.constant 0 : index
      %c0_19 = arith.constant 0 : index
      %21 = vector.load %arg8[%c0_18, %c0_19] : memref<32x256xf32, #tpu.memory_space<vmem>>, vector<32x256xf32>
      tpu.vector_store %arg8[%c0_18, %c0_19], %20 {strides = array<i32>} : memref<32x256xf32, #tpu.memory_space<vmem>>, vector<32x256xf32>,
    } else {
    }
    return
  }
  func.func @transform_0(%arg0: i32, %arg1: i32, %arg2: i32) -> (i32, i32) {
    %c0_i32 = arith.constant 0 : i32
    return %arg0, %arg2 : i32, i32
  }
  func.func @transform_1(%arg0: i32, %arg1: i32, %arg2: i32) -> (i32, i32) {
    %c0_i32 = arith.constant 0 : i32
    return %arg2, %arg1 : i32, i32
  }
  func.func @transform_2(%arg0: i32, %arg1: i32, %arg2: i32) -> (i32, i32) {
    %c0_i32 = arith.constant 0 : i32
    %c0_i32_0 = arith.constant 0 : i32
    return %c0_i32, %arg1 : i32, i32
  }
  func.func @transform_3(%arg0: i32, %arg1: i32, %arg2: i32) -> (i32, i32) {
    %c0_i32 = arith.constant 0 : i32
    %c0_i32_0 = arith.constant 0 : i32
    return %c0_i32, %arg1 : i32, i32
  }
  func.func @transform_4(%arg0: i32, %arg1: i32, %arg2: i32) -> (i32, i32) {
    %c0_i32 = arith.constant 0 : i32
    return %arg0, %arg1 : i32, i32
  }
  func.func @transform_5(%arg0: i32, %arg1: i32, %arg2: i32) -> (i32, i32) {
    %c0_i32 = arith.constant 0 : i32
    return %arg0, %arg1 : i32, i32
  }
}

</mosaic_0001>

<bundles_post_ra>
// kernel: dinov2_layer_forward.6
= control target key start
LH: loop header
LB: loop body
LE: loop exit
PB: predicated region body
PF: predicated region fallthrough
CT: control target
= control target key end

     0   :  { %8 = vsyncpa [#allocation3], 0  ;;  %s217_s12 = smov [#allocation2]   ;;  %s280_s0 = inlined_call_operand.hbm [shape: f32[32,256], index: 0, kind: input, shape index: {}]   ;;  %s281_s1 = inlined_call_operand.vmem [shape: f32[1,256], index: 1, kind: input, shape index: {}]   ;;  %s282_s2 = inlined_call_operand.vmem [shape: f32[1,256], index: 2, kind: input, shape index: {}]   ;;  %s283_s3 = inlined_call_operand.vmem [shape: bf16[32,256], index: 3, kind: output, shape index: {}]  }
   0x1   :  { %s14_s13 = sshll.u32 %s217_s12, 4  ;;  %s193_s16 = scalar_lea.hbm %s280_s0, 1024  ;;  %s15_s13 = int_to_ptr.vmem [resolvable:$true] %s14_s13 }
   0x2   :  { %p194_p0 = scmp.ne.s32.totalorder %s280_s0, %s193_s16  ;;  %p197_p1 = scmp.lt.u32.totalorder %s193_s16, %s280_s0 }
   0x4   :  { %p199_p2 = pnand %p197_p1, %p194_p0 }
   0x6   :  { %202 = shalt.err (!%p199_p2)
}
   0x7   :  { %s203_s21 = scalar_lea.vmem %s15_s13, 1024  ;;  %p208_p4 = scmp.lt.s32.totalorder %s15_s13, %s15_s13 }
   0x8   :  { %p204_p3 = scmp.ne.s32.totalorder %s15_s13, %s203_s21  ;;  %p209_p5 = scmp.lt.s32.totalorder %s203_s21, %s203_s21 }
   0xa   :  { %p210_p6 = por %p209_p5, %p208_p4 }
   0xc   :  { %p211_p7 = pnand %p210_p6, %p204_p3 }
   0xe   :  { %214 = shalt.err (!%p211_p7)
}
   0xf   :  { %s218_s22 = smov 256   ;;  %s219_s23 = smov 16  }
  0x10   :  { %20 = dma.hbm_to_vmem [thread:$0]  %s280_s0, 1024, %s15_s13, [#allocation3], %s218_s22, %s218_s22, %s219_s23  }
  0x11   :  { %215 = dma.done.wait [#allocation3], 1024  }
  0x12   :  { %216 = vsyncadd [#allocation3], 4294966272  ;;  %v28_v0 = vld [vmem:[#allocation2] sm:$0xff]  ;;  %v29_v1 = vld [vmem:[#allocation2 + $0x8] sm:$0xff]  ;;  %v103_v42 = vlaneseq }
  0x13   :  { %v32_v2 = vld [vmem:[#allocation2 + $0x20] sm:$0xff]  ;;  %v36_v3 = vadd.f32 %v29_v1, %v28_v0  ;;  %v33_v4 = vld [vmem:[#allocation2 + $0x28] sm:$0xff]  ;;  %v30_v5 = vld [vmem:[#allocation2 + $0x10] sm:$0xff] }
  0x14   :  { %v31_v6 = vld [vmem:[#allocation2 + $0x18] sm:$0xff]  ;;  %v42_v7 = vadd.f32 %v33_v4, %v32_v2  ;;  %v34_v8 = vld [vmem:[#allocation2 + $0x30] sm:$0xff]  ;;  %v104_v48 = vshrl.u32 %v103_v42, 7  ;;  %v101_v55 = vld [vmem:[%s281_s1] sm:$0x3] }
  0x15   :  { %v35_v9 = vld [vmem:[#allocation2 + $0x38] sm:$0xff]  ;;  %37 = vadd.xlane.f32.xlu0 %v36_v3  ;;  %v39_v10 = vadd.f32 %v31_v6, %v30_v5  ;;  %v121_v57 = vld [vmem:[%s282_s2] sm:$0x3] }
  0x16   :  { %43 = vadd.xlane.f32.xlu1 %v42_v7  ;;  %v45_v11 = vadd.f32 %v35_v9, %v34_v8  ;;  %v105_v53 = vsub.s32 0, %v104_v48  ;;  %v109_v54 = vsub.s32 1, %v104_v48 }
  0x18   :  { %v106_v58 = vrot.slane %v101_v55, %v105_v53  ;;  %v110_v59 = vrot.slane %v101_v55, %v109_v54  ;;  %v126_v61 = vrot.slane %v121_v57, %v105_v53  ;;  %v130_v62 = vrot.slane %v121_v57, %v109_v54 }
  0x19   :  { %40 = vadd.xlane.f32.xlu0 %v39_v10 }
  0x1a   :  { %46 = vadd.xlane.f32.xlu1 %v45_v11 }
  0xa2   :  { %v38_v12 = vpop.xlane.xlu0 %37 }
  0xa3   :  { %v49_v13 = vmul.f32 0.00390625, %v38_v12  ;;  %v44_v14 = vpop.xlane.xlu1 %43 }
  0xa4   :  { %v51_v15 = vmul.f32 0.00390625, %v44_v14 }
  0xa5   :  { %v53_v16 = vsub.f32 %v28_v0, %v49_v13  ;;  %v54_v17 = vsub.f32 %v29_v1, %v49_v13 }
  0xa6   :  { %v252_v18 = vsub.f32 %v32_v2, %v51_v15  ;;  %v254_v19 = vsub.f32 %v33_v4, %v51_v15  ;;  %v41_v20 = vpop.xlane.xlu0 %40 }
  0xa7   :  { %v50_v21 = vmul.f32 0.00390625, %v41_v20  ;;  %v47_v22 = vpop.xlane.xlu1 %46  ;;  %v61_v23 = vmul.f32 %v53_v16, %v53_v16  ;;  %v62_v24 = vmul.f32 %v54_v17, %v54_v17 }
  0xa8   :  { %v52_v25 = vmul.f32 0.00390625, %v47_v22  ;;  %v65_v26 = vmul.f32 %v252_v18, %v252_v18  ;;  %v66_v27 = vmul.f32 %v254_v19, %v254_v19 }
  0xa9   :  { %v55_v28 = vsub.f32 %v30_v5, %v50_v21  ;;  %v56_v29 = vsub.f32 %v31_v6, %v50_v21  ;;  %v69_v30 = vadd.f32 %v62_v24, %v61_v23 }
  0xaa   :  { %v59_v31 = vsub.f32 %v34_v8, %v52_v25  ;;  %v60_v32 = vsub.f32 %v35_v9, %v52_v25  ;;  %v75_v33 = vadd.f32 %v66_v27, %v65_v26 }
  0xab   :  { %70 = vadd.xlane.f32.xlu0 %v69_v30  ;;  %v63_v34 = vmul.f32 %v55_v28, %v55_v28  ;;  %v64_v35 = vmul.f32 %v56_v29, %v56_v29 }
  0xac   :  { %v67_v36 = vmul.f32 %v59_v31, %v59_v31  ;;  %v68_v37 = vmul.f32 %v60_v32, %v60_v32 }
  0xad   :  { %v72_v38 = vadd.f32 %v64_v35, %v63_v34 }
  0xae   :  { %v78_v39 = vadd.f32 %v68_v37, %v67_v36 }
  0xaf   :  { %76 = vadd.xlane.f32.xlu0 %v75_v33  ;;  %73 = vadd.xlane.f32.xlu1 %v72_v38 }
  0xb3   :  { %79 = vadd.xlane.f32.xlu1 %v78_v39 }
 0x138   :  { %v71_v40 = vpop.xlane.xlu0 %70 }
 0x139   :  { %v81_v41 = vmul.f32 0.00390625, %v71_v40 }
 0x13b   :  { %v85_v43 = vadd.f32 1e-06, %v81_v41 }
 0x13c   :  { %v74_v44 = vpop.xlane.xlu1 %73  ;;  %v77_v45 = vpop.xlane.xlu0 %76 }
 0x13d   :  { %185 = vrsqrt.f32 %v85_v43  ;;  %v82_v46 = vmul.f32 0.00390625, %v74_v44  ;;  %v83_v47 = vmul.f32 0.00390625, %v77_v45 }
 0x13f   :  { %v86_v49 = vadd.f32 1e-06, %v82_v46  ;;  %v87_v50 = vadd.f32 1e-06, %v83_v47 }
 0x140   :  { %v80_v51 = vpop.xlane.xlu1 %79 }
 0x141   :  { %187 = vrsqrt.f32 %v86_v49  ;;  %v84_v52 = vmul.f32 0.00390625, %v80_v51 }
 0x142   :  { %189 = vrsqrt.f32 %v87_v50 }
 0x143   :  { %v88_v56 = vadd.f32 1e-06, %v84_v52 }
 0x145   :  { %191 = vrsqrt.f32 %v88_v56 }
 0x147   :  { %v186_v60 = vpop.eup %185 }
 0x148   :  { %v93_v63 = vmul.f32 %v186_v60, %v53_v16  ;;  %v94_v0 = vmul.f32 %v186_v60, %v54_v17 }
 0x14a   :  { %v113_v1 = vmul.f32 %v106_v58, %v93_v63  ;;  %v114_v2 = vmul.f32 %v110_v59, %v94_v0 }
 0x14b   :  { %v188_v3 = vpop.eup %187 }
 0x14c   :  { %v190_v4 = vpop.eup %189  ;;  %v133_v5 = vadd.f32 %v126_v61, %v113_v1  ;;  %v134_v6 = vadd.f32 %v130_v62, %v114_v2  ;;  %v95_v7 = vmul.f32 %v188_v3, %v55_v28  ;;  %v96_v8 = vmul.f32 %v188_v3, %v56_v29 }
 0x14d   :  { %v97_v9 = vmul.f32 %v190_v4, %v252_v18  ;;  %v98_v10 = vmul.f32 %v190_v4, %v254_v19 }
 0x14e   :  { %v178_v11 = vpack.c.bf16 %v134_v6, %v133_v5  ;;  %v115_v12 = vmul.f32 %v106_v58, %v95_v7  ;;  %v116_v13 = vmul.f32 %v110_v59, %v96_v8 }
 0x14f   :  { %v192_v14 = vpop.eup %191  ;;  %v117_v15 = vmul.f32 %v106_v58, %v97_v9  ;;  %v118_v20 = vmul.f32 %v110_v59, %v98_v10 }
 0x150   :  { %165 = vst [vmem:[%s283_s3] sm:$0xff] %v178_v11  ;;  %v135_v16 = vadd.f32 %v126_v61, %v115_v12  ;;  %v136_v17 = vadd.f32 %v130_v62, %v116_v13  ;;  %v99_v21 = vmul.f32 %v192_v14, %v59_v31  ;;  %v100_v22 = vmul.f32 %v192_v14, %v60_v32 }
 0x151   :  { %v137_v23 = vadd.f32 %v126_v61, %v117_v15  ;;  %v138_v24 = vadd.f32 %v130_v62, %v118_v20 }
 0x152   :  { %v179_v25 = vpack.c.bf16 %v136_v17, %v135_v16  ;;  %v119_v18 = vmul.f32 %v106_v58, %v99_v21  ;;  %v120_v26 = vmul.f32 %v110_v59, %v100_v22 }
 0x153   :  { %v180_v19 = vpack.c.bf16 %v138_v24, %v137_v23 }
 0x154   :  { %166 = vst [vmem:[%s283_s3 + $0x8] sm:$0xff] %v179_v25  ;;  %v139_v27 = vadd.f32 %v126_v61, %v119_v18  ;;  %v140_v28 = vadd.f32 %v130_v62, %v120_v26 }
 0x155   :  { %167 = vst [vmem:[%s283_s3 + $0x10] sm:$0xff] %v180_v19 }
 0x156   :  { %v181_v29 = vpack.c.bf16 %v140_v28, %v139_v27 }
 0x158   :  { %168 = vst [vmem:[%s283_s3 + $0x18] sm:$0xff] %v181_v29 }
 0x159   :  { %173 = vsyncpa [#allocation3], 1 }

// kernel: dinov2_layer_forward.8
= control target key start
LH: loop header
LB: loop body
LE: loop exit
PB: predicated region body
PF: predicated region fallthrough
CT: control target
= control target key end

     0   :  { %s1377_s0 = inlined_call_operand.vmem [shape: bf16[2,16,768], index: 0, kind: input, shape index: {}, may-alias: {0,1,2}]   ;;  %s1378_s1 = inlined_call_operand.vmem [shape: bf16[2,16,768], index: 1, kind: input, shape index: {}, may-alias: {0,1,2}]   ;;  %s1379_s2 = inlined_call_operand.vmem [shape: bf16[2,16,768], index: 2, kind: input, shape index: {}, may-alias: {0,1,2}]   ;;  %s1380_s3 = inlined_call_operand.vmem [shape: bf16[2,16,256], index: 3, kind: output, shape index: {}]  }
   0x1   :  { %1383 = sst [smem:[#allocation9_spill]] %s1380_s3 }
   0x2   :  { %s1151_s12 = smov 0   ;;  %s1153_s13 = smov 0  }
   0x3   :  { %s1155_s14 = smov 0   ;;  %s1157_s15 = smov 0  }
   0x4   :  { %s1159_s16 = smov 0   ;;  %s1161_s17 = smov 0  }
   0x5   :  { %s1163_s18 = smov 0   ;;  %s1165_s19 = smov 0  }
   0x6   :  { %s1167_s20 = smov 0   ;;  %s1169_s21 = smov 0  }
   0x7   :  { %s1171_s22 = smov 0  }
   0x8 LB: > { %s28_s24 = sadd.s32 1, %s1118_s20  ;;  %s32_s25 = sadd.s32 1, %s1122_s21  ;;  %s1126_s22 = sphi %s1171_s22, %s13_s22   ;;  %s1122_s21 = sphi %s1169_s21, %s1405_s21   ;;  %s1118_s20 = sphi %s1167_s20, %s1404_s20   ;;  %s1114_s19 = sphi %s1165_s19, %s1403_s19   ;;  %s1110_s18 = sphi %s1163_s18, %s1402_s18   ;;  %s1106_s17 = sphi %s1161_s17, %s1401_s17   ;;  %s1102_s16 = sphi %s1159_s16, %s1400_s16   ;;  %s1098_s15 = sphi %s1157_s15, %s1399_s15   ;;  %s1094_s14 = sphi %s1155_s14, %s1398_s14   ;;  %s1090_s13 = sphi %s1153_s13, %s1397_s13   ;;  %s1086_s12 = sphi %s1151_s12, %s1396_s12  }
   0x9   : > { %p30_p0 = scmp.ge.s32.totalorder %s28_s24, 2  ;;  %s43_s26 = sadd.s32 1, %s1106_s17 }
   0xa   : > { %p50_p1 = scmp.ne.s32.totalorder %s1106_s17, %s1102_s16  ;;  %p51_p2 = scmp.eq.s32.totalorder %s1126_s22, 0 }
   0xb   : > { %s1407_s24 = smov (%p30_p0, %s28_s24), 0  ;;  %s1409_s25 = smov (!%p30_p0, %s32_s25), %s1122_s21 }
   0xc   : > { %1384 = sst [smem:[#allocation6_spill]] %s1407_s24  ;;  %s39_s27 = ssub.s32 %s1118_s20, %s1407_s24 }
   0xd   : > { %p34_p3 = scmp.ge.s32.totalorder %s1409_s25, 2  ;;  %s66_s28 = sadd.s32 2, %s1118_s20 }
   0xe   : > { %p1224_p4 = por %p51_p2, %p50_p1  ;;  %s67_s30 = sadd.s32 2, %s1407_s24 }
   0xf   : > { %s1411_s25 = smov (%p34_p3, %s1409_s25), 0  ;;  %s69_s4 = ssub.s32 %s66_s28, %s67_s30 }
  0x10   : > { %1386 = sst [smem:[#allocation7_spill]] %s1411_s25  ;;  %s73_s5 = sadd.s32 1, %s1098_s15 }
  0x11   : > { %s36_s6 = ssub.s32 %s1122_s21, %s1411_s25  ;;  %p80_p5 = scmp.ne.s32.totalorder %s1098_s15, %s1094_s14 }
  0x12   : > { %s40_s7 = sor.u32 %s39_s27, %s36_s6  ;;  %s70_s8 = sor.u32 %s69_s4, %s36_s6 }
  0x13   : > { %p41_p6 = scmp.eq.s32.totalorder %s40_s7, 0  ;;  %p71_p7 = scmp.eq.s32.totalorder %s70_s8, 0 }
  0x14   : > { %p1238_p8 = por %p80_p5, %p51_p2  ;;  %s96_s10 = sadd.s32 4, %s1118_s20 }
  0x15   : > { %s1244_s11 = scalar_select %p41_p6, %s1106_s17, %s43_s26  }
  0x16   : > { %s1247_s28 = scalar_select %p71_p7, %s1098_s15, %s73_s5  }
  0x17   : > { %1388 = sst [smem:[#allocation8_spill]] %s1244_s11  ;;  %s97_s30 = sadd.s32 4, %s1407_s24 }
  0x18   : > { %s103_s23 = sadd.s32 1, %s1090_s13  ;;  %s99_s25 = ssub.s32 %s96_s10, %s97_s30 }
  0x19   : > { %p110_p9 = scmp.ne.s32.totalorder %s1090_s13, %s1086_s12  ;;  %s100_s27 = sor.u32 %s99_s25, %s36_s6 }
  0x1a   : > { %s1389_s3 = sadd.s32 4294967295, %s1126_s22   ;;  %p101_p11 = scmp.eq.s32.totalorder %s100_s27, 0 }
  0x1b   : > { %p144_p10 = scmp.eq.s32.totalorder %s1389_s3, 3  ;;  %p1257_p12 = por %p110_p9, %p51_p2 }
  0x1c   : > { %s1269_s26 = scalar_select %p101_p11, %s1090_s13, %s103_s23  }
  0x1d   : > { %p1264_p13 = por %p144_p10, %p50_p1  ;;  %p855_p0 = scmp.ge.s32.totalorder %s1126_s22, 4 }
  0x1f   : > { %166 = sbr.rel (%p855_p0) target bundleno = 62 (0x3e), region = 16 }
  0x26   : > { %169 = sbr.rel (!%p1224_p4) target bundleno = 46 (0x2e), region = 20  ;;  %s171_s3 = sand.u32 (%p1224_p4), 1, %s1106_s17  }
  0x27   : > { %s924_s25 = smul.u32 (%p1224_p4), 12, %s1122_s21  ;;  %s856_s5 = sshll.u32 (%p1224_p4), %s171_s3, 3 }
  0x28   : > { %s173_s23 = scalar_lea.vmem (%p1224_p4), [#allocation2], %s856_s5 }
  0x29   : > { %s178_s6 = sadd.s32 (%p1224_p4), %s1118_s20, %s924_s25 }
  0x2a   : > { %s857_s8 = sshll.u32 (%p1224_p4), %s178_s6, 2 }
  0x2b   : > { %s180_s27 = scalar_lea.vmem (%p1224_p4), %s1377_s0, %s857_s8 }
  0x2c   : > { %v196_v0 = vld [vmem:[%s180_s27] sm:$0xf] (%p1224_p4)  ;;  %v198_v1 = vld [vmem:[%s180_s27 + $0x18] sm:$0xf] (%p1224_p4) }
  0x2d   : > { %197 = vst [vmem:[%s173_s23] sm:$0xf] %v196_v0  ;;  %199 = vst [vmem:[%s173_s23 + $0x4] sm:$0xf] %v198_v1 }
  0x2e PF: > { %226 = sbr.rel (!%p1238_p8) target bundleno = 54 (0x36), region = 61  ;;  %s228_s29 = sand.u32 (%p1238_p8), 1, %s1098_s15  }
  0x2f   : > { %s753_s3 = smul.u32 (%p1238_p8), 12, %s1122_s21  ;;  %s858_s25 = sshll.u32 (%p1238_p8), %s228_s29, 3 }
  0x30   : > { %s230_s5 = scalar_lea.vmem (%p1238_p8), [#allocation3], %s858_s25 }
  0x31   : > { %s754_s6 = sadd.s32 (%p1238_p8), %s1118_s20, %s753_s3 }
  0x32   : > { %s859_s24 = sshll.u32 (%p1238_p8), %s754_s6, 2 }
  0x33   : > { %s756_s8 = scalar_lea.vmem (%p1238_p8), %s1378_s1, %s859_s24 }
  0x34   : > { %v860_v2 = vld [vmem:[%s756_s8 + $0x8] sm:$0xf] (%p1238_p8)  ;;  %v861_v3 = vld [vmem:[%s756_s8 + $0x20] sm:$0xf] (%p1238_p8) }
  0x35   : > { %252 = vst [vmem:[%s230_s5] sm:$0xf] %v860_v2  ;;  %254 = vst [vmem:[%s230_s5 + $0x4] sm:$0xf] %v861_v3 }
  0x36 PF: > { %281 = sbr.rel (!%p1257_p12) target bundleno = 62 (0x3e), region = 102  ;;  %s283_s9 = sand.u32 (%p1257_p12), 1, %s1090_s13  }
  0x37   : > { %s760_s30 = smul.u32 (%p1257_p12), 12, %s1122_s21  ;;  %s862_s27 = sshll.u32 (%p1257_p12), %s283_s9, 3 }
  0x38   : > { %s285_s25 = scalar_lea.vmem (%p1257_p12), [#allocation4], %s862_s27 }
  0x39   : > { %s761_s23 = sadd.s32 (%p1257_p12), %s1118_s20, %s760_s30 }
  0x3a   : > { %s863_s29 = sshll.u32 (%p1257_p12), %s761_s23, 2 }
  0x3b   : > { %s763_s24 = scalar_lea.vmem (%p1257_p12), %s1379_s2, %s863_s29 }
  0x3c   : > { %v864_v4 = vld [vmem:[%s763_s24 + $0x10] sm:$0xf] (%p1257_p12)  ;;  %v865_v5 = vld [vmem:[%s763_s24 + $0x28] sm:$0xf] (%p1257_p12) }
  0x3d   : > { %307 = vst [vmem:[%s285_s25] sm:$0xf] %v864_v4  ;;  %309 = vst [vmem:[%s285_s25 + $0x4] sm:$0xf] %v865_v5 }
  0x3e PF: > { %p866_p1 = scmp.ge.s32.totalorder %s1126_s22, 1  ;;  %p335_p2 = scmp.lt.s32.totalorder %s1126_s22, 5 }
  0x40   : > { %p336_p3 = pnand %p866_p1, %p335_p2 }
  0x41   : > { %s349_s4 = sand.u32 (!%p336_p3), 1, %s1094_s14   ;;  %s342_s6 = sand.u32 (!%p336_p3), 1, %s1102_s16   ;;  %v1128_v6 = vmov (!%p336_p3), 0.0   ;;  %vm1129_vm0 = vmmov (!%p336_p3), 0   ;;  %vm407_vm1 = vcmask (!%p336_p3), 523264   ;;  %vm455_vm2 = vcmask (!%p336_p3), 130048  }
  0x42   : > { %339 = sbr.rel (%p336_p3) target bundleno = 1492 (0x5d4), region = 143  ;;  %900 = vmatprep.subr.bf16.mxu0 (!%p336_p3), %v1128_v6  ;;  %s868_s10 = sshll.u32 (!%p336_p3), %s349_s4, 3  ;;  %902 = vmatprep.mubr.msk.bf16.mxu0 (!%p336_p3), %vm1129_vm0, %v1128_v6 }
  0x43   : > { %s1303_s8 = sshll.u32 (!%p336_p3), %s342_s6, 3  ;;  %906 = vmatprep.subr.bf16.mxu1 (!%p336_p3), %v1128_v6  ;;  %908 = vmatprep.mubr.msk.bf16.mxu1 (!%p336_p3), %vm1129_vm0, %v1128_v6  ;;  %s351_s5 = scalar_lea.vmem (!%p336_p3), [#allocation3], %s868_s10 }
  0x44   : > { %v1021_v7 = vld [vmem:[%s351_s5] sm:$0xff] (!%p336_p3)   ;;  %s344_s14 = scalar_lea.vmem (!%p336_p3), [#allocation2], %s1303_s8  ;;  %s1130_s16 = smov (!%p336_p3), 64  }
  0x45   : > { %v412_v8 = vsel (!%p336_p3), %vm407_vm1, %v1021_v7, 0  ;;  %v1022_v9 = vld [vmem:[%s344_s14] sm:$0xff] (!%p336_p3)   ;;  %s356_s9 = sand.u32 (!%p336_p3), 1, %s1086_s12   ;;  %s385_s12 = scalar_lea.vmem (!%p336_p3), [#allocation5], %s1303_s8 }
  0x46   : > { %901 = vmatpush3.bf16.xpose.msra.mxu0 (!%p336_p3), %v412_v8  ;;  %s869_s30 = sshll.u32 (!%p336_p3), %s356_s9, 3 }
  0x47   : > { %918 = vmatprep.subr.bf16.mxu0 (!%p336_p3), %v1128_v6  ;;  %s358_s27 = scalar_lea.vmem (!%p336_p3), [#allocation4], %s869_s30 }
  0x48   : > { %v1023_v26 = vld [vmem:[%s358_s27] sm:$0xff] (!%p336_p3)  }
  0x49   : > { %907 = vmatpush3.bf16.msra.mxu1 %v1023_v26  ;;  %s881_s23 = sshll.u32 (%p1264_p13), %s1114_s19, 2  ;;  %s1392_s25 = sld [smem:[#allocation9_spill]] (%p1264_p13) }
  0x4a   : > { %912 = vmatprep.subr.bf16.mxu1 %v1128_v6  ;;  %s685_s29 = sadd.s32 (%p1264_p13), %s1110_s18, %s881_s23 }
  0x4b   : > { %s882_s3 = sshll.u32 (%p1264_p13), %s685_s29, 2 }
  0x4d   : > { %903 = vmatmul.mubr.msk.bf16.vlgmr.msra.gmra.mrb[0].mxu0 %vm407_vm1, %v1022_v9 }
  0x4e   : > { %920 = vmatprep.mubr.msk.bf16.mxu0 %vm1129_vm0, %v1128_v6 }
  0x4f   : > { %s687_s4 = scalar_lea.vmem (%p1264_p13), %s1392_s25, %s882_s3 }
 0x120   : > { %v448_v10 = vpop.f32.mrb[0].mxu0 }
 0x121   : > { %v904_v11 = vpop.f32.mrb[1].mxu0  ;;  %v456_v12 = vsel %vm455_vm2, %v448_v10, -inf }
 0x122   : > { %457 = vmax.xlane.f32.xlu0 %v456_v12  ;;  %v451_v13 = vpop.f32.mrb[2].mxu0 }
 0x123   : > { %v905_v14 = vpop.f32.mrb[3].mxu0  ;;  %v459_v15 = vsel %vm455_vm2, %v451_v13, -inf }
 0x126   : > { %460 = vmax.xlane.f32.xlu0 %v459_v15 }
 0x13c   : > { %533 = vrot.lane.b32.xlu0 %v1021_v7, %s1130_s16 }
 0x1af   : > { %v458_v16 = vpop.xlane.xlu0 %457 }
 0x1b0   : > { %v462_v17 = vsub.f32 %v448_v10, %v458_v16 }
 0x1b2   : > { %v464_v18 = vmul.f32 1.442695, %v462_v17 }
 0x1b3   : > { %v461_v19 = vpop.xlane.xlu0 %460 }
 0x1b4   : > { %1024 = vpow2.f32 %v464_v18  ;;  %v463_v20 = vsub.f32 %v451_v13, %v461_v19 }
 0x1b6   : > { %v466_v21 = vmul.f32 1.442695, %v463_v20 }
 0x1b7   : > { %v534_v31 = vpop.permute.xlu0 %533 }
 0x1b8   : > { %1026 = vpow2.f32 %v466_v21  ;;  %v539_v34 = vsel %vm407_vm1, %v534_v31, 0 }
 0x1be   : > { %v1025_v22 = vpop.eup %1024 }
 0x1bf   : > { %v468_v23 = vsel %vm455_vm2, %v1025_v22, 0.0 }
 0x1c0   : > { %469 = vadd.xlane.f32.xlu1 %v468_v23 }
 0x1c2   : > { %v1027_v24 = vpop.eup %1026 }
 0x1c3   : > { %v471_v25 = vsel %vm455_vm2, %v1027_v24, 0.0 }
 0x1c4   : > { %472 = vadd.xlane.f32.xlu1 %v471_v25 }
 0x1d5   : > { %531 = vrot.lane.b32.xlu1 %v1022_v9, %s1130_s16 }
 0x24d   : > { %v470_v27 = vpop.xlane.xlu1 %469 }
 0x24e   : > { %1028 = vrcp.f32 %v470_v27 }
 0x251   : > { %v473_v28 = vpop.xlane.xlu1 %472 }
 0x252   : > { %1030 = vrcp.f32 %v473_v28 }
 0x255   : > { %v532_v36 = vpop.permute.xlu1 %531 }
 0x258   : > { %v1029_v29 = vpop.eup %1028 }
 0x259   : > { %v478_v32 = vmul.f32 %v1029_v29, %v1025_v22 }
 0x25c   : > { %v1031_v30 = vpop.eup %1030 }
 0x25d   : > { %v479_v33 = vmul.f32 %v1031_v30, %v1027_v24 }
 0x25f   : > { %v480_v35 = vpack.c.bf16 %v479_v33, %v478_v32 }
 0x261   : > { %909 = vmatmul.mubr.msk.bf16.vlgmr.msra.gmra.mrb[0].mxu1 %vm455_vm2, %v480_v35 }
 0x262   : > { %913 = vmatpush3.bf16.xpose.msra.mxu1 %v539_v34  ;;  %914 = vmatprep.mubr.msk.bf16.mxu1 %vm1129_vm0, %v1128_v6 }
 0x269   : > { %915 = vmatmul.mubr.msk.bf16.vlgmr.msra.gmra.mrb[4].mxu1 %vm407_vm1, %v532_v36 }
 0x334   : > { %v524_v37 = vpop.f32.mrb[0].mxu1 }
 0x335   : > { %v910_v38 = vpop.f32.mrb[1].mxu1 }
 0x336   : > { %v527_v39 = vpop.f32.mrb[2].mxu1 }
 0x337   : > { %v911_v40 = vpop.f32.mrb[3].mxu1 }
 0x33c   : > { %v575_v41 = vpop.f32.mrb[4].mxu1 }
 0x33d   : > { %v916_v42 = vpop.f32.mrb[5].mxu1  ;;  %v582_v43 = vsel %vm455_vm2, %v575_v41, -inf }
 0x33e   : > { %583 = vmax.xlane.f32.xlu1 %v582_v43  ;;  %v578_v44 = vpop.f32.mrb[6].mxu1 }
 0x33f   : > { %v917_v45 = vpop.f32.mrb[7].mxu1  ;;  %v585_v46 = vsel %vm455_vm2, %v578_v44, -inf }
 0x340   : > { %586 = vmax.xlane.f32.xlu0 %v585_v46 }
 0x3cb   : > { %v584_v47 = vpop.xlane.xlu1 %583 }
 0x3cc   : > { %v588_v48 = vsub.f32 %v575_v41, %v584_v47 }
 0x3cd   : > { %v587_v49 = vpop.xlane.xlu0 %586 }
 0x3ce   : > { %v590_v50 = vmul.f32 1.442695, %v588_v48  ;;  %v589_v51 = vsub.f32 %v578_v44, %v587_v49 }
 0x3d0   : > { %1032 = vpow2.f32 %v590_v50  ;;  %v592_v52 = vmul.f32 1.442695, %v589_v51 }
 0x3d2   : > { %1034 = vpow2.f32 %v592_v52 }
 0x3da   : > { %v1033_v53 = vpop.eup %1032 }
 0x3db   : > { %v594_v54 = vsel %vm455_vm2, %v1033_v53, 0.0 }
 0x3dc   : > { %v1035_v55 = vpop.eup %1034  ;;  %595 = vadd.xlane.f32.xlu0 %v594_v54 }
 0x3dd   : > { %v597_v56 = vsel %vm455_vm2, %v1035_v55, 0.0 }
 0x3de   : > { %598 = vadd.xlane.f32.xlu1 %v597_v56 }
 0x3f2   : > { %607 = vrot.lane.b32.xlu0 %v1023_v26, %s1130_s16 }
 0x469   : > { %v596_v57 = vpop.xlane.xlu0 %595 }
 0x46a   : > { %1036 = vrcp.f32 %v596_v57 }
 0x46b   : > { %v599_v58 = vpop.xlane.xlu1 %598 }
 0x46c   : > { %1038 = vrcp.f32 %v599_v58 }
 0x46d   : > { %v608_v59 = vpop.permute.xlu0 %607 }
 0x46e   : > { %919 = vmatpush3.bf16.msra.mxu0 %v608_v59 }
 0x474   : > { %v1037_v60 = vpop.eup %1036 }
 0x475   : > { %v604_v62 = vmul.f32 %v1037_v60, %v1033_v53 }
 0x476   : > { %v1039_v61 = vpop.eup %1038 }
 0x477   : > { %v605_v63 = vmul.f32 %v1039_v61, %v1035_v55 }
 0x479   : > { %v606_v0 = vpack.c.bf16 %v605_v63, %v604_v62 }
 0x47b   : > { %921 = vmatmul.mubr.msk.bf16.vlgmr.msra.gmra.mrb[4].mxu0 %vm455_vm2, %v606_v0 }
 0x54e   : > { %v647_v1 = vpop.f32.mrb[4].mxu0 }
 0x54f   : > { %v922_v2 = vpop.f32.mrb[5].mxu0 }
 0x550   : > { %v650_v3 = vpop.f32.mrb[6].mxu0 }
 0x551   : > { %v1016_v4 = vpack.i.bf16 %v650_v3, %v647_v1  ;;  %v923_v5 = vpop.f32.mrb[7].mxu0 }
 0x553   : > { %1017 = vrot.lane.b32.xlu1 %v1016_v4, %s1130_s16 }
 0x5c5   : > { %v1018_v6 = vpop.permute.xlu1 %1017  ;;  %680 = sbr.rel (!%p1264_p13) target bundleno = 1492 (0x5d4), region = 159 }
 0x5c6   : > { %v1020_v7 = vunpack.i.h.bf16 %v1018_v6  ;;  %v1019_v8 = vunpack.i.l.bf16 %v1018_v6 }
 0x5c8   : > { %v663_v9 = vsel %vm407_vm1, %v527_v39, %v1020_v7  ;;  %v662_v10 = vsel %vm407_vm1, %v524_v37, %v1019_v8 }
 0x5c9   : > { %v890_v11 = vpack.c.bf16 %v663_v9, %v662_v10 }
 0x5cb   : > { %891 = vst [vmem:[%s385_s12] sm:$0xff] %v890_v11  }
 0x5d2   : > { %v703_v12 = vld [vmem:[%s385_s12] sm:$0xf]  ;;  %v705_v13 = vld [vmem:[%s385_s12 + $0x4] sm:$0xf] }
 0x5d3   : > { %704 = vst [vmem:[%s687_s4] sm:$0xf] %v703_v12  ;;  %706 = vst [vmem:[%s687_s4 + $0x8] sm:$0xf] %v705_v13 }
 0x5d4 PF: > { %s13_s22 = sadd.s32 1, %s1126_s22   ;;  %s1393_s18 = sld [smem:[#allocation8_spill]] }
 0x5d5   : > { %p10_p4 = scmp.ge.s32.totalorder %s13_s22, 6   ;;  %s1394_s7 = sld [smem:[#allocation6_spill]] }
 0x5d6   : > { %s1395_s6 = sld [smem:[#allocation7_spill]]  ;;  %s1396_s12 = smov %s1090_s13 }
 0x5d7   : > { %s1397_s13 = smov %s1269_s26  ;;  %s1398_s14 = smov %s1098_s15 }
 0x5d8   : > { %s1399_s15 = smov %s1247_s28  ;;  %s1400_s16 = smov %s1106_s17 }
 0x5d9   : > { %s1403_s19 = smov %s1122_s21  ;;  %12 = sbr.rel (!%p10_p4) target bundleno = 8 (0x8), region = 247 }
 0x5da   : > { %s1401_s17 = smov %s1393_s18  ;;  %s1402_s18 = smov %s1118_s20 }
 0x5db   : > { %s1404_s20 = smov %s1394_s7 }
 0x5dc   : > { %s1405_s21 = smov %s1395_s6 }

// kernel: dinov2_layer_forward.7
= control target key start
LH: loop header
LB: loop body
LE: loop exit
PB: predicated region body
PF: predicated region fallthrough
CT: control target
= control target key end

     0   :  { %8 = vsyncpa [#allocation4], 0  ;;  %s1304_s0 = inlined_call_operand.vmem [shape: bf16[32,256], index: 0, kind: input, shape index: {}]   ;;  %s1305_s1 = inlined_call_operand.hbm [shape: bf16[256,768], index: 1, kind: input, shape index: {}]   ;;  %s1306_s2 = inlined_call_operand.vmem [shape: f32[1,768], index: 2, kind: input, shape index: {}]   ;;  %s1307_s3 = inlined_call_operand.vmem [shape: bf16[32,768], index: 3, kind: output, shape index: {}]  }
   0x1   :  { %10 = vsyncpa [#allocation4 + $0x1], 0  ;;  %s1118_s12 = smov 0   ;;  %s1120_s13 = smov 0  }
   0x2   :  { %s1122_s14 = smov 0   ;;  %s1124_s15 = smov 0  }
   0x3   :  { %s1126_s16 = smov 0   ;;  %s1128_s17 = smov 0  }
   0x4 LB: > { %s805_s18 = sadd.s32 4294967295, %s1092_s17   ;;  %s31_s19 = sadd.s32 1, %s1088_s16  ;;  %s1092_s17 = sphi %s1128_s17, %s16_s17   ;;  %s1088_s16 = sphi %s1126_s16, %s1318_s16   ;;  %s1084_s15 = sphi %s1124_s15, %s1317_s15   ;;  %s1080_s14 = sphi %s1122_s14, %s1316_s14   ;;  %s1076_s13 = sphi %s1120_s13, %s1315_s13   ;;  %s1072_s12 = sphi %s1118_s12, %s1314_s12  }
   0x5   : > { %p33_p0 = scmp.ge.s32.totalorder %s31_s19, 3  ;;  %s72_s20 = sadd.s32 1, %s1080_s14 }
   0x6   : > { %p79_p1 = scmp.ne.s32.totalorder %s1080_s14, %s1076_s13  ;;  %p80_p2 = scmp.eq.s32.totalorder %s1092_s17, 0 }
   0x7   : > { %s1320_s19 = smov (%p33_p0, %s31_s19), 0  ;;  %p85_p4 = scmp.ne.s32.totalorder %s1076_s13, %s1072_s12 }
   0x8   : > { %p1154_p3 = por %p80_p2, %p79_p1  ;;  %s68_s22 = ssub.s32 %s1088_s16, %s1320_s19 }
   0x9   : > { %p86_p5 = scmp.eq.s32.totalorder %s805_s18, 0  ;;  %p70_p6 = scmp.eq.s32.totalorder %s68_s22, 0 }
   0xa   : > { %p137_p7 = scmp.eq.s32.totalorder %s805_s18, 2  ;;  %p906_p10 = scmp.lt.s32.totalorder %s1092_s17, 3 }
   0xb   : > { %p1161_p8 = por %p86_p5, %p85_p4  ;;  %s178_s26 = sand.u32 1, %s1080_s14  }
   0xc   : > { %s1166_s24 = scalar_select %p70_p6, %s1080_s14, %s72_s20  }
   0xd   : > { %p1168_p9 = por %p137_p7, %p79_p1  ;;  %s862_s27 = sshll.u32 %s1088_s16, 7 }
   0xe   : > { %s810_s28 = sshll.u32 %s178_s26, 8  ;;  %s1178_s4 = scalar_lea.hbm %s1305_s1, %s862_s27 }
   0xf   : > { %s1310_s25 = scalar_select %p1168_p9, 1, 0 }
  0x10   : > { %s182_s5 = scalar_lea.vmem [#allocation3], %s810_s28  ;;  %p1182_p11 = pnand %p906_p10, %p1154_p3 }
  0x11   : > { %s192_s6 = sshll.u32 %s182_s5, 4  ;;  %s1189_s8 = scalar_lea.sflag [#allocation4], %s178_s26  ;;  %s1186_s6 = int_to_ptr.vmem [resolvable:$true] %s192_s6 }
  0x12   : > { %s1012_s9 = scalar_lea.hbm %s1178_s4, 4096  ;;  %p1014_p0 = pneg %p1182_p11 }
  0x13   : > { %p1013_p13 = scmp.ne.s32.totalorder %s1178_s4, %s1012_s9  ;;  %s1017_s12 = scalar_lea.hbm %s1305_s1, 12288 }
  0x14   : > { %p1018_p3 = scmp.lt.u32.totalorder %s1178_s4, %s1305_s1  ;;  %p1019_p4 = scmp.lt.u32.totalorder %s1017_s12, %s1012_s9 }
  0x15   : > { %p1015_p1 = pnand %p1014_p0, %p1013_p13  ;;  %p1021_p6 = scmp.lt.u32.totalorder %s1012_s9, %s1178_s4 }
  0x16   : > { %p1020_p5 = por %p1019_p4, %p1018_p3 }
  0x17   : > { %p1016_p2 = pneg %p1015_p1 }
  0x18   : > { %p1022_p7 = por %p1021_p6, %p1020_p5 }
  0x1a   : > { %p1023_p10 = pnand %p1022_p7, %p1016_p2 }
  0x1c   : > { %1026 = shalt.err (!%p1023_p10)
}
  0x1d   : > { %s1027_s21 = scalar_lea.vmem %s1186_s6, 4096  ;;  %s1094_s22 = smov [#allocation3]  }
  0x1e   : > { %p1028_p13 = scmp.ne.s32.totalorder %s1186_s6, %s1027_s21  ;;  %s1032_s26 = sshll.u32 %s1094_s22, 4  ;;  %s1033_s26 = int_to_ptr.vmem [resolvable:$false] %s1032_s26 }
  0x1f   : > { %s1034_s27 = scalar_lea.vmem %s1033_s26, 8192  ;;  %p1035_p9 = scmp.lt.s32.totalorder %s1186_s6, %s1033_s26 }
  0x20   : > { %p1030_p1 = pnand %p1028_p13, %p1014_p0  ;;  %p1036_p3 = scmp.lt.s32.totalorder %s1034_s27, %s1027_s21 }
  0x22   : > { %p1031_p12 = pneg %p1030_p1  ;;  %p1037_p4 = por %p1036_p3, %p1035_p9 }
  0x24   : > { %p1038_p5 = pnand %p1037_p4, %p1031_p12 }
  0x26   : > { %1041 = shalt.err (!%p1038_p5)
}
  0x27   : > { %s1095_s28 = smov 384   ;;  %s1096_s29 = smov 128  }
  0x28   : > { %s1097_s30 = smov 8   ;;  %p208_p0 = scmp.lt.s32.totalorder %s1092_s17, 4 }
  0x29   : > { %905 = dma.hbm_to_vmem [thread:$0]  (!%p1182_p11), %s1178_s4, 4096, %s1186_s6, %s1189_s8, %s1095_s28, %s1096_s29, %s1097_s30  }
  0x2a   : > { %p1312_p2 = scmp.ge.s32.totalorder %s1092_s17, 1 }
  0x2c   : > { %p209_p6 = pnand %p1312_p2, %p208_p0 }
  0x2d   : > { %s1221_s5 = sand.u32 (!%p209_p6), 1, %s1076_s13  }
  0x2e   : > { %212 = sbr.rel (%p209_p6) target bundleno = 347 (0x15b), region = 32  ;;  %s814_s9 = sshll.u32 (!%p209_p6), %s1221_s5, 8 }
  0x2f   : > { %s215_s10 = scalar_lea.sflag (!%p209_p6), [#allocation4], %s1221_s5  ;;  %s1225_s11 = scalar_lea.vmem (!%p209_p6), [#allocation3], %s814_s9 }
  0x35   : > { %1067 = dma.done.wait (%p1161_p8), %s215_s10, 4096  }
  0x36   : > { %1069 = vsyncadd (%p1161_p8), %s215_s10, 4294963200  ;;  %v958_v0 = vld [vmem:[%s1225_s11 + $0x4] ss:$8 sps:$4 sm:$0xff]   ;;  %v960_v1 = vld [vmem:[%s1225_s11] ss:$8 sps:$4 sm:$0xff]   ;;  %s816_s21 = sshll.u32 %s1084_s15, 1  ;;  %v593_v36 = vlaneseq }
  0x37   : > { %511 = vmatprep.subr.bf16.mxu0 %v958_v0  ;;  %868 = vmatprep.subr.bf16.mxu1 %v958_v0  ;;  %v961_v2 = vld [vmem:[%s1225_s11 + $0x14] ss:$8 sps:$4 sm:$0xff]   ;;  %v963_v3 = vld [vmem:[%s1225_s11 + $0x10] ss:$8 sps:$4 sm:$0xff]   ;;  %v964_v4 = vld [vmem:[%s1225_s11 + $0x24] ss:$8 sps:$4 sm:$0xff]  }
  0x38   : > { %512 = vmatpush1.bf16.msra.mxu0 %v960_v1  ;;  %884 = vmatpush1.bf16.msra.mxu1 %v960_v1  ;;  %v966_v5 = vld [vmem:[%s1225_s11 + $0x20] ss:$8 sps:$4 sm:$0xff]   ;;  %v967_v6 = vld [vmem:[%s1225_s11 + $0x34] ss:$8 sps:$4 sm:$0xff]   ;;  %v969_v7 = vld [vmem:[%s1225_s11 + $0x30] ss:$8 sps:$4 sm:$0xff]  }
  0x39   : > { %513 = vmatprep.subr.bf16.mxu0 %v961_v2  ;;  %869 = vmatprep.subr.bf16.mxu1 %v961_v2  ;;  %v970_v8 = vld [vmem:[%s1225_s11 + $0x44] ss:$8 sps:$4 sm:$0xff]   ;;  %v972_v9 = vld [vmem:[%s1225_s11 + $0x40] ss:$8 sps:$4 sm:$0xff]   ;;  %v973_v10 = vld [vmem:[%s1225_s11 + $0x54] ss:$8 sps:$4 sm:$0xff]  }
  0x3a   : > { %v975_v11 = vld [vmem:[%s1225_s11 + $0x50] ss:$8 sps:$4 sm:$0xff]   ;;  %v976_v12 = vld [vmem:[%s1225_s11 + $0x64] ss:$8 sps:$4 sm:$0xff]   ;;  %v978_v14 = vld [vmem:[%s1225_s11 + $0x60] ss:$8 sps:$4 sm:$0xff]  }
  0x3b   : > { %v1008_v13 = vld [vmem:[%s1304_s0 + $0x4] ss:$8 sps:$4 sm:$0xff]   ;;  %v1011_v15 = vld [vmem:[%s1304_s0 + $0x14] ss:$8 sps:$4 sm:$0xff]   ;;  %v981_v17 = vld [vmem:[%s1225_s11 + $0x70] ss:$8 sps:$4 sm:$0xff]  }
  0x3c   : > { %514 = vmatpush1.bf16.msra.mxu0 %v963_v3  ;;  %885 = vmatpush1.bf16.msra.mxu1 %v963_v3  ;;  %v979_v16 = vld [vmem:[%s1225_s11 + $0x74] ss:$8 sps:$4 sm:$0xff]   ;;  %v982_v18 = vld [vmem:[%s1225_s11 + $0x84] ss:$8 sps:$4 sm:$0xff]   ;;  %v984_v19 = vld [vmem:[%s1225_s11 + $0x80] ss:$8 sps:$4 sm:$0xff]  }
  0x3d   : > { %515 = vmatprep.subr.bf16.mxu0 %v964_v4  ;;  %870 = vmatprep.subr.bf16.mxu1 %v964_v4  ;;  %v985_v20 = vld [vmem:[%s1225_s11 + $0x94] ss:$8 sps:$4 sm:$0xff]   ;;  %v987_v21 = vld [vmem:[%s1225_s11 + $0x90] ss:$8 sps:$4 sm:$0xff]   ;;  %v988_v22 = vld [vmem:[%s1225_s11 + $0xa4] ss:$8 sps:$4 sm:$0xff]  }
  0x3e   : > { %543 = vmatprep.mubr.bf16.mxu0 %v1008_v13  ;;  %553 = vmatprep.mubr.bf16.mxu1 %v1011_v15  ;;  %v990_v23 = vld [vmem:[%s1225_s11 + $0xa0] ss:$8 sps:$4 sm:$0xff]   ;;  %v991_v24 = vld [vmem:[%s1225_s11 + $0xb4] ss:$8 sps:$4 sm:$0xff]   ;;  %v993_v25 = vld [vmem:[%s1225_s11 + $0xb0] ss:$8 sps:$4 sm:$0xff]  }
  0x3f   : > { %v994_v26 = vld [vmem:[%s1225_s11 + $0xc4] ss:$8 sps:$4 sm:$0xff]   ;;  %v996_v27 = vld [vmem:[%s1225_s11 + $0xc0] ss:$8 sps:$4 sm:$0xff]   ;;  %v997_v28 = vld [vmem:[%s1225_s11 + $0xd4] ss:$8 sps:$4 sm:$0xff]  }
  0x40   : > { %516 = vmatpush1.bf16.msra.mxu0 %v966_v5  ;;  %886 = vmatpush1.bf16.msra.mxu1 %v966_v5  ;;  %v999_v29 = vld [vmem:[%s1225_s11 + $0xd0] ss:$8 sps:$4 sm:$0xff]   ;;  %v1000_v30 = vld [vmem:[%s1225_s11 + $0xe4] ss:$8 sps:$4 sm:$0xff]   ;;  %v1002_v31 = vld [vmem:[%s1225_s11 + $0xe0] ss:$8 sps:$4 sm:$0xff]  }
  0x41   : > { %517 = vmatprep.subr.bf16.mxu0 %v967_v6  ;;  %871 = vmatprep.subr.bf16.mxu1 %v967_v6  ;;  %v1003_v32 = vld [vmem:[%s1225_s11 + $0xf4] ss:$8 sps:$4 sm:$0xff]   ;;  %v1005_v33 = vld [vmem:[%s1225_s11 + $0xf0] ss:$8 sps:$4 sm:$0xff]   ;;  %v1006_v34 = vld [vmem:[%s1304_s0] ss:$8 sps:$4 sm:$0xff]  }
  0x42   : > { %v1009_v35 = vld [vmem:[%s1304_s0 + $0x10] ss:$8 sps:$4 sm:$0xff]   ;;  %p269_p8 = scmp.lt.s32.totalorder %s816_s21, 5  ;;  %v594_v37 = vshrl.u32 %v593_v36, 7  ;;  %s815_s28 = sshll.u32 %s1221_s5, 5 }
  0x43   : > { %s253_s29 = scalar_lea.vmem [#allocation5], %s815_s28  ;;  %p1313_p9 = scmp.ne.s32.totalorder %s1310_s25, 0 }
  0x44   : > { %518 = vmatpush1.bf16.msra.mxu0 %v969_v7  ;;  %887 = vmatpush1.bf16.msra.mxu1 %v969_v7  ;;  %s1322_s21 = smov (!%p269_p8, %s816_s21), 5  ;;  %v595_v38 = vsub.s32 0, %v594_v37  ;;  %v599_v40 = vsub.s32 1, %v594_v37  ;;  %s867_s30 = sshll.u32 (%p1313_p9), %s1084_s15, 3 }
  0x45   : > { %519 = vmatprep.subr.bf16.mxu0 %v970_v8  ;;  %872 = vmatprep.subr.bf16.mxu1 %v970_v8  ;;  %s271_s27 = scalar_lea.vmem %s1306_s2, %s1322_s21  ;;  %s651_s10 = scalar_lea.vmem (%p1313_p9), %s1307_s3, %s867_s30 }
  0x46   : > { %v591_v39 = vld [vmem:[%s271_s27] sm:$0x3] }
  0x47   : > { %v596_v41 = vrot.slane %v591_v39, %v595_v38  ;;  %v600_v42 = vrot.slane %v591_v39, %v599_v40 }
  0x48   : > { %520 = vmatpush1.bf16.msra.mxu0 %v972_v9  ;;  %888 = vmatpush1.bf16.msra.mxu1 %v972_v9 }
  0x49   : > { %521 = vmatprep.subr.bf16.mxu0 %v973_v10  ;;  %873 = vmatprep.subr.bf16.mxu1 %v973_v10 }
  0x4c   : > { %522 = vmatpush1.bf16.msra.mxu0 %v975_v11  ;;  %889 = vmatpush1.bf16.msra.mxu1 %v975_v11 }
  0x4d   : > { %523 = vmatprep.subr.bf16.mxu0 %v976_v12  ;;  %874 = vmatprep.subr.bf16.mxu1 %v976_v12 }
  0x50   : > { %524 = vmatpush1.bf16.msra.mxu0 %v978_v14  ;;  %890 = vmatpush1.bf16.msra.mxu1 %v978_v14 }
  0x51   : > { %525 = vmatprep.subr.bf16.mxu0 %v979_v16  ;;  %875 = vmatprep.subr.bf16.mxu1 %v979_v16 }
  0x54   : > { %526 = vmatpush1.bf16.msra.mxu0 %v981_v17  ;;  %891 = vmatpush1.bf16.msra.mxu1 %v981_v17 }
  0x55   : > { %527 = vmatprep.subr.bf16.mxu0 %v982_v18  ;;  %876 = vmatprep.subr.bf16.mxu1 %v982_v18 }
  0x58   : > { %528 = vmatpush1.bf16.msra.mxu0 %v984_v19  ;;  %892 = vmatpush1.bf16.msra.mxu1 %v984_v19 }
  0x59   : > { %529 = vmatprep.subr.bf16.mxu0 %v985_v20  ;;  %877 = vmatprep.subr.bf16.mxu1 %v985_v20 }
  0x5c   : > { %530 = vmatpush1.bf16.msra.mxu0 %v987_v21  ;;  %893 = vmatpush1.bf16.msra.mxu1 %v987_v21 }
  0x5d   : > { %531 = vmatprep.subr.bf16.mxu0 %v988_v22  ;;  %878 = vmatprep.subr.bf16.mxu1 %v988_v22 }
  0x60   : > { %532 = vmatpush1.bf16.msra.mxu0 %v990_v23  ;;  %894 = vmatpush1.bf16.msra.mxu1 %v990_v23 }
  0x61   : > { %533 = vmatprep.subr.bf16.mxu0 %v991_v24  ;;  %879 = vmatprep.subr.bf16.mxu1 %v991_v24 }
  0x64   : > { %534 = vmatpush1.bf16.msra.mxu0 %v993_v25  ;;  %895 = vmatpush1.bf16.msra.mxu1 %v993_v25 }
  0x65   : > { %535 = vmatprep.subr.bf16.mxu0 %v994_v26  ;;  %880 = vmatprep.subr.bf16.mxu1 %v994_v26 }
  0x68   : > { %536 = vmatpush1.bf16.msra.mxu0 %v996_v27  ;;  %896 = vmatpush1.bf16.msra.mxu1 %v996_v27 }
  0x69   : > { %537 = vmatprep.subr.bf16.mxu0 %v997_v28  ;;  %881 = vmatprep.subr.bf16.mxu1 %v997_v28 }
  0x6c   : > { %538 = vmatpush1.bf16.msra.mxu0 %v999_v29  ;;  %897 = vmatpush1.bf16.msra.mxu1 %v999_v29 }
  0x6d   : > { %539 = vmatprep.subr.bf16.mxu0 %v1000_v30  ;;  %882 = vmatprep.subr.bf16.mxu1 %v1000_v30 }
  0x70   : > { %540 = vmatpush1.bf16.msra.mxu0 %v1002_v31  ;;  %898 = vmatpush1.bf16.msra.mxu1 %v1002_v31 }
  0x71   : > { %541 = vmatprep.subr.bf16.mxu0 %v1003_v32  ;;  %883 = vmatprep.subr.bf16.mxu1 %v1003_v32 }
  0x74   : > { %542 = vmatpush1.bf16.msra.mxu0 %v1005_v33  ;;  %899 = vmatpush1.bf16.msra.mxu1 %v1005_v33 }
  0x77   : > { %544 = vmatmul.mubr.bf16.vlgmr.msra.gmra.mrb[0].mxu0 %v1006_v34  ;;  %554 = vmatmul.mubr.bf16.vlgmr.msra.gmra.mrb[0].mxu1 %v1009_v35 }
 0x14a   : > { %v545_v43 = vpop.f32.mrb[0].mxu0  ;;  %v555_v44 = vpop.f32.mrb[0].mxu1 }
 0x14b   : > { %v603_v45 = vadd.f32 %v596_v41, %v545_v43  ;;  %v607_v46 = vadd.f32 %v596_v41, %v555_v44  ;;  %v547_v47 = vpop.f32.mrb[1].mxu0  ;;  %v557_v48 = vpop.f32.mrb[1].mxu1 }
 0x14c   : > { %v604_v49 = vadd.f32 %v600_v42, %v547_v47  ;;  %v608_v50 = vadd.f32 %v600_v42, %v557_v48  ;;  %v549_v51 = vpop.f32.mrb[2].mxu0  ;;  %v559_v52 = vpop.f32.mrb[2].mxu1  ;;  %645 = sbr.rel (!%p1313_p9) target bundleno = 347 (0x15b), region = 48 }
 0x14d   : > { %v605_v53 = vadd.f32 %v596_v41, %v549_v51  ;;  %v609_v54 = vadd.f32 %v596_v41, %v559_v52  ;;  %v551_v55 = vpop.f32.mrb[3].mxu0  ;;  %v561_v56 = vpop.f32.mrb[3].mxu1 }
 0x14e   : > { %v863_v57 = vpack.c.bf16 %v604_v49, %v603_v45  ;;  %v865_v58 = vpack.c.bf16 %v608_v50, %v607_v46  ;;  %v606_v59 = vadd.f32 %v600_v42, %v551_v55  ;;  %v610_v60 = vadd.f32 %v600_v42, %v561_v56 }
 0x150   : > { %635 = vst [vmem:[%s253_s29] sm:$0xff] %v863_v57  ;;  %637 = vst [vmem:[%s253_s29 + $0x10] sm:$0xff] %v865_v58  ;;  %v864_v61 = vpack.c.bf16 %v606_v59, %v605_v53  ;;  %v866_v62 = vpack.c.bf16 %v610_v60, %v609_v54 }
 0x152   : > { %636 = vst [vmem:[%s253_s29 + $0x8] sm:$0xff] %v864_v61  ;;  %638 = vst [vmem:[%s253_s29 + $0x18] sm:$0xff] %v866_v62 }
 0x157   : > { %v685_v63 = vld [vmem:[%s253_s29] sm:$0xff]  ;;  %v689_v1 = vld [vmem:[%s253_s29 + $0x10] sm:$0xff] }
 0x158   : > { %686 = vst [vmem:[%s651_s10] sm:$0xff] %v685_v63  ;;  %690 = vst [vmem:[%s651_s10 + $0x30] sm:$0xff] %v689_v1 }
 0x159   : > { %v687_v0 = vld [vmem:[%s253_s29 + $0x8] sm:$0xff]  ;;  %v691_v2 = vld [vmem:[%s253_s29 + $0x18] sm:$0xff] }
 0x15a   : > { %688 = vst [vmem:[%s651_s10 + $0x18] sm:$0xff] %v687_v0  ;;  %692 = vst [vmem:[%s651_s10 + $0x48] sm:$0xff] %v691_v2 }
 0x15b PF: > { %s16_s17 = sadd.s32 1, %s1092_s17   ;;  %s1314_s12 = smov %s1076_s13 }
 0x15c   : > { %p13_p11 = scmp.ge.s32.totalorder %s16_s17, 5   ;;  %s1315_s13 = smov %s1080_s14 }
 0x15d   : > { %s1316_s14 = smov %s1166_s24  ;;  %s1317_s15 = smov %s1088_s16 }
 0x15e   : > { %s1318_s16 = smov %s1320_s19  ;;  %15 = sbr.rel (!%p13_p11) target bundleno = 4 (0x4), region = 124 }
 0x165   :  { %708 = vsyncpa [#allocation4], 1 }
 0x166   :  { %710 = vsyncpa [#allocation4 + $0x1], 1 }

// kernel: dinov2_layer_forward.9
= control target key start
LH: loop header
LB: loop body
LE: loop exit
PB: predicated region body
PF: predicated region fallthrough
CT: control target
= control target key end

     0   :  { %v346_v36 = vlaneseq  ;;  %s934_s1 = inlined_call_operand.vmem [shape: bf16[256,256], index: 1, kind: input, shape index: {}]   ;;  %s935_s0 = inlined_call_operand.vmem [shape: bf16[32,256], index: 0, kind: input, shape index: {}]   ;;  %s936_s2 = inlined_call_operand.vmem [shape: f32[1,256], index: 2, kind: input, shape index: {}]   ;;  %s937_s3 = inlined_call_operand.vmem [shape: f32[1,256], index: 3, kind: input, shape index: {}]   ;;  %s938_s4 = inlined_call_operand.vmem [shape: f32[32,256], index: 4, kind: input, shape index: {}]   ;;  %s939_s7 = inlined_call_operand.vmem [shape: f32[32,256], index: 7, kind: output, shape index: {0}]   ;;  %s940_s5 = inlined_call_operand.vmem [shape: f32[1,256], index: 5, kind: input, shape index: {}]   ;;  %s941_s6 = inlined_call_operand.vmem [shape: f32[1,256], index: 6, kind: input, shape index: {}]   ;;  %s942_s8 = inlined_call_operand.vmem [shape: bf16[32,256], index: 8, kind: output, shape index: {1}]  }
   0x1   :  { %v625_v0 = vld [vmem:[%s934_s1 + $0x4] ss:$8 sps:$4 sm:$0xff]   ;;  %v627_v1 = vld [vmem:[%s934_s1] ss:$8 sps:$4 sm:$0xff]   ;;  %v628_v2 = vld [vmem:[%s934_s1 + $0x14] ss:$8 sps:$4 sm:$0xff]  }
   0x2   :  { %264 = vmatprep.subr.bf16.mxu0 %v625_v0  ;;  %593 = vmatprep.subr.bf16.mxu1 %v625_v0  ;;  %v630_v3 = vld [vmem:[%s934_s1 + $0x10] ss:$8 sps:$4 sm:$0xff]   ;;  %v631_v4 = vld [vmem:[%s934_s1 + $0x24] ss:$8 sps:$4 sm:$0xff]   ;;  %v633_v5 = vld [vmem:[%s934_s1 + $0x20] ss:$8 sps:$4 sm:$0xff]  }
   0x3   :  { %265 = vmatpush1.bf16.msra.mxu0 %v627_v1  ;;  %609 = vmatpush1.bf16.msra.mxu1 %v627_v1  ;;  %v634_v6 = vld [vmem:[%s934_s1 + $0x34] ss:$8 sps:$4 sm:$0xff]   ;;  %v636_v7 = vld [vmem:[%s934_s1 + $0x30] ss:$8 sps:$4 sm:$0xff]   ;;  %v637_v8 = vld [vmem:[%s934_s1 + $0x44] ss:$8 sps:$4 sm:$0xff]  }
   0x4   :  { %266 = vmatprep.subr.bf16.mxu0 %v628_v2  ;;  %594 = vmatprep.subr.bf16.mxu1 %v628_v2  ;;  %v639_v9 = vld [vmem:[%s934_s1 + $0x40] ss:$8 sps:$4 sm:$0xff]   ;;  %v640_v10 = vld [vmem:[%s934_s1 + $0x54] ss:$8 sps:$4 sm:$0xff]   ;;  %v642_v11 = vld [vmem:[%s934_s1 + $0x50] ss:$8 sps:$4 sm:$0xff]  }
   0x5   :  { %v643_v12 = vld [vmem:[%s934_s1 + $0x64] ss:$8 sps:$4 sm:$0xff]   ;;  %v645_v14 = vld [vmem:[%s934_s1 + $0x60] ss:$8 sps:$4 sm:$0xff]   ;;  %v678_v15 = vld [vmem:[%s935_s0 + $0x14] ss:$8 sps:$4 sm:$0xff]  }
   0x6   :  { %v675_v13 = vld [vmem:[%s935_s0 + $0x4] ss:$8 sps:$4 sm:$0xff]   ;;  %v646_v16 = vld [vmem:[%s934_s1 + $0x74] ss:$8 sps:$4 sm:$0xff]   ;;  %306 = vmatprep.mubr.bf16.mxu1 %v678_v15  ;;  %v648_v17 = vld [vmem:[%s934_s1 + $0x70] ss:$8 sps:$4 sm:$0xff]  }
   0x7   :  { %267 = vmatpush1.bf16.msra.mxu0 %v630_v3  ;;  %610 = vmatpush1.bf16.msra.mxu1 %v630_v3  ;;  %v649_v18 = vld [vmem:[%s934_s1 + $0x84] ss:$8 sps:$4 sm:$0xff]   ;;  %v651_v19 = vld [vmem:[%s934_s1 + $0x80] ss:$8 sps:$4 sm:$0xff]   ;;  %v652_v20 = vld [vmem:[%s934_s1 + $0x94] ss:$8 sps:$4 sm:$0xff]  }
   0x8   :  { %268 = vmatprep.subr.bf16.mxu0 %v631_v4  ;;  %595 = vmatprep.subr.bf16.mxu1 %v631_v4  ;;  %v654_v21 = vld [vmem:[%s934_s1 + $0x90] ss:$8 sps:$4 sm:$0xff]   ;;  %v655_v22 = vld [vmem:[%s934_s1 + $0xa4] ss:$8 sps:$4 sm:$0xff]   ;;  %v657_v23 = vld [vmem:[%s934_s1 + $0xa0] ss:$8 sps:$4 sm:$0xff]  }
   0x9   :  { %296 = vmatprep.mubr.bf16.mxu0 %v675_v13  ;;  %v658_v24 = vld [vmem:[%s934_s1 + $0xb4] ss:$8 sps:$4 sm:$0xff]   ;;  %v660_v25 = vld [vmem:[%s934_s1 + $0xb0] ss:$8 sps:$4 sm:$0xff]   ;;  %v661_v26 = vld [vmem:[%s934_s1 + $0xc4] ss:$8 sps:$4 sm:$0xff]  }
   0xa   :  { %v663_v27 = vld [vmem:[%s934_s1 + $0xc0] ss:$8 sps:$4 sm:$0xff]   ;;  %v664_v28 = vld [vmem:[%s934_s1 + $0xd4] ss:$8 sps:$4 sm:$0xff]   ;;  %v666_v29 = vld [vmem:[%s934_s1 + $0xd0] ss:$8 sps:$4 sm:$0xff]  }
   0xb   :  { %269 = vmatpush1.bf16.msra.mxu0 %v633_v5  ;;  %611 = vmatpush1.bf16.msra.mxu1 %v633_v5  ;;  %v667_v30 = vld [vmem:[%s934_s1 + $0xe4] ss:$8 sps:$4 sm:$0xff]   ;;  %v669_v31 = vld [vmem:[%s934_s1 + $0xe0] ss:$8 sps:$4 sm:$0xff]   ;;  %v670_v32 = vld [vmem:[%s934_s1 + $0xf4] ss:$8 sps:$4 sm:$0xff]  }
   0xc   :  { %270 = vmatprep.subr.bf16.mxu0 %v634_v6  ;;  %596 = vmatprep.subr.bf16.mxu1 %v634_v6  ;;  %v672_v33 = vld [vmem:[%s934_s1 + $0xf0] ss:$8 sps:$4 sm:$0xff]   ;;  %v673_v34 = vld [vmem:[%s935_s0] ss:$8 sps:$4 sm:$0xff]   ;;  %v347_v37 = vshrl.u32 %v346_v36, 7 }
   0xd   :  { %v676_v35 = vld [vmem:[%s935_s0 + $0x10] ss:$8 sps:$4 sm:$0xff]   ;;  %v344_v39 = vld [vmem:[%s936_s2] sm:$0x3]  ;;  %v389_v0 = vld [vmem:[%s938_s4 + $0x28] sm:$0xff] }
   0xe   :  { %v840_v38 = vsub.s32 0, %v347_v37  ;;  %v845_v40 = vsub.s32 1, %v347_v37  ;;  %v364_v41 = vld [vmem:[%s937_s3] sm:$0x3]  ;;  %v385_v1 = vld [vmem:[%s938_s4 + $0x8] sm:$0xff]  ;;  %v386_v4 = vld [vmem:[%s938_s4 + $0x10] sm:$0xff] }
   0xf   :  { %271 = vmatpush1.bf16.msra.mxu0 %v636_v7  ;;  %612 = vmatpush1.bf16.msra.mxu1 %v636_v7  ;;  %v388_v56 = vld [vmem:[%s938_s4 + $0x20] sm:$0xff]  ;;  %v390_v6 = vld [vmem:[%s938_s4 + $0x30] sm:$0xff] }
  0x10   :  { %272 = vmatprep.subr.bf16.mxu0 %v637_v8  ;;  %597 = vmatprep.subr.bf16.mxu1 %v637_v8  ;;  %v349_v42 = vrot.slane %v344_v39, %v840_v38  ;;  %v353_v43 = vrot.slane %v344_v39, %v845_v40  ;;  %v369_v44 = vrot.slane %v364_v41, %v840_v38  ;;  %v384_v57 = vld [vmem:[%s938_s4] sm:$0xff] }
  0x11   :  { %v373_v47 = vrot.slane %v364_v41, %v845_v40 }
  0x13   :  { %273 = vmatpush1.bf16.msra.mxu0 %v639_v9  ;;  %613 = vmatpush1.bf16.msra.mxu1 %v639_v9  ;;  %v387_v9 = vld [vmem:[%s938_s4 + $0x18] sm:$0xff] }
  0x14   :  { %274 = vmatprep.subr.bf16.mxu0 %v640_v10  ;;  %598 = vmatprep.subr.bf16.mxu1 %v640_v10 }
  0x17   :  { %275 = vmatpush1.bf16.msra.mxu0 %v642_v11  ;;  %614 = vmatpush1.bf16.msra.mxu1 %v642_v11  ;;  %v391_v11 = vld [vmem:[%s938_s4 + $0x38] sm:$0xff] }
  0x18   :  { %276 = vmatprep.subr.bf16.mxu0 %v643_v12  ;;  %599 = vmatprep.subr.bf16.mxu1 %v643_v12 }
  0x1b   :  { %277 = vmatpush1.bf16.msra.mxu0 %v645_v14  ;;  %615 = vmatpush1.bf16.msra.mxu1 %v645_v14 }
  0x1c   :  { %278 = vmatprep.subr.bf16.mxu0 %v646_v16  ;;  %600 = vmatprep.subr.bf16.mxu1 %v646_v16 }
  0x1f   :  { %279 = vmatpush1.bf16.msra.mxu0 %v648_v17  ;;  %616 = vmatpush1.bf16.msra.mxu1 %v648_v17 }
  0x20   :  { %280 = vmatprep.subr.bf16.mxu0 %v649_v18  ;;  %601 = vmatprep.subr.bf16.mxu1 %v649_v18 }
  0x23   :  { %281 = vmatpush1.bf16.msra.mxu0 %v651_v19  ;;  %617 = vmatpush1.bf16.msra.mxu1 %v651_v19 }
  0x24   :  { %282 = vmatprep.subr.bf16.mxu0 %v652_v20  ;;  %602 = vmatprep.subr.bf16.mxu1 %v652_v20 }
  0x27   :  { %283 = vmatpush1.bf16.msra.mxu0 %v654_v21  ;;  %618 = vmatpush1.bf16.msra.mxu1 %v654_v21 }
  0x28   :  { %284 = vmatprep.subr.bf16.mxu0 %v655_v22  ;;  %603 = vmatprep.subr.bf16.mxu1 %v655_v22 }
  0x2b   :  { %285 = vmatpush1.bf16.msra.mxu0 %v657_v23  ;;  %619 = vmatpush1.bf16.msra.mxu1 %v657_v23 }
  0x2c   :  { %286 = vmatprep.subr.bf16.mxu0 %v658_v24  ;;  %604 = vmatprep.subr.bf16.mxu1 %v658_v24 }
  0x2f   :  { %287 = vmatpush1.bf16.msra.mxu0 %v660_v25  ;;  %620 = vmatpush1.bf16.msra.mxu1 %v660_v25 }
  0x30   :  { %288 = vmatprep.subr.bf16.mxu0 %v661_v26  ;;  %605 = vmatprep.subr.bf16.mxu1 %v661_v26 }
  0x33   :  { %289 = vmatpush1.bf16.msra.mxu0 %v663_v27  ;;  %621 = vmatpush1.bf16.msra.mxu1 %v663_v27 }
  0x34   :  { %290 = vmatprep.subr.bf16.mxu0 %v664_v28  ;;  %606 = vmatprep.subr.bf16.mxu1 %v664_v28 }
  0x37   :  { %291 = vmatpush1.bf16.msra.mxu0 %v666_v29  ;;  %622 = vmatpush1.bf16.msra.mxu1 %v666_v29 }
  0x38   :  { %292 = vmatprep.subr.bf16.mxu0 %v667_v30  ;;  %607 = vmatprep.subr.bf16.mxu1 %v667_v30 }
  0x3b   :  { %293 = vmatpush1.bf16.msra.mxu0 %v669_v31  ;;  %623 = vmatpush1.bf16.msra.mxu1 %v669_v31 }
  0x3c   :  { %294 = vmatprep.subr.bf16.mxu0 %v670_v32  ;;  %608 = vmatprep.subr.bf16.mxu1 %v670_v32 }
  0x3f   :  { %295 = vmatpush1.bf16.msra.mxu0 %v672_v33  ;;  %624 = vmatpush1.bf16.msra.mxu1 %v672_v33 }
  0x42   :  { %297 = vmatmul.mubr.bf16.vlgmr.msra.gmra.mrb[0].mxu0 %v673_v34  ;;  %307 = vmatmul.mubr.bf16.vlgmr.msra.gmra.mrb[0].mxu1 %v676_v35 }
 0x115   :  { %v298_v45 = vpop.f32.mrb[0].mxu0  ;;  %v308_v46 = vpop.f32.mrb[0].mxu1 }
 0x116   :  { %v356_v48 = vadd.f32 %v349_v42, %v298_v45  ;;  %v360_v49 = vadd.f32 %v349_v42, %v308_v46  ;;  %v300_v50 = vpop.f32.mrb[1].mxu0  ;;  %v310_v51 = vpop.f32.mrb[1].mxu1 }
 0x117   :  { %v357_v52 = vadd.f32 %v353_v43, %v300_v50  ;;  %v361_v53 = vadd.f32 %v353_v43, %v310_v51  ;;  %v302_v54 = vpop.f32.mrb[2].mxu0  ;;  %v312_v55 = vpop.f32.mrb[2].mxu1 }
 0x118   :  { %v376_v58 = vmul.f32 %v369_v44, %v356_v48  ;;  %v380_v59 = vmul.f32 %v369_v44, %v360_v49  ;;  %v358_v60 = vadd.f32 %v349_v42, %v302_v54  ;;  %v304_v61 = vpop.f32.mrb[3].mxu0  ;;  %v362_v62 = vadd.f32 %v349_v42, %v312_v55  ;;  %v314_v63 = vpop.f32.mrb[3].mxu1 }
 0x119   :  { %v377_v2 = vmul.f32 %v373_v47, %v357_v52  ;;  %v381_v3 = vmul.f32 %v373_v47, %v361_v53  ;;  %v359_v5 = vadd.f32 %v353_v43, %v304_v61  ;;  %v363_v7 = vadd.f32 %v353_v43, %v314_v63 }
 0x11a   :  { %v378_v8 = vmul.f32 %v369_v44, %v358_v60  ;;  %v382_v10 = vmul.f32 %v369_v44, %v362_v62  ;;  %v396_v12 = vadd.f32 %v388_v56, %v380_v59  ;;  %v392_v13 = vadd.f32 %v384_v57, %v376_v58 }
 0x11b   :  { %v379_v14 = vmul.f32 %v373_v47, %v359_v5  ;;  %v383_v15 = vmul.f32 %v373_v47, %v363_v7  ;;  %v397_v16 = vadd.f32 %v389_v0, %v381_v3  ;;  %v393_v17 = vadd.f32 %v385_v1, %v377_v2  ;;  %v493_v5 = vld [vmem:[%s941_s6] sm:$0x3] }
 0x11c   :  { %v394_v18 = vadd.f32 %v386_v4, %v378_v8  ;;  %v398_v19 = vadd.f32 %v390_v6, %v382_v10  ;;  %404 = vst [vmem:[%s939_s7 + $0x20] sm:$0xff] %v396_v12  ;;  %400 = vst [vmem:[%s939_s7] sm:$0xff] %v392_v13  ;;  %v473_v4 = vld [vmem:[%s940_s5] sm:$0x3]  ;;  %v502_v10 = vrot.slane %v493_v5, %v845_v40 }
 0x11d   :  { %v395_v20 = vadd.f32 %v387_v9, %v379_v14  ;;  %v399_v21 = vadd.f32 %v391_v11, %v383_v15  ;;  %v414_v22 = vadd.f32 %v397_v16, %v396_v12  ;;  %405 = vst [vmem:[%s939_s7 + $0x28] sm:$0xff] %v397_v16  ;;  %v408_v23 = vadd.f32 %v393_v17, %v392_v13 }
 0x11e   :  { %401 = vst [vmem:[%s939_s7 + $0x8] sm:$0xff] %v393_v17  ;;  %402 = vst [vmem:[%s939_s7 + $0x10] sm:$0xff] %v394_v18  ;;  %v478_v6 = vrot.slane %v473_v4, %v840_v38  ;;  %v482_v7 = vrot.slane %v473_v4, %v845_v40  ;;  %v498_v9 = vrot.slane %v493_v5, %v840_v38 }
 0x11f   :  { %406 = vst [vmem:[%s939_s7 + $0x30] sm:$0xff] %v398_v19  ;;  %403 = vst [vmem:[%s939_s7 + $0x18] sm:$0xff] %v395_v20  ;;  %415 = vadd.xlane.f32.xlu1 %v414_v22  ;;  %409 = vadd.xlane.f32.xlu0 %v408_v23  ;;  %v417_v24 = vadd.f32 %v399_v21, %v398_v19  ;;  %v411_v25 = vadd.f32 %v395_v20, %v394_v18 }
 0x120   :  { %407 = vst [vmem:[%s939_s7 + $0x38] sm:$0xff] %v399_v21 }
 0x123   :  { %418 = vadd.xlane.f32.xlu1 %v417_v24  ;;  %412 = vadd.xlane.f32.xlu0 %v411_v25 }
 0x1ac   :  { %v416_v26 = vpop.xlane.xlu1 %415  ;;  %v410_v27 = vpop.xlane.xlu0 %409 }
 0x1ad   :  { %v423_v28 = vmul.f32 0.00390625, %v416_v26  ;;  %v421_v29 = vmul.f32 0.00390625, %v410_v27 }
 0x1af   :  { %v425_v30 = vsub.f32 %v392_v13, %v421_v29  ;;  %v426_v31 = vsub.f32 %v393_v17, %v421_v29  ;;  %v429_v32 = vsub.f32 %v396_v12, %v423_v28  ;;  %v430_v33 = vsub.f32 %v397_v16, %v423_v28 }
 0x1b0   :  { %v419_v34 = vpop.xlane.xlu1 %418  ;;  %v413_v35 = vpop.xlane.xlu0 %412 }
 0x1b1   :  { %v424_v36 = vmul.f32 0.00390625, %v419_v34  ;;  %v422_v37 = vmul.f32 0.00390625, %v413_v35  ;;  %v433_v39 = vmul.f32 %v425_v30, %v425_v30  ;;  %v434_v41 = vmul.f32 %v426_v31, %v426_v31 }
 0x1b2   :  { %v437_v47 = vmul.f32 %v429_v32, %v429_v32  ;;  %v438_v48 = vmul.f32 %v430_v33, %v430_v33 }
 0x1b3   :  { %v902_v42 = vsub.f32 %v398_v19, %v424_v36  ;;  %v904_v43 = vsub.f32 %v399_v21, %v424_v36  ;;  %v427_v44 = vsub.f32 %v394_v18, %v422_v37  ;;  %v428_v45 = vsub.f32 %v395_v20, %v422_v37 }
 0x1b4   :  { %v441_v46 = vadd.f32 %v434_v41, %v433_v39  ;;  %v447_v54 = vadd.f32 %v438_v48, %v437_v47 }
 0x1b5   :  { %v435_v49 = vmul.f32 %v427_v44, %v427_v44  ;;  %v436_v50 = vmul.f32 %v428_v45, %v428_v45  ;;  %v439_v52 = vmul.f32 %v902_v42, %v902_v42  ;;  %v440_v53 = vmul.f32 %v904_v43, %v904_v43 }
 0x1b6   :  { %442 = vadd.xlane.f32.xlu0 %v441_v46 }
 0x1b7   :  { %v444_v51 = vadd.f32 %v436_v50, %v435_v49  ;;  %v450_v55 = vadd.f32 %v440_v53, %v439_v52 }
 0x1b9   :  { %445 = vadd.xlane.f32.xlu1 %v444_v51 }
 0x1ba   :  { %448 = vadd.xlane.f32.xlu0 %v447_v54 }
 0x1bd   :  { %451 = vadd.xlane.f32.xlu1 %v450_v55 }
 0x243   :  { %v443_v56 = vpop.xlane.xlu0 %442 }
 0x244   :  { %v453_v57 = vmul.f32 0.00390625, %v443_v56 }
 0x246   :  { %v457_v58 = vadd.f32 1e-06, %v453_v57  ;;  %v446_v59 = vpop.xlane.xlu1 %445 }
 0x247   :  { %v454_v60 = vmul.f32 0.00390625, %v446_v59  ;;  %v449_v61 = vpop.xlane.xlu0 %448 }
 0x248   :  { %679 = vrsqrt.f32 %v457_v58  ;;  %v455_v62 = vmul.f32 0.00390625, %v449_v61 }
 0x249   :  { %v458_v63 = vadd.f32 1e-06, %v454_v60 }
 0x24a   :  { %v459_v0 = vadd.f32 1e-06, %v455_v62  ;;  %v452_v1 = vpop.xlane.xlu1 %451 }
 0x24b   :  { %681 = vrsqrt.f32 %v458_v63  ;;  %v456_v2 = vmul.f32 0.00390625, %v452_v1 }
 0x24c   :  { %683 = vrsqrt.f32 %v459_v0 }
 0x24d   :  { %v460_v3 = vadd.f32 1e-06, %v456_v2 }
 0x24f   :  { %685 = vrsqrt.f32 %v460_v3 }
 0x252   :  { %v680_v8 = vpop.eup %679 }
 0x253   :  { %v465_v11 = vmul.f32 %v680_v8, %v425_v30  ;;  %v466_v12 = vmul.f32 %v680_v8, %v426_v31 }
 0x255   :  { %v682_v13 = vpop.eup %681  ;;  %v485_v14 = vmul.f32 %v478_v6, %v465_v11  ;;  %v486_v15 = vmul.f32 %v482_v7, %v466_v12 }
 0x256   :  { %v684_v16 = vpop.eup %683  ;;  %v467_v17 = vmul.f32 %v682_v13, %v427_v44  ;;  %v468_v18 = vmul.f32 %v682_v13, %v428_v45 }
 0x257   :  { %v505_v19 = vadd.f32 %v498_v9, %v485_v14  ;;  %v506_v20 = vadd.f32 %v502_v10, %v486_v15  ;;  %v469_v21 = vmul.f32 %v684_v16, %v429_v32  ;;  %v470_v22 = vmul.f32 %v684_v16, %v430_v33 }
 0x258   :  { %v487_v23 = vmul.f32 %v478_v6, %v467_v17  ;;  %v488_v24 = vmul.f32 %v482_v7, %v468_v18 }
 0x259   :  { %v686_v25 = vpop.eup %685  ;;  %v589_v26 = vpack.c.bf16 %v506_v20, %v505_v19  ;;  %v489_v27 = vmul.f32 %v478_v6, %v469_v21  ;;  %v490_v38 = vmul.f32 %v482_v7, %v470_v22 }
 0x25a   :  { %v507_v28 = vadd.f32 %v498_v9, %v487_v23  ;;  %v508_v40 = vadd.f32 %v502_v10, %v488_v24  ;;  %v471_v29 = vmul.f32 %v686_v25, %v902_v42  ;;  %v472_v30 = vmul.f32 %v686_v25, %v904_v43 }
 0x25b   :  { %537 = vst [vmem:[%s942_s8] sm:$0xff] %v589_v26  ;;  %v509_v31 = vadd.f32 %v498_v9, %v489_v27  ;;  %v510_v34 = vadd.f32 %v502_v10, %v490_v38 }
 0x25c   :  { %v590_v32 = vpack.c.bf16 %v508_v40, %v507_v28  ;;  %v491_v33 = vmul.f32 %v478_v6, %v471_v29  ;;  %v492_v35 = vmul.f32 %v482_v7, %v472_v30 }
 0x25d   :  { %v591_v36 = vpack.c.bf16 %v510_v34, %v509_v31 }
 0x25e   :  { %538 = vst [vmem:[%s942_s8 + $0x8] sm:$0xff] %v590_v32  ;;  %v511_v37 = vadd.f32 %v498_v9, %v491_v33  ;;  %v512_v39 = vadd.f32 %v502_v10, %v492_v35 }
 0x25f   :  { %539 = vst [vmem:[%s942_s8 + $0x10] sm:$0xff] %v591_v36 }
 0x260   :  { %v592_v41 = vpack.c.bf16 %v512_v39, %v511_v37 }
 0x262   :  { %540 = vst [vmem:[%s942_s8 + $0x18] sm:$0xff] %v592_v41 }

// kernel: dinov2_layer_forward.11
= control target key start
LH: loop header
LB: loop body
LE: loop exit
PB: predicated region body
PF: predicated region fallthrough
CT: control target
= control target key end

     0   :  { %s1161_s1 = inlined_call_operand.vmem [shape: bf16[512,256], index: 1, kind: input, shape index: {}]   ;;  %s1162_s0 = inlined_call_operand.vmem [shape: bf16[32,512], index: 0, kind: input, shape index: {}]   ;;  %s1163_s2 = inlined_call_operand.vmem [shape: f32[1,256], index: 2, kind: input, shape index: {}]   ;;  %s1164_s3 = inlined_call_operand.vmem [shape: f32[1,256], index: 3, kind: input, shape index: {}]   ;;  %s1165_s4 = inlined_call_operand.vmem [shape: f32[32,256], index: 4, kind: input, shape index: {}, may-alias: {4,5}]   ;;  %s1166_s5 = inlined_call_operand.vmem [shape: f32[32,256], index: 5, kind: output, shape index: {}, may-alias: {4,5}]  }
   0x1   :  { %v753_v0 = vld [vmem:[%s1161_s1 + $0x4] ss:$8 sps:$4 sm:$0xff]   ;;  %v757_v2 = vld [vmem:[%s1161_s1] ss:$8 sps:$4 sm:$0xff]   ;;  %v759_v4 = vld [vmem:[%s1161_s1 + $0x14] ss:$8 sps:$4 sm:$0xff]  }
   0x2   :  { %v755_v1 = vld [vmem:[%s1161_s1 + $0x104] ss:$8 sps:$4 sm:$0xff]   ;;  %472 = vmatprep.subr.bf16.mxu1 %v753_v0  ;;  %v758_v3 = vld [vmem:[%s1161_s1 + $0x100] ss:$8 sps:$4 sm:$0xff]   ;;  %v761_v5 = vld [vmem:[%s1161_s1 + $0x114] ss:$8 sps:$4 sm:$0xff]  }
   0x3   :  { %525 = vmatprep.subr.bf16.mxu0 %v755_v1  ;;  %473 = vmatpush1.bf16.msra.mxu1 %v757_v2  ;;  %v763_v6 = vld [vmem:[%s1161_s1 + $0x10] ss:$8 sps:$4 sm:$0xff]   ;;  %v765_v8 = vld [vmem:[%s1161_s1 + $0x24] ss:$8 sps:$4 sm:$0xff]   ;;  %v769_v10 = vld [vmem:[%s1161_s1 + $0x20] ss:$8 sps:$4 sm:$0xff]  }
   0x4   :  { %526 = vmatpush1.bf16.msra.mxu0 %v758_v3  ;;  %474 = vmatprep.subr.bf16.mxu1 %v759_v4  ;;  %v764_v7 = vld [vmem:[%s1161_s1 + $0x110] ss:$8 sps:$4 sm:$0xff]   ;;  %v767_v9 = vld [vmem:[%s1161_s1 + $0x124] ss:$8 sps:$4 sm:$0xff]   ;;  %v770_v11 = vld [vmem:[%s1161_s1 + $0x120] ss:$8 sps:$4 sm:$0xff]  }
   0x5   :  { %527 = vmatprep.subr.bf16.mxu0 %v761_v5  ;;  %v771_v12 = vld [vmem:[%s1161_s1 + $0x34] ss:$8 sps:$4 sm:$0xff]   ;;  %v775_v14 = vld [vmem:[%s1161_s1 + $0x30] ss:$8 sps:$4 sm:$0xff]   ;;  %v777_v16 = vld [vmem:[%s1161_s1 + $0x44] ss:$8 sps:$4 sm:$0xff]  }
   0x6   :  { %v773_v13 = vld [vmem:[%s1161_s1 + $0x134] ss:$8 sps:$4 sm:$0xff]   ;;  %v776_v15 = vld [vmem:[%s1161_s1 + $0x130] ss:$8 sps:$4 sm:$0xff]   ;;  %v779_v17 = vld [vmem:[%s1161_s1 + $0x144] ss:$8 sps:$4 sm:$0xff]  }
   0x7   :  { %475 = vmatpush1.bf16.msra.mxu1 %v763_v6  ;;  %v781_v18 = vld [vmem:[%s1161_s1 + $0x40] ss:$8 sps:$4 sm:$0xff]   ;;  %v783_v20 = vld [vmem:[%s1161_s1 + $0x54] ss:$8 sps:$4 sm:$0xff]   ;;  %v787_v22 = vld [vmem:[%s1161_s1 + $0x50] ss:$8 sps:$4 sm:$0xff]  }
   0x8   :  { %528 = vmatpush1.bf16.msra.mxu0 %v764_v7  ;;  %476 = vmatprep.subr.bf16.mxu1 %v765_v8  ;;  %v782_v19 = vld [vmem:[%s1161_s1 + $0x140] ss:$8 sps:$4 sm:$0xff]   ;;  %v785_v21 = vld [vmem:[%s1161_s1 + $0x154] ss:$8 sps:$4 sm:$0xff]   ;;  %v788_v23 = vld [vmem:[%s1161_s1 + $0x150] ss:$8 sps:$4 sm:$0xff]   ;;  %v607_v8 = vlaneseq }
   0x9   :  { %529 = vmatprep.subr.bf16.mxu0 %v767_v9  ;;  %v789_v24 = vld [vmem:[%s1161_s1 + $0x64] ss:$8 sps:$4 sm:$0xff]   ;;  %v793_v26 = vld [vmem:[%s1161_s1 + $0x60] ss:$8 sps:$4 sm:$0xff]   ;;  %v795_v28 = vld [vmem:[%s1161_s1 + $0x74] ss:$8 sps:$4 sm:$0xff]  }
   0xa   :  { %v791_v25 = vld [vmem:[%s1161_s1 + $0x164] ss:$8 sps:$4 sm:$0xff]   ;;  %v794_v27 = vld [vmem:[%s1161_s1 + $0x160] ss:$8 sps:$4 sm:$0xff]   ;;  %v797_v29 = vld [vmem:[%s1161_s1 + $0x174] ss:$8 sps:$4 sm:$0xff]  }
   0xb   :  { %477 = vmatpush1.bf16.msra.mxu1 %v769_v10  ;;  %v799_v30 = vld [vmem:[%s1161_s1 + $0x70] ss:$8 sps:$4 sm:$0xff]   ;;  %v801_v32 = vld [vmem:[%s1161_s1 + $0x84] ss:$8 sps:$4 sm:$0xff]   ;;  %v805_v34 = vld [vmem:[%s1161_s1 + $0x80] ss:$8 sps:$4 sm:$0xff]  }
   0xc   :  { %530 = vmatpush1.bf16.msra.mxu0 %v770_v11  ;;  %478 = vmatprep.subr.bf16.mxu1 %v771_v12  ;;  %v800_v31 = vld [vmem:[%s1161_s1 + $0x170] ss:$8 sps:$4 sm:$0xff]   ;;  %v803_v33 = vld [vmem:[%s1161_s1 + $0x184] ss:$8 sps:$4 sm:$0xff]   ;;  %v806_v35 = vld [vmem:[%s1161_s1 + $0x180] ss:$8 sps:$4 sm:$0xff]  }
   0xd   :  { %531 = vmatprep.subr.bf16.mxu0 %v773_v13  ;;  %v807_v36 = vld [vmem:[%s1161_s1 + $0x94] ss:$8 sps:$4 sm:$0xff]   ;;  %v811_v38 = vld [vmem:[%s1161_s1 + $0x90] ss:$8 sps:$4 sm:$0xff]   ;;  %v813_v40 = vld [vmem:[%s1161_s1 + $0xa4] ss:$8 sps:$4 sm:$0xff]  }
   0xe   :  { %v809_v37 = vld [vmem:[%s1161_s1 + $0x194] ss:$8 sps:$4 sm:$0xff]   ;;  %v812_v39 = vld [vmem:[%s1161_s1 + $0x190] ss:$8 sps:$4 sm:$0xff]   ;;  %v815_v41 = vld [vmem:[%s1161_s1 + $0x1a4] ss:$8 sps:$4 sm:$0xff]  }
   0xf   :  { %479 = vmatpush1.bf16.msra.mxu1 %v775_v14  ;;  %v817_v42 = vld [vmem:[%s1161_s1 + $0xa0] ss:$8 sps:$4 sm:$0xff]   ;;  %v819_v44 = vld [vmem:[%s1161_s1 + $0xb4] ss:$8 sps:$4 sm:$0xff]   ;;  %v823_v46 = vld [vmem:[%s1161_s1 + $0xb0] ss:$8 sps:$4 sm:$0xff]  }
  0x10   :  { %532 = vmatpush1.bf16.msra.mxu0 %v776_v15  ;;  %480 = vmatprep.subr.bf16.mxu1 %v777_v16  ;;  %v818_v43 = vld [vmem:[%s1161_s1 + $0x1a0] ss:$8 sps:$4 sm:$0xff]   ;;  %v821_v45 = vld [vmem:[%s1161_s1 + $0x1b4] ss:$8 sps:$4 sm:$0xff]   ;;  %v824_v47 = vld [vmem:[%s1161_s1 + $0x1b0] ss:$8 sps:$4 sm:$0xff]  }
  0x11   :  { %533 = vmatprep.subr.bf16.mxu0 %v779_v17  ;;  %v825_v48 = vld [vmem:[%s1161_s1 + $0xc4] ss:$8 sps:$4 sm:$0xff]   ;;  %v829_v52 = vld [vmem:[%s1161_s1 + $0xc0] ss:$8 sps:$4 sm:$0xff]   ;;  %v831_v54 = vld [vmem:[%s1161_s1 + $0xd4] ss:$8 sps:$4 sm:$0xff]  }
  0x12   :  { %v851_v49 = vld [vmem:[%s1162_s0 + $0x4] ss:$16 sps:$4 sm:$0xff]   ;;  %v854_v51 = vld [vmem:[%s1162_s0 + $0xc] ss:$16 sps:$4 sm:$0xff]   ;;  %v830_v53 = vld [vmem:[%s1161_s1 + $0x1c0] ss:$8 sps:$4 sm:$0xff]  }
  0x13   :  { %481 = vmatpush1.bf16.msra.mxu1 %v781_v18  ;;  %v827_v50 = vld [vmem:[%s1161_s1 + $0x1c4] ss:$8 sps:$4 sm:$0xff]   ;;  %504 = vmatprep.mubr.bf16.mxu1 %v851_v49  ;;  %v833_v55 = vld [vmem:[%s1161_s1 + $0x1d4] ss:$8 sps:$4 sm:$0xff]   ;;  %v835_v56 = vld [vmem:[%s1161_s1 + $0xd0] ss:$8 sps:$4 sm:$0xff]  }
  0x14   :  { %534 = vmatpush1.bf16.msra.mxu0 %v782_v19  ;;  %482 = vmatprep.subr.bf16.mxu1 %v783_v20  ;;  %v836_v57 = vld [vmem:[%s1161_s1 + $0x1d0] ss:$8 sps:$4 sm:$0xff]   ;;  %v837_v58 = vld [vmem:[%s1161_s1 + $0xe4] ss:$8 sps:$4 sm:$0xff]   ;;  %v841_v60 = vld [vmem:[%s1161_s1 + $0xe0] ss:$8 sps:$4 sm:$0xff]  }
  0x15   :  { %535 = vmatprep.subr.bf16.mxu0 %v785_v21  ;;  %557 = vmatprep.mubr.bf16.mxu0 %v854_v51  ;;  %v839_v59 = vld [vmem:[%s1161_s1 + $0x1e4] ss:$8 sps:$4 sm:$0xff]   ;;  %v842_v61 = vld [vmem:[%s1161_s1 + $0x1e0] ss:$8 sps:$4 sm:$0xff]   ;;  %v843_v62 = vld [vmem:[%s1161_s1 + $0xf4] ss:$8 sps:$4 sm:$0xff]  }
  0x16   :  { %v845_v63 = vld [vmem:[%s1161_s1 + $0x1f4] ss:$8 sps:$4 sm:$0xff]   ;;  %v847_v0 = vld [vmem:[%s1161_s1 + $0xf0] ss:$8 sps:$4 sm:$0xff]   ;;  %v608_v9 = vshrl.u32 %v607_v8, 7 }
  0x17   :  { %483 = vmatpush1.bf16.msra.mxu1 %v787_v22  ;;  %v848_v1 = vld [vmem:[%s1161_s1 + $0x1f0] ss:$8 sps:$4 sm:$0xff]   ;;  %v855_v4 = vld [vmem:[%s1162_s0 + $0x24] ss:$16 sps:$4 sm:$0xff]   ;;  %v857_v5 = vld [vmem:[%s1162_s0 + $0x2c] ss:$16 sps:$4 sm:$0xff]  }
  0x18   :  { %536 = vmatpush1.bf16.msra.mxu0 %v788_v23  ;;  %484 = vmatprep.subr.bf16.mxu1 %v789_v24  ;;  %v849_v2 = vld [vmem:[%s1162_s0] ss:$16 sps:$4 sm:$0xff]   ;;  %v852_v3 = vld [vmem:[%s1162_s0 + $0x8] ss:$16 sps:$4 sm:$0xff]   ;;  %v609_v10 = vsub.s32 0, %v608_v9  ;;  %v613_v12 = vsub.s32 1, %v608_v9 }
  0x19   :  { %537 = vmatprep.subr.bf16.mxu0 %v791_v25  ;;  %v859_v6 = vld [vmem:[%s1162_s0 + $0x20] ss:$16 sps:$4 sm:$0xff]   ;;  %v860_v7 = vld [vmem:[%s1162_s0 + $0x28] ss:$16 sps:$4 sm:$0xff]  }
  0x1a   :  { %v605_v11 = vld [vmem:[%s1163_s2] sm:$0x3] }
  0x1b   :  { %485 = vmatpush1.bf16.msra.mxu1 %v793_v26  ;;  %v625_v13 = vld [vmem:[%s1164_s3] sm:$0x3]  ;;  %v610_v14 = vrot.slane %v605_v11, %v609_v10  ;;  %v614_v17 = vrot.slane %v605_v11, %v613_v12 }
  0x1c   :  { %538 = vmatpush1.bf16.msra.mxu0 %v794_v27  ;;  %486 = vmatprep.subr.bf16.mxu1 %v795_v28  ;;  %v630_v19 = vrot.slane %v625_v13, %v609_v10  ;;  %v634_v23 = vrot.slane %v625_v13, %v613_v12 }
  0x1d   :  { %539 = vmatprep.subr.bf16.mxu0 %v797_v29 }
  0x1f   :  { %487 = vmatpush1.bf16.msra.mxu1 %v799_v30  ;;  %v645_v30 = vld [vmem:[%s1165_s4] sm:$0xff] }
  0x20   :  { %540 = vmatpush1.bf16.msra.mxu0 %v800_v31  ;;  %488 = vmatprep.subr.bf16.mxu1 %v801_v32 }
  0x21   :  { %541 = vmatprep.subr.bf16.mxu0 %v803_v33 }
  0x23   :  { %489 = vmatpush1.bf16.msra.mxu1 %v805_v34  ;;  %v646_v34 = vld [vmem:[%s1165_s4 + $0x8] sm:$0xff] }
  0x24   :  { %542 = vmatpush1.bf16.msra.mxu0 %v806_v35  ;;  %490 = vmatprep.subr.bf16.mxu1 %v807_v36 }
  0x25   :  { %543 = vmatprep.subr.bf16.mxu0 %v809_v37  ;;  %v647_v37 = vld [vmem:[%s1165_s4 + $0x10] sm:$0xff] }
  0x27   :  { %491 = vmatpush1.bf16.msra.mxu1 %v811_v38 }
  0x28   :  { %544 = vmatpush1.bf16.msra.mxu0 %v812_v39  ;;  %492 = vmatprep.subr.bf16.mxu1 %v813_v40 }
  0x29   :  { %545 = vmatprep.subr.bf16.mxu0 %v815_v41  ;;  %v648_v41 = vld [vmem:[%s1165_s4 + $0x18] sm:$0xff] }
  0x2b   :  { %493 = vmatpush1.bf16.msra.mxu1 %v817_v42 }
  0x2c   :  { %546 = vmatpush1.bf16.msra.mxu0 %v818_v43  ;;  %494 = vmatprep.subr.bf16.mxu1 %v819_v44 }
  0x2d   :  { %547 = vmatprep.subr.bf16.mxu0 %v821_v45 }
  0x2f   :  { %495 = vmatpush1.bf16.msra.mxu1 %v823_v46 }
  0x30   :  { %548 = vmatpush1.bf16.msra.mxu0 %v824_v47  ;;  %496 = vmatprep.subr.bf16.mxu1 %v825_v48 }
  0x31   :  { %549 = vmatprep.subr.bf16.mxu0 %v827_v50 }
  0x33   :  { %497 = vmatpush1.bf16.msra.mxu1 %v829_v52 }
  0x34   :  { %550 = vmatpush1.bf16.msra.mxu0 %v830_v53  ;;  %498 = vmatprep.subr.bf16.mxu1 %v831_v54 }
  0x35   :  { %551 = vmatprep.subr.bf16.mxu0 %v833_v55 }
  0x37   :  { %499 = vmatpush1.bf16.msra.mxu1 %v835_v56 }
  0x38   :  { %552 = vmatpush1.bf16.msra.mxu0 %v836_v57  ;;  %500 = vmatprep.subr.bf16.mxu1 %v837_v58 }
  0x39   :  { %553 = vmatprep.subr.bf16.mxu0 %v839_v59 }
  0x3b   :  { %501 = vmatpush1.bf16.msra.mxu1 %v841_v60 }
  0x3c   :  { %554 = vmatpush1.bf16.msra.mxu0 %v842_v61  ;;  %502 = vmatprep.subr.bf16.mxu1 %v843_v62 }
  0x3d   :  { %555 = vmatprep.subr.bf16.mxu0 %v845_v63 }
  0x3f   :  { %503 = vmatpush1.bf16.msra.mxu1 %v847_v0 }
  0x40   :  { %556 = vmatpush1.bf16.msra.mxu0 %v848_v1 }
  0x42   :  { %505 = vmatmul.mubr.bf16.vlgmr.msra.gmra.mrb[0].mxu1 %v849_v2 }
  0x43   :  { %558 = vmatmul.mubr.bf16.vlgmr.msra.gmra.mrb[0].mxu0 %v852_v3  ;;  %514 = vmatprep.mubr.bf16.mxu1 %v855_v4 }
  0x44   :  { %567 = vmatprep.mubr.bf16.mxu0 %v857_v5 }
  0x4a   :  { %515 = vmatmul.mubr.bf16.gmra.mrb[4].mxu1 %v859_v6 }
  0x4b   :  { %568 = vmatmul.mubr.bf16.gmra.mrb[4].mxu0 %v860_v7 }
 0x115   :  { %v506_v15 = vpop.f32.mrb[0].mxu1 }
 0x116   :  { %v559_v16 = vpop.f32.mrb[0].mxu0  ;;  %v508_v20 = vpop.f32.mrb[1].mxu1 }
 0x117   :  { %v560_v18 = vadd.f32 %v559_v16, %v506_v15  ;;  %v561_v21 = vpop.f32.mrb[1].mxu0  ;;  %v510_v24 = vpop.f32.mrb[2].mxu1 }
 0x118   :  { %v562_v22 = vadd.f32 %v561_v21, %v508_v20  ;;  %v563_v25 = vpop.f32.mrb[2].mxu0  ;;  %v512_v28 = vpop.f32.mrb[3].mxu1 }
 0x119   :  { %v617_v26 = vadd.f32 %v610_v14, %v560_v18  ;;  %v564_v27 = vadd.f32 %v563_v25, %v510_v24  ;;  %v565_v29 = vpop.f32.mrb[3].mxu0 }
 0x11a   :  { %v618_v31 = vadd.f32 %v614_v17, %v562_v22  ;;  %v566_v32 = vadd.f32 %v565_v29, %v512_v28 }
 0x11b   :  { %v637_v33 = vmul.f32 %v630_v19, %v617_v26  ;;  %v619_v35 = vadd.f32 %v610_v14, %v564_v27 }
 0x11c   :  { %v638_v36 = vmul.f32 %v634_v23, %v618_v31  ;;  %v620_v38 = vadd.f32 %v614_v17, %v566_v32 }
 0x11d   :  { %v653_v39 = vadd.f32 %v645_v30, %v637_v33  ;;  %v639_v40 = vmul.f32 %v630_v19, %v619_v35  ;;  %v516_v44 = vpop.f32.mrb[4].mxu1 }
 0x11e   :  { %v654_v42 = vadd.f32 %v646_v34, %v638_v36  ;;  %v640_v43 = vmul.f32 %v634_v23, %v620_v38  ;;  %v569_v45 = vpop.f32.mrb[4].mxu0  ;;  %v518_v48 = vpop.f32.mrb[5].mxu1 }
 0x11f   :  { %661 = vst [vmem:[%s1166_s5] sm:$0xff] %v653_v39  ;;  %v655_v46 = vadd.f32 %v647_v37, %v639_v40  ;;  %v570_v47 = vadd.f32 %v569_v45, %v516_v44  ;;  %v571_v49 = vpop.f32.mrb[5].mxu0  ;;  %v520_v52 = vpop.f32.mrb[6].mxu1 }
 0x120   :  { %662 = vst [vmem:[%s1166_s5 + $0x8] sm:$0xff] %v654_v42  ;;  %v656_v50 = vadd.f32 %v648_v41, %v640_v43  ;;  %v572_v51 = vadd.f32 %v571_v49, %v518_v48  ;;  %v573_v53 = vpop.f32.mrb[6].mxu0  ;;  %v522_v56 = vpop.f32.mrb[7].mxu1 }
 0x121   :  { %663 = vst [vmem:[%s1166_s5 + $0x10] sm:$0xff] %v655_v46  ;;  %v621_v54 = vadd.f32 %v610_v14, %v570_v47  ;;  %v574_v55 = vadd.f32 %v573_v53, %v520_v52  ;;  %v575_v57 = vpop.f32.mrb[7].mxu0 }
 0x122   :  { %664 = vst [vmem:[%s1166_s5 + $0x18] sm:$0xff] %v656_v50  ;;  %v622_v59 = vadd.f32 %v614_v17, %v572_v51  ;;  %v576_v60 = vadd.f32 %v575_v57, %v522_v56 }
 0x123   :  { %v641_v61 = vmul.f32 %v630_v19, %v621_v54  ;;  %v623_v63 = vadd.f32 %v610_v14, %v574_v55 }
 0x124   :  { %v642_v0 = vmul.f32 %v634_v23, %v622_v59  ;;  %v624_v2 = vadd.f32 %v614_v17, %v576_v60 }
 0x125   :  { %v643_v4 = vmul.f32 %v630_v19, %v623_v63 }
 0x126   :  { %v644_v7 = vmul.f32 %v634_v23, %v624_v2 }
 0x129   :  { %v649_v58 = vld [vmem:[%s1165_s4 + $0x20] sm:$0xff]  ;;  %v650_v62 = vld [vmem:[%s1165_s4 + $0x28] sm:$0xff]  ;;  %v651_v1 = vld [vmem:[%s1165_s4 + $0x30] sm:$0xff] }
 0x12a   :  { %v657_v3 = vadd.f32 %v649_v58, %v641_v61  ;;  %v652_v5 = vld [vmem:[%s1165_s4 + $0x38] sm:$0xff]  ;;  %v658_v6 = vadd.f32 %v650_v62, %v642_v0  ;;  %v659_v8 = vadd.f32 %v651_v1, %v643_v4 }
 0x12b   :  { %v660_v9 = vadd.f32 %v652_v5, %v644_v7 }
 0x12c   :  { %665 = vst [vmem:[%s1166_s5 + $0x20] sm:$0xff] %v657_v3  ;;  %666 = vst [vmem:[%s1166_s5 + $0x28] sm:$0xff] %v658_v6 }
 0x12d   :  { %667 = vst [vmem:[%s1166_s5 + $0x30] sm:$0xff] %v659_v8  ;;  %668 = vst [vmem:[%s1166_s5 + $0x38] sm:$0xff] %v660_v9 }

// kernel: dinov2_layer_forward.10
= control target key start
LH: loop header
LB: loop body
LE: loop exit
PB: predicated region body
PF: predicated region fallthrough
CT: control target
= control target key end

     0   :  { %s2471_s1 = inlined_call_operand.vmem [shape: bf16[256,512], index: 1, kind: input, shape index: {}]   ;;  %s2472_s0 = inlined_call_operand.vmem [shape: bf16[32,256], index: 0, kind: input, shape index: {}]   ;;  %s2473_s3 = inlined_call_operand.vmem [shape: bf16[256,512], index: 3, kind: input, shape index: {}]   ;;  %s2474_s2 = inlined_call_operand.vmem [shape: f32[1,512], index: 2, kind: input, shape index: {}]   ;;  %s2475_s4 = inlined_call_operand.vmem [shape: f32[1,512], index: 4, kind: input, shape index: {}]   ;;  %s2476_s5 = inlined_call_operand.vmem [shape: bf16[32,512], index: 5, kind: output, shape index: {}]  }
   0x1   :  { %v1619_v0 = vld [vmem:[%s2471_s1 + $0x4] ss:$16 sps:$4 sm:$0xff]   ;;  %v1621_v1 = vld [vmem:[%s2471_s1 + $0xc] ss:$16 sps:$4 sm:$0xff]   ;;  %v1623_v2 = vld [vmem:[%s2471_s1] ss:$16 sps:$4 sm:$0xff]  }
   0x2   :  { %480 = vmatprep.subr.bf16.mxu0 %v1619_v0  ;;  %v1624_v3 = vld [vmem:[%s2471_s1 + $0x8] ss:$16 sps:$4 sm:$0xff]   ;;  %533 = vmatprep.subr.bf16.mxu1 %v1621_v1  ;;  %v1625_v4 = vld [vmem:[%s2471_s1 + $0x24] ss:$16 sps:$4 sm:$0xff]   ;;  %v1627_v5 = vld [vmem:[%s2471_s1 + $0x2c] ss:$16 sps:$4 sm:$0xff]  }
   0x3   :  { %481 = vmatpush1.bf16.msra.mxu0 %v1623_v2  ;;  %534 = vmatpush1.bf16.msra.mxu1 %v1624_v3  ;;  %v1629_v6 = vld [vmem:[%s2471_s1 + $0x20] ss:$16 sps:$4 sm:$0xff]   ;;  %v1630_v7 = vld [vmem:[%s2471_s1 + $0x28] ss:$16 sps:$4 sm:$0xff]   ;;  %v1631_v8 = vld [vmem:[%s2471_s1 + $0x44] ss:$16 sps:$4 sm:$0xff]  }
   0x4   :  { %482 = vmatprep.subr.bf16.mxu0 %v1625_v4  ;;  %535 = vmatprep.subr.bf16.mxu1 %v1627_v5  ;;  %v1633_v9 = vld [vmem:[%s2471_s1 + $0x4c] ss:$16 sps:$4 sm:$0xff]   ;;  %v1635_v10 = vld [vmem:[%s2471_s1 + $0x40] ss:$16 sps:$4 sm:$0xff]   ;;  %v1636_v11 = vld [vmem:[%s2471_s1 + $0x48] ss:$16 sps:$4 sm:$0xff]  }
   0x5   :  { %v1637_v12 = vld [vmem:[%s2471_s1 + $0x64] ss:$16 sps:$4 sm:$0xff]   ;;  %v1639_v13 = vld [vmem:[%s2471_s1 + $0x6c] ss:$16 sps:$4 sm:$0xff]   ;;  %v1641_v14 = vld [vmem:[%s2471_s1 + $0x60] ss:$16 sps:$4 sm:$0xff]  }
   0x6   :  { %v1642_v15 = vld [vmem:[%s2471_s1 + $0x68] ss:$16 sps:$4 sm:$0xff]   ;;  %v1643_v16 = vld [vmem:[%s2471_s1 + $0x84] ss:$16 sps:$4 sm:$0xff]   ;;  %v1645_v17 = vld [vmem:[%s2471_s1 + $0x8c] ss:$16 sps:$4 sm:$0xff]  }
   0x7   :  { %483 = vmatpush1.bf16.msra.mxu0 %v1629_v6  ;;  %536 = vmatpush1.bf16.msra.mxu1 %v1630_v7  ;;  %v1647_v18 = vld [vmem:[%s2471_s1 + $0x80] ss:$16 sps:$4 sm:$0xff]   ;;  %v1648_v19 = vld [vmem:[%s2471_s1 + $0x88] ss:$16 sps:$4 sm:$0xff]   ;;  %v1649_v20 = vld [vmem:[%s2471_s1 + $0xa4] ss:$16 sps:$4 sm:$0xff]  }
   0x8   :  { %484 = vmatprep.subr.bf16.mxu0 %v1631_v8  ;;  %537 = vmatprep.subr.bf16.mxu1 %v1633_v9  ;;  %v1651_v21 = vld [vmem:[%s2471_s1 + $0xac] ss:$16 sps:$4 sm:$0xff]   ;;  %v1653_v22 = vld [vmem:[%s2471_s1 + $0xa0] ss:$16 sps:$4 sm:$0xff]   ;;  %v1654_v23 = vld [vmem:[%s2471_s1 + $0xa8] ss:$16 sps:$4 sm:$0xff]  }
   0x9   :  { %v1655_v24 = vld [vmem:[%s2471_s1 + $0xc4] ss:$16 sps:$4 sm:$0xff]   ;;  %v1657_v25 = vld [vmem:[%s2471_s1 + $0xcc] ss:$16 sps:$4 sm:$0xff]   ;;  %v1659_v26 = vld [vmem:[%s2471_s1 + $0xc0] ss:$16 sps:$4 sm:$0xff]  }
   0xa   :  { %v1660_v27 = vld [vmem:[%s2471_s1 + $0xc8] ss:$16 sps:$4 sm:$0xff]   ;;  %v1661_v28 = vld [vmem:[%s2471_s1 + $0xe4] ss:$16 sps:$4 sm:$0xff]   ;;  %v1663_v29 = vld [vmem:[%s2471_s1 + $0xec] ss:$16 sps:$4 sm:$0xff]  }
   0xb   :  { %485 = vmatpush1.bf16.msra.mxu0 %v1635_v10  ;;  %538 = vmatpush1.bf16.msra.mxu1 %v1636_v11  ;;  %v1665_v30 = vld [vmem:[%s2471_s1 + $0xe0] ss:$16 sps:$4 sm:$0xff]   ;;  %v1666_v31 = vld [vmem:[%s2471_s1 + $0xe8] ss:$16 sps:$4 sm:$0xff]   ;;  %v1667_v32 = vld [vmem:[%s2471_s1 + $0x104] ss:$16 sps:$4 sm:$0xff]  }
   0xc   :  { %486 = vmatprep.subr.bf16.mxu0 %v1637_v12  ;;  %539 = vmatprep.subr.bf16.mxu1 %v1639_v13  ;;  %v1669_v33 = vld [vmem:[%s2471_s1 + $0x10c] ss:$16 sps:$4 sm:$0xff]   ;;  %v1671_v34 = vld [vmem:[%s2471_s1 + $0x100] ss:$16 sps:$4 sm:$0xff]   ;;  %v1672_v35 = vld [vmem:[%s2471_s1 + $0x108] ss:$16 sps:$4 sm:$0xff]  }
   0xd   :  { %v1673_v36 = vld [vmem:[%s2471_s1 + $0x124] ss:$16 sps:$4 sm:$0xff]   ;;  %v1675_v37 = vld [vmem:[%s2471_s1 + $0x12c] ss:$16 sps:$4 sm:$0xff]   ;;  %v1677_v38 = vld [vmem:[%s2471_s1 + $0x120] ss:$16 sps:$4 sm:$0xff]  }
   0xe   :  { %v1678_v39 = vld [vmem:[%s2471_s1 + $0x128] ss:$16 sps:$4 sm:$0xff]   ;;  %v1679_v40 = vld [vmem:[%s2471_s1 + $0x144] ss:$16 sps:$4 sm:$0xff]   ;;  %v1681_v41 = vld [vmem:[%s2471_s1 + $0x14c] ss:$16 sps:$4 sm:$0xff]  }
   0xf   :  { %487 = vmatpush1.bf16.msra.mxu0 %v1641_v14  ;;  %540 = vmatpush1.bf16.msra.mxu1 %v1642_v15  ;;  %v1683_v42 = vld [vmem:[%s2471_s1 + $0x140] ss:$16 sps:$4 sm:$0xff]   ;;  %v1684_v43 = vld [vmem:[%s2471_s1 + $0x148] ss:$16 sps:$4 sm:$0xff]   ;;  %v1685_v44 = vld [vmem:[%s2471_s1 + $0x164] ss:$16 sps:$4 sm:$0xff]  }
  0x10   :  { %488 = vmatprep.subr.bf16.mxu0 %v1643_v16  ;;  %541 = vmatprep.subr.bf16.mxu1 %v1645_v17  ;;  %v1687_v45 = vld [vmem:[%s2471_s1 + $0x16c] ss:$16 sps:$4 sm:$0xff]   ;;  %v1689_v46 = vld [vmem:[%s2471_s1 + $0x160] ss:$16 sps:$4 sm:$0xff]   ;;  %v1690_v47 = vld [vmem:[%s2471_s1 + $0x168] ss:$16 sps:$4 sm:$0xff]  }
  0x11   :  { %v2058_v48 = vld [vmem:[%s2472_s0 + $0x4] ss:$8 sps:$4 sm:$0xff]   ;;  %v1695_v51 = vld [vmem:[%s2471_s1 + $0x180] ss:$16 sps:$4 sm:$0xff]   ;;  %v1696_v52 = vld [vmem:[%s2471_s1 + $0x188] ss:$16 sps:$4 sm:$0xff]  }
  0x12   :  { %v1691_v49 = vld [vmem:[%s2471_s1 + $0x184] ss:$16 sps:$4 sm:$0xff]   ;;  %v1693_v50 = vld [vmem:[%s2471_s1 + $0x18c] ss:$16 sps:$4 sm:$0xff]   ;;  %512 = vmatprep.mubr.bf16.mxu0 %v2058_v48  ;;  %565 = vmatprep.mubr.bf16.mxu1 %v2058_v48  ;;  %v1701_v55 = vld [vmem:[%s2471_s1 + $0x1a0] ss:$16 sps:$4 sm:$0xff]  }
  0x13   :  { %489 = vmatpush1.bf16.msra.mxu0 %v1647_v18  ;;  %542 = vmatpush1.bf16.msra.mxu1 %v1648_v19  ;;  %v1697_v53 = vld [vmem:[%s2471_s1 + $0x1a4] ss:$16 sps:$4 sm:$0xff]   ;;  %v1699_v54 = vld [vmem:[%s2471_s1 + $0x1ac] ss:$16 sps:$4 sm:$0xff]   ;;  %v1702_v56 = vld [vmem:[%s2471_s1 + $0x1a8] ss:$16 sps:$4 sm:$0xff]  }
  0x14   :  { %490 = vmatprep.subr.bf16.mxu0 %v1649_v20  ;;  %543 = vmatprep.subr.bf16.mxu1 %v1651_v21  ;;  %v1703_v57 = vld [vmem:[%s2471_s1 + $0x1c4] ss:$16 sps:$4 sm:$0xff]   ;;  %v1705_v58 = vld [vmem:[%s2471_s1 + $0x1cc] ss:$16 sps:$4 sm:$0xff]   ;;  %v1707_v59 = vld [vmem:[%s2471_s1 + $0x1c0] ss:$16 sps:$4 sm:$0xff]  }
  0x15   :  { %v1708_v60 = vld [vmem:[%s2471_s1 + $0x1c8] ss:$16 sps:$4 sm:$0xff]   ;;  %v1709_v61 = vld [vmem:[%s2471_s1 + $0x1e4] ss:$16 sps:$4 sm:$0xff]   ;;  %v1711_v62 = vld [vmem:[%s2471_s1 + $0x1ec] ss:$16 sps:$4 sm:$0xff]  }
  0x16   :  { %v1713_v63 = vld [vmem:[%s2471_s1 + $0x1e0] ss:$16 sps:$4 sm:$0xff]   ;;  %v1714_v0 = vld [vmem:[%s2471_s1 + $0x1e8] ss:$16 sps:$4 sm:$0xff]   ;;  %v1720_v1 = vld [vmem:[%s2473_s3 + $0x4] ss:$16 sps:$4 sm:$0xff]  }
  0x17   :  { %491 = vmatpush1.bf16.msra.mxu0 %v1653_v22  ;;  %544 = vmatpush1.bf16.msra.mxu1 %v1654_v23  ;;  %v1723_v2 = vld [vmem:[%s2473_s3 + $0xc] ss:$16 sps:$4 sm:$0xff]   ;;  %v2119_v3 = vld [vmem:[%s2472_s0] ss:$8 sps:$4 sm:$0xff]   ;;  %v1726_v6 = vld [vmem:[%s2473_s3 + $0x24] ss:$16 sps:$4 sm:$0xff]  }
  0x18   :  { %492 = vmatprep.subr.bf16.mxu0 %v1655_v24  ;;  %545 = vmatprep.subr.bf16.mxu1 %v1657_v25  ;;  %v1718_v4 = vld [vmem:[%s2473_s3] ss:$16 sps:$4 sm:$0xff]   ;;  %v1721_v5 = vld [vmem:[%s2473_s3 + $0x8] ss:$16 sps:$4 sm:$0xff]   ;;  %v1729_v7 = vld [vmem:[%s2473_s3 + $0x2c] ss:$16 sps:$4 sm:$0xff]  }
  0x19   :  { %v2136_v8 = vld [vmem:[%s2472_s0 + $0x14] ss:$8 sps:$4 sm:$0xff]   ;;  %v1724_v9 = vld [vmem:[%s2473_s3 + $0x20] ss:$16 sps:$4 sm:$0xff]   ;;  %v1727_v10 = vld [vmem:[%s2473_s3 + $0x28] ss:$16 sps:$4 sm:$0xff]  }
  0x1a   :  { %v1732_v11 = vld [vmem:[%s2473_s3 + $0x44] ss:$16 sps:$4 sm:$0xff]   ;;  %v1735_v12 = vld [vmem:[%s2473_s3 + $0x4c] ss:$16 sps:$4 sm:$0xff]   ;;  %v1730_v13 = vld [vmem:[%s2473_s3 + $0x40] ss:$16 sps:$4 sm:$0xff]  }
  0x1b   :  { %493 = vmatpush1.bf16.msra.mxu0 %v1659_v26  ;;  %546 = vmatpush1.bf16.msra.mxu1 %v1660_v27  ;;  %v1733_v14 = vld [vmem:[%s2473_s3 + $0x48] ss:$16 sps:$4 sm:$0xff]   ;;  %v1738_v16 = vld [vmem:[%s2473_s3 + $0x64] ss:$16 sps:$4 sm:$0xff]   ;;  %v1741_v17 = vld [vmem:[%s2473_s3 + $0x6c] ss:$16 sps:$4 sm:$0xff]  }
  0x1c   :  { %494 = vmatprep.subr.bf16.mxu0 %v1661_v28  ;;  %547 = vmatprep.subr.bf16.mxu1 %v1663_v29  ;;  %v2163_v15 = vld [vmem:[%s2472_s0 + $0x10] ss:$8 sps:$4 sm:$0xff]   ;;  %v1747_v20 = vld [vmem:[%s2473_s3 + $0x84] ss:$16 sps:$4 sm:$0xff]   ;;  %v1750_v21 = vld [vmem:[%s2473_s3 + $0x8c] ss:$16 sps:$4 sm:$0xff]  }
  0x1d   :  { %v1736_v18 = vld [vmem:[%s2473_s3 + $0x60] ss:$16 sps:$4 sm:$0xff]   ;;  %v1739_v19 = vld [vmem:[%s2473_s3 + $0x68] ss:$16 sps:$4 sm:$0xff]   ;;  %v1753_v24 = vld [vmem:[%s2473_s3 + $0xa4] ss:$16 sps:$4 sm:$0xff]  }
  0x1e   :  { %v1745_v22 = vld [vmem:[%s2473_s3 + $0x80] ss:$16 sps:$4 sm:$0xff]   ;;  %v1748_v23 = vld [vmem:[%s2473_s3 + $0x88] ss:$16 sps:$4 sm:$0xff]   ;;  %v1756_v25 = vld [vmem:[%s2473_s3 + $0xac] ss:$16 sps:$4 sm:$0xff]  }
  0x1f   :  { %495 = vmatpush1.bf16.msra.mxu0 %v1665_v30  ;;  %548 = vmatpush1.bf16.msra.mxu1 %v1666_v31  ;;  %v1751_v26 = vld [vmem:[%s2473_s3 + $0xa0] ss:$16 sps:$4 sm:$0xff]   ;;  %v1754_v27 = vld [vmem:[%s2473_s3 + $0xa8] ss:$16 sps:$4 sm:$0xff]   ;;  %v1759_v28 = vld [vmem:[%s2473_s3 + $0xc4] ss:$16 sps:$4 sm:$0xff]  }
  0x20   :  { %496 = vmatprep.subr.bf16.mxu0 %v1667_v32  ;;  %549 = vmatprep.subr.bf16.mxu1 %v1669_v33  ;;  %v1762_v29 = vld [vmem:[%s2473_s3 + $0xcc] ss:$16 sps:$4 sm:$0xff]   ;;  %v1757_v30 = vld [vmem:[%s2473_s3 + $0xc0] ss:$16 sps:$4 sm:$0xff]   ;;  %v1760_v31 = vld [vmem:[%s2473_s3 + $0xc8] ss:$16 sps:$4 sm:$0xff]  }
  0x21   :  { %v1765_v32 = vld [vmem:[%s2473_s3 + $0xe4] ss:$16 sps:$4 sm:$0xff]   ;;  %v1768_v33 = vld [vmem:[%s2473_s3 + $0xec] ss:$16 sps:$4 sm:$0xff]  }
  0x23   :  { %497 = vmatpush1.bf16.msra.mxu0 %v1671_v34  ;;  %550 = vmatpush1.bf16.msra.mxu1 %v1672_v35  ;;  %v1763_v34 = vld [vmem:[%s2473_s3 + $0xe0] ss:$16 sps:$4 sm:$0xff]   ;;  %v1766_v35 = vld [vmem:[%s2473_s3 + $0xe8] ss:$16 sps:$4 sm:$0xff]  }
  0x24   :  { %498 = vmatprep.subr.bf16.mxu0 %v1673_v36  ;;  %551 = vmatprep.subr.bf16.mxu1 %v1675_v37  ;;  %v1771_v36 = vld [vmem:[%s2473_s3 + $0x104] ss:$16 sps:$4 sm:$0xff]   ;;  %v1774_v37 = vld [vmem:[%s2473_s3 + $0x10c] ss:$16 sps:$4 sm:$0xff]  }
  0x27   :  { %499 = vmatpush1.bf16.msra.mxu0 %v1677_v38  ;;  %552 = vmatpush1.bf16.msra.mxu1 %v1678_v39  ;;  %v1769_v38 = vld [vmem:[%s2473_s3 + $0x100] ss:$16 sps:$4 sm:$0xff]   ;;  %v1772_v39 = vld [vmem:[%s2473_s3 + $0x108] ss:$16 sps:$4 sm:$0xff]  }
  0x28   :  { %500 = vmatprep.subr.bf16.mxu0 %v1679_v40  ;;  %553 = vmatprep.subr.bf16.mxu1 %v1681_v41  ;;  %v1777_v40 = vld [vmem:[%s2473_s3 + $0x124] ss:$16 sps:$4 sm:$0xff]   ;;  %v1780_v41 = vld [vmem:[%s2473_s3 + $0x12c] ss:$16 sps:$4 sm:$0xff]  }
  0x2b   :  { %501 = vmatpush1.bf16.msra.mxu0 %v1683_v42  ;;  %554 = vmatpush1.bf16.msra.mxu1 %v1684_v43  ;;  %v1775_v42 = vld [vmem:[%s2473_s3 + $0x120] ss:$16 sps:$4 sm:$0xff]   ;;  %v1778_v43 = vld [vmem:[%s2473_s3 + $0x128] ss:$16 sps:$4 sm:$0xff]  }
  0x2c   :  { %502 = vmatprep.subr.bf16.mxu0 %v1685_v44  ;;  %555 = vmatprep.subr.bf16.mxu1 %v1687_v45  ;;  %v1783_v44 = vld [vmem:[%s2473_s3 + $0x144] ss:$16 sps:$4 sm:$0xff]   ;;  %v1786_v45 = vld [vmem:[%s2473_s3 + $0x14c] ss:$16 sps:$4 sm:$0xff]  }
  0x2f   :  { %503 = vmatpush1.bf16.msra.mxu0 %v1689_v46  ;;  %556 = vmatpush1.bf16.msra.mxu1 %v1690_v47  ;;  %v1781_v46 = vld [vmem:[%s2473_s3 + $0x140] ss:$16 sps:$4 sm:$0xff]   ;;  %v1784_v47 = vld [vmem:[%s2473_s3 + $0x148] ss:$16 sps:$4 sm:$0xff]  }
  0x30   :  { %504 = vmatprep.subr.bf16.mxu0 %v1691_v49  ;;  %557 = vmatprep.subr.bf16.mxu1 %v1693_v50  ;;  %v1792_v49 = vld [vmem:[%s2473_s3 + $0x16c] ss:$16 sps:$4 sm:$0xff]   ;;  %v1787_v50 = vld [vmem:[%s2473_s3 + $0x160] ss:$16 sps:$4 sm:$0xff]  }
  0x33   :  { %505 = vmatpush1.bf16.msra.mxu0 %v1695_v51  ;;  %558 = vmatpush1.bf16.msra.mxu1 %v1696_v52  ;;  %v1790_v51 = vld [vmem:[%s2473_s3 + $0x168] ss:$16 sps:$4 sm:$0xff]   ;;  %v1795_v52 = vld [vmem:[%s2473_s3 + $0x184] ss:$16 sps:$4 sm:$0xff]  }
  0x34   :  { %506 = vmatprep.subr.bf16.mxu0 %v1697_v53  ;;  %559 = vmatprep.subr.bf16.mxu1 %v1699_v54  ;;  %v1798_v53 = vld [vmem:[%s2473_s3 + $0x18c] ss:$16 sps:$4 sm:$0xff]   ;;  %v1793_v54 = vld [vmem:[%s2473_s3 + $0x180] ss:$16 sps:$4 sm:$0xff]  }
  0x37   :  { %507 = vmatpush1.bf16.msra.mxu0 %v1701_v55  ;;  %560 = vmatpush1.bf16.msra.mxu1 %v1702_v56  ;;  %v1796_v55 = vld [vmem:[%s2473_s3 + $0x188] ss:$16 sps:$4 sm:$0xff]   ;;  %v1801_v56 = vld [vmem:[%s2473_s3 + $0x1a4] ss:$16 sps:$4 sm:$0xff]  }
  0x38   :  { %508 = vmatprep.subr.bf16.mxu0 %v1703_v57  ;;  %561 = vmatprep.subr.bf16.mxu1 %v1705_v58  ;;  %v1804_v57 = vld [vmem:[%s2473_s3 + $0x1ac] ss:$16 sps:$4 sm:$0xff]   ;;  %v1799_v58 = vld [vmem:[%s2473_s3 + $0x1a0] ss:$16 sps:$4 sm:$0xff]  }
  0x3b   :  { %509 = vmatpush1.bf16.msra.mxu0 %v1707_v59  ;;  %562 = vmatpush1.bf16.msra.mxu1 %v1708_v60  ;;  %v1802_v59 = vld [vmem:[%s2473_s3 + $0x1a8] ss:$16 sps:$4 sm:$0xff]   ;;  %v1807_v60 = vld [vmem:[%s2473_s3 + $0x1c4] ss:$16 sps:$4 sm:$0xff]  }
  0x3c   :  { %510 = vmatprep.subr.bf16.mxu0 %v1709_v61  ;;  %563 = vmatprep.subr.bf16.mxu1 %v1711_v62  ;;  %v1810_v61 = vld [vmem:[%s2473_s3 + $0x1cc] ss:$16 sps:$4 sm:$0xff]   ;;  %v1805_v62 = vld [vmem:[%s2473_s3 + $0x1c0] ss:$16 sps:$4 sm:$0xff]  }
  0x3f   :  { %511 = vmatpush1.bf16.msra.mxu0 %v1713_v63  ;;  %564 = vmatpush1.bf16.msra.mxu1 %v1714_v0  ;;  %v1808_v63 = vld [vmem:[%s2473_s3 + $0x1c8] ss:$16 sps:$4 sm:$0xff]   ;;  %v1813_v0 = vld [vmem:[%s2473_s3 + $0x1e4] ss:$16 sps:$4 sm:$0xff]  }
  0x40   :  { %1018 = vmatprep.subr.bf16.mxu0 %v1720_v1  ;;  %1071 = vmatprep.subr.bf16.mxu1 %v1723_v2  ;;  %v1816_v1 = vld [vmem:[%s2473_s3 + $0x1ec] ss:$16 sps:$4 sm:$0xff]   ;;  %v1811_v2 = vld [vmem:[%s2473_s3 + $0x1e0] ss:$16 sps:$4 sm:$0xff]  }
  0x42   :  { %513 = vmatmul.mubr.bf16.vlgmr.msra.gmra.mrb[0].mxu0 %v2119_v3  ;;  %566 = vmatmul.mubr.bf16.vlgmr.msra.gmra.mrb[0].mxu1 %v2119_v3 }
  0x43   :  { %1019 = vmatpush1.bf16.msra.mxu0 %v1718_v4  ;;  %1072 = vmatpush1.bf16.msra.mxu1 %v1721_v5  ;;  %v1814_v4 = vld [vmem:[%s2473_s3 + $0x1e8] ss:$16 sps:$4 sm:$0xff]  }
  0x44   :  { %1020 = vmatprep.subr.bf16.mxu0 %v1726_v6  ;;  %1073 = vmatprep.subr.bf16.mxu1 %v1729_v7 }
  0x45   :  { %522 = vmatprep.mubr.bf16.mxu0 %v2136_v8  ;;  %575 = vmatprep.mubr.bf16.mxu1 %v2136_v8 }
  0x47   :  { %1021 = vmatpush1.bf16.msra.mxu0 %v1724_v9  ;;  %1074 = vmatpush1.bf16.msra.mxu1 %v1727_v10 }
  0x48   :  { %1022 = vmatprep.subr.bf16.mxu0 %v1732_v11  ;;  %1075 = vmatprep.subr.bf16.mxu1 %v1735_v12 }
  0x4a   :  { %523 = vmatmul.mubr.bf16.gmra.mrb[4].mxu0 %v2163_v15  ;;  %576 = vmatmul.mubr.bf16.gmra.mrb[4].mxu1 %v2163_v15 }
  0x4b   :  { %1023 = vmatpush1.bf16.msra.mxu0 %v1730_v13  ;;  %1076 = vmatpush1.bf16.msra.mxu1 %v1733_v14  ;;  %v1177_v14 = vlaneseq }
  0x4c   :  { %1024 = vmatprep.subr.bf16.mxu0 %v1738_v16  ;;  %1077 = vmatprep.subr.bf16.mxu1 %v1741_v17 }
  0x4d   :  { %1050 = vmatprep.mubr.bf16.mxu0 %v2058_v48  ;;  %1103 = vmatprep.mubr.bf16.mxu1 %v2058_v48  ;;  %v1789_v48 = vld [vmem:[%s2473_s3 + $0x164] ss:$16 sps:$4 sm:$0xff]  }
  0x4f   :  { %1025 = vmatpush1.bf16.msra.mxu0 %v1736_v18  ;;  %1078 = vmatpush1.bf16.msra.mxu1 %v1739_v19 }
  0x50   :  { %1026 = vmatprep.subr.bf16.mxu0 %v1747_v20  ;;  %1079 = vmatprep.subr.bf16.mxu1 %v1750_v21 }
  0x53   :  { %1027 = vmatpush1.bf16.msra.mxu0 %v1745_v22  ;;  %1080 = vmatpush1.bf16.msra.mxu1 %v1748_v23  ;;  %v1175_v23 = vld [vmem:[%s2474_s2] sm:$0xf] }
  0x54   :  { %1028 = vmatprep.subr.bf16.mxu0 %v1753_v24  ;;  %1081 = vmatprep.subr.bf16.mxu1 %v1756_v25 }
  0x57   :  { %1029 = vmatpush1.bf16.msra.mxu0 %v1751_v26  ;;  %1082 = vmatpush1.bf16.msra.mxu1 %v1754_v27 }
  0x58   :  { %1030 = vmatprep.subr.bf16.mxu0 %v1759_v28  ;;  %1083 = vmatprep.subr.bf16.mxu1 %v1762_v29 }
  0x5b   :  { %1031 = vmatpush1.bf16.msra.mxu0 %v1757_v30  ;;  %1084 = vmatpush1.bf16.msra.mxu1 %v1760_v31 }
  0x5c   :  { %1032 = vmatprep.subr.bf16.mxu0 %v1765_v32  ;;  %1085 = vmatprep.subr.bf16.mxu1 %v1768_v33 }
  0x5f   :  { %1033 = vmatpush1.bf16.msra.mxu0 %v1763_v34  ;;  %1086 = vmatpush1.bf16.msra.mxu1 %v1766_v35 }
  0x60   :  { %1034 = vmatprep.subr.bf16.mxu0 %v1771_v36  ;;  %1087 = vmatprep.subr.bf16.mxu1 %v1774_v37 }
  0x63   :  { %1035 = vmatpush1.bf16.msra.mxu0 %v1769_v38  ;;  %1088 = vmatpush1.bf16.msra.mxu1 %v1772_v39 }
  0x64   :  { %1036 = vmatprep.subr.bf16.mxu0 %v1777_v40  ;;  %1089 = vmatprep.subr.bf16.mxu1 %v1780_v41 }
  0x67   :  { %1037 = vmatpush1.bf16.msra.mxu0 %v1775_v42  ;;  %1090 = vmatpush1.bf16.msra.mxu1 %v1778_v43 }
  0x68   :  { %1038 = vmatprep.subr.bf16.mxu0 %v1783_v44  ;;  %1091 = vmatprep.subr.bf16.mxu1 %v1786_v45 }
  0x6b   :  { %1039 = vmatpush1.bf16.msra.mxu0 %v1781_v46  ;;  %1092 = vmatpush1.bf16.msra.mxu1 %v1784_v47 }
  0x6c   :  { %1040 = vmatprep.subr.bf16.mxu0 %v1789_v48  ;;  %1093 = vmatprep.subr.bf16.mxu1 %v1792_v49 }
  0x6f   :  { %1041 = vmatpush1.bf16.msra.mxu0 %v1787_v50  ;;  %1094 = vmatpush1.bf16.msra.mxu1 %v1790_v51 }
  0x70   :  { %1042 = vmatprep.subr.bf16.mxu0 %v1795_v52  ;;  %1095 = vmatprep.subr.bf16.mxu1 %v1798_v53 }
  0x73   :  { %1043 = vmatpush1.bf16.msra.mxu0 %v1793_v54  ;;  %1096 = vmatpush1.bf16.msra.mxu1 %v1796_v55 }
  0x74   :  { %1044 = vmatprep.subr.bf16.mxu0 %v1801_v56  ;;  %1097 = vmatprep.subr.bf16.mxu1 %v1804_v57 }
  0x77   :  { %1045 = vmatpush1.bf16.msra.mxu0 %v1799_v58  ;;  %1098 = vmatpush1.bf16.msra.mxu1 %v1802_v59 }
  0x78   :  { %1046 = vmatprep.subr.bf16.mxu0 %v1807_v60  ;;  %1099 = vmatprep.subr.bf16.mxu1 %v1810_v61 }
  0x7b   :  { %1047 = vmatpush1.bf16.msra.mxu0 %v1805_v62  ;;  %1100 = vmatpush1.bf16.msra.mxu1 %v1808_v63 }
  0x7c   :  { %1048 = vmatprep.subr.bf16.mxu0 %v1813_v0  ;;  %1101 = vmatprep.subr.bf16.mxu1 %v1816_v1 }
  0x7f   :  { %1049 = vmatpush1.bf16.msra.mxu0 %v1811_v2  ;;  %1102 = vmatpush1.bf16.msra.mxu1 %v1814_v4 }
  0x82   :  { %1051 = vmatmul.mubr.bf16.vlgmr.msra.gmra.mrb[8].mxu0 %v2119_v3  ;;  %1104 = vmatmul.mubr.bf16.vlgmr.msra.gmra.mrb[8].mxu1 %v2119_v3  ;;  %v2331_v3 = vshrl.u32 %v1177_v14, 7 }
  0x83   :  { %1060 = vmatprep.mubr.bf16.mxu0 %v2136_v8  ;;  %1113 = vmatprep.mubr.bf16.mxu1 %v2136_v8 }
  0x84   :  { %v1187_v24 = vsub.s32 2, %v2331_v3  ;;  %v1183_v25 = vsub.s32 1, %v2331_v3  ;;  %v1191_v26 = vsub.s32 3, %v2331_v3 }
  0x86   :  { %v1188_v28 = vrot.slane %v1175_v23, %v1187_v24  ;;  %v1184_v29 = vrot.slane %v1175_v23, %v1183_v25  ;;  %v1192_v30 = vrot.slane %v1175_v23, %v1191_v26 }
  0x8a   :  { %1061 = vmatmul.mubr.bf16.gmra.mrb[12].mxu0 %v2163_v15  ;;  %1114 = vmatmul.mubr.bf16.gmra.mrb[12].mxu1 %v2163_v15  ;;  %v1179_v15 = vsub.s32 0, %v2331_v3 }
  0x8c   :  { %v1180_v27 = vrot.slane %v1175_v23, %v1179_v15 }
 0x115   :  { %v514_v5 = vpop.f32.mrb[0].mxu0  ;;  %v567_v6 = vpop.f32.mrb[0].mxu1 }
 0x116   :  { %v516_v7 = vpop.f32.mrb[1].mxu0  ;;  %v569_v9 = vpop.f32.mrb[1].mxu1  ;;  %v2348_v31 = vadd.f32 %v1180_v27, %v514_v5  ;;  %v2350_v32 = vadd.f32 %v1188_v28, %v567_v6 }
 0x117   :  { %v518_v10 = vpop.f32.mrb[2].mxu0  ;;  %v571_v11 = vpop.f32.mrb[2].mxu1  ;;  %v2352_v33 = vadd.f32 %v1184_v29, %v516_v7  ;;  %v2354_v34 = vadd.f32 %v1192_v30, %v569_v9 }
 0x118   :  { %v520_v12 = vpop.f32.mrb[3].mxu0  ;;  %v573_v13 = vpop.f32.mrb[3].mxu1  ;;  %v1587_v35 = vmul.f32 -1.442695, %v2348_v31  ;;  %v2357_v36 = vadd.f32 %v1180_v27, %v518_v10  ;;  %v1589_v37 = vmul.f32 -1.442695, %v2350_v32  ;;  %v2360_v38 = vadd.f32 %v1188_v28, %v571_v11 }
 0x119   :  { %v1588_v39 = vmul.f32 -1.442695, %v2352_v33  ;;  %v2363_v40 = vadd.f32 %v1184_v29, %v520_v12  ;;  %v1590_v41 = vmul.f32 -1.442695, %v2354_v34  ;;  %v2366_v42 = vadd.f32 %v1192_v30, %v573_v13 }
 0x11a   :  { %1817 = vpow2.f32 %v1587_v35  ;;  %v1591_v43 = vmul.f32 -1.442695, %v2357_v36  ;;  %v1593_v45 = vmul.f32 -1.442695, %v2360_v38 }
 0x11b   :  { %1819 = vpow2.f32 %v1589_v37  ;;  %v1592_v47 = vmul.f32 -1.442695, %v2363_v40  ;;  %v1594_v49 = vmul.f32 -1.442695, %v2366_v42 }
 0x11c   :  { %1821 = vpow2.f32 %v1588_v39 }
 0x11d   :  { %v524_v16 = vpop.f32.mrb[4].mxu0  ;;  %v577_v17 = vpop.f32.mrb[4].mxu1  ;;  %1823 = vpow2.f32 %v1590_v41 }
 0x11e   :  { %v526_v18 = vpop.f32.mrb[5].mxu0  ;;  %v579_v19 = vpop.f32.mrb[5].mxu1  ;;  %v2369_v44 = vadd.f32 %v1180_v27, %v524_v16  ;;  %v2372_v46 = vadd.f32 %v1188_v28, %v577_v17  ;;  %1825 = vpow2.f32 %v1591_v43 }
 0x11f   :  { %v528_v8 = vpop.f32.mrb[6].mxu0  ;;  %v581_v20 = vpop.f32.mrb[6].mxu1  ;;  %v2375_v48 = vadd.f32 %v1184_v29, %v526_v18  ;;  %v2378_v50 = vadd.f32 %v1192_v30, %v579_v19  ;;  %1827 = vpow2.f32 %v1593_v45 }
 0x120   :  { %v530_v21 = vpop.f32.mrb[7].mxu0  ;;  %v583_v22 = vpop.f32.mrb[7].mxu1  ;;  %v1595_v51 = vmul.f32 -1.442695, %v2369_v44  ;;  %v2381_v52 = vadd.f32 %v1180_v27, %v528_v8  ;;  %v1597_v53 = vmul.f32 -1.442695, %v2372_v46  ;;  %v2384_v54 = vadd.f32 %v1188_v28, %v581_v20 }
 0x121   :  { %1829 = vpow2.f32 %v1592_v47  ;;  %v1596_v55 = vmul.f32 -1.442695, %v2375_v48  ;;  %v2387_v56 = vadd.f32 %v1184_v29, %v530_v21  ;;  %v1598_v57 = vmul.f32 -1.442695, %v2378_v50 }
 0x122   :  { %1831 = vpow2.f32 %v1594_v49  ;;  %v2390_v58 = vadd.f32 %v1192_v30, %v583_v22  ;;  %v1599_v59 = vmul.f32 -1.442695, %v2381_v52  ;;  %v1601_v60 = vmul.f32 -1.442695, %v2384_v54 }
 0x123   :  { %1833 = vpow2.f32 %v1595_v51  ;;  %v1600_v62 = vmul.f32 -1.442695, %v2387_v56  ;;  %v1229_v51 = vld [vmem:[%s2475_s4] sm:$0xf] }
 0x124   :  { %1835 = vpow2.f32 %v1597_v53  ;;  %v1818_v61 = vpop.eup %1817  ;;  %v1602_v0 = vmul.f32 -1.442695, %v2390_v58 }
 0x125   :  { %1837 = vpow2.f32 %v1596_v55  ;;  %v1820_v63 = vpop.eup %1819  ;;  %v1315_v4 = vadd.f32 1.0, %v1818_v61 }
 0x126   :  { %1839 = vpow2.f32 %v1598_v57  ;;  %v1822_v1 = vpop.eup %1821  ;;  %v1317_v6 = vadd.f32 1.0, %v1820_v63  ;;  %v2413_v63 = vrot.slane %v1229_v51, %v1191_v26 }
 0x127   :  { %1841 = vpow2.f32 %v1599_v59  ;;  %v1824_v2 = vpop.eup %1823  ;;  %v1316_v9 = vadd.f32 1.0, %v1822_v1  ;;  %v2401_v59 = vrot.slane %v1229_v51, %v1179_v15 }
 0x128   :  { %1843 = vpow2.f32 %v1601_v60  ;;  %v1826_v5 = vpop.eup %1825  ;;  %v1318_v11 = vadd.f32 1.0, %v1824_v2  ;;  %v2405_v60 = vrot.slane %v1229_v51, %v1187_v24 }
 0x129   :  { %1845 = vpow2.f32 %v1600_v62  ;;  %v1828_v7 = vpop.eup %1827  ;;  %v1319_v13 = vadd.f32 1.0, %v1826_v5  ;;  %v2409_v62 = vrot.slane %v1229_v51, %v1183_v25 }
 0x12a   :  { %1847 = vpow2.f32 %v1602_v0  ;;  %v1321_v16 = vadd.f32 1.0, %v1828_v7 }
 0x12b   :  { %v1830_v10 = vpop.eup %1829  ;;  %1849 = vrcp.f32 %v1315_v4 }
 0x12c   :  { %v1832_v12 = vpop.eup %1831  ;;  %1851 = vrcp.f32 %v1317_v6  ;;  %v1320_v18 = vadd.f32 1.0, %v1830_v10 }
 0x12d   :  { %v1834_v14 = vpop.eup %1833  ;;  %1853 = vrcp.f32 %v1316_v9  ;;  %v1322_v8 = vadd.f32 1.0, %v1832_v12 }
 0x12e   :  { %v1836_v17 = vpop.eup %1835  ;;  %1855 = vrcp.f32 %v1318_v11  ;;  %v1323_v21 = vadd.f32 1.0, %v1834_v14 }
 0x12f   :  { %v1838_v19 = vpop.eup %1837  ;;  %1857 = vrcp.f32 %v1319_v13  ;;  %v1325_v23 = vadd.f32 1.0, %v1836_v17 }
 0x130   :  { %v1840_v20 = vpop.eup %1839  ;;  %1859 = vrcp.f32 %v1321_v16  ;;  %v1324_v28 = vadd.f32 1.0, %v1838_v19 }
 0x131   :  { %v1842_v22 = vpop.eup %1841  ;;  %1861 = vrcp.f32 %v1320_v18  ;;  %v1326_v30 = vadd.f32 1.0, %v1840_v20 }
 0x132   :  { %v1844_v27 = vpop.eup %1843  ;;  %1863 = vrcp.f32 %v1322_v8  ;;  %v1327_v37 = vadd.f32 1.0, %v1842_v22 }
 0x133   :  { %v1846_v29 = vpop.eup %1845  ;;  %1865 = vrcp.f32 %v1323_v21  ;;  %v1329_v39 = vadd.f32 1.0, %v1844_v27 }
 0x134   :  { %v1848_v35 = vpop.eup %1847  ;;  %1867 = vrcp.f32 %v1325_v23  ;;  %v1328_v43 = vadd.f32 1.0, %v1846_v29 }
 0x135   :  { %v1850_v41 = vpop.eup %1849  ;;  %1869 = vrcp.f32 %v1324_v28  ;;  %v1330_v47 = vadd.f32 1.0, %v1848_v35 }
 0x136   :  { %v1852_v45 = vpop.eup %1851  ;;  %1871 = vrcp.f32 %v1326_v30  ;;  %v1363_v2 = vmul.f32 %v1850_v41, %v2348_v31 }
 0x137   :  { %v1854_v49 = vpop.eup %1853  ;;  %1873 = vrcp.f32 %v1327_v37  ;;  %v1365_v15 = vmul.f32 %v1852_v45, %v2350_v32 }
 0x138   :  { %v1856_v53 = vpop.eup %1855  ;;  %1875 = vrcp.f32 %v1329_v39  ;;  %v1364_v4 = vmul.f32 %v1854_v49, %v2352_v33 }
 0x139   :  { %v1858_v55 = vpop.eup %1857  ;;  %1877 = vrcp.f32 %v1328_v43  ;;  %v1366_v24 = vmul.f32 %v1856_v53, %v2354_v34 }
 0x13a   :  { %v1860_v57 = vpop.eup %1859  ;;  %1879 = vrcp.f32 %v1330_v47  ;;  %v1367_v25 = vmul.f32 %v1858_v55, %v2357_v36 }
 0x13b   :  { %v1862_v61 = vpop.eup %1861  ;;  %v1369_v9 = vmul.f32 %v1860_v57, %v2360_v38 }
 0x13c   :  { %v1864_v0 = vpop.eup %1863  ;;  %v1368_v32 = vmul.f32 %v1862_v61, %v2363_v40 }
 0x13d   :  { %v1866_v1 = vpop.eup %1865  ;;  %v1370_v33 = vmul.f32 %v1864_v0, %v2366_v42 }
 0x13e   :  { %v1868_v7 = vpop.eup %1867  ;;  %v1371_v43 = vmul.f32 %v1866_v1, %v2369_v44 }
 0x13f   :  { %v1870_v31 = vpop.eup %1869  ;;  %v1373_v45 = vmul.f32 %v1868_v7, %v2372_v46 }
 0x140   :  { %v1872_v36 = vpop.eup %1871  ;;  %v1372_v47 = vmul.f32 %v1870_v31, %v2375_v48 }
 0x141   :  { %v1874_v20 = vpop.eup %1873  ;;  %v1374_v49 = vmul.f32 %v1872_v36, %v2378_v50 }
 0x142   :  { %v1876_v23 = vpop.eup %1875  ;;  %v1375_v44 = vmul.f32 %v1874_v20, %v2381_v52 }
 0x143   :  { %v1878_v29 = vpop.eup %1877  ;;  %v1377_v46 = vmul.f32 %v1876_v23, %v2384_v54 }
 0x144   :  { %v1880_v41 = vpop.eup %1879  ;;  %v1376_v1 = vmul.f32 %v1878_v29, %v2387_v56 }
 0x155   :  { %v1052_v5 = vpop.f32.mrb[8].mxu0  ;;  %v1105_v6 = vpop.f32.mrb[8].mxu1 }
 0x156   :  { %v1251_v3 = vadd.f32 %v2401_v59, %v1052_v5  ;;  %v1253_v26 = vadd.f32 %v2405_v60, %v1105_v6  ;;  %v1054_v10 = vpop.f32.mrb[9].mxu0  ;;  %v1107_v11 = vpop.f32.mrb[9].mxu1 }
 0x157   :  { %v1252_v34 = vadd.f32 %v2409_v62, %v1054_v10  ;;  %v1254_v12 = vadd.f32 %v2413_v63, %v1107_v11  ;;  %v1056_v13 = vpop.f32.mrb[10].mxu0  ;;  %v1109_v14 = vpop.f32.mrb[10].mxu1 }
 0x158   :  { %v1379_v16 = vmul.f32 %v1363_v2, %v1251_v3  ;;  %v1381_v38 = vmul.f32 %v1365_v15, %v1253_v26  ;;  %v1255_v17 = vadd.f32 %v2401_v59, %v1056_v13  ;;  %v1257_v18 = vadd.f32 %v2405_v60, %v1109_v14  ;;  %v1058_v19 = vpop.f32.mrb[11].mxu0  ;;  %v1111_v8 = vpop.f32.mrb[11].mxu1 }
 0x159   :  { %v1380_v21 = vmul.f32 %v1364_v4, %v1252_v34  ;;  %v1382_v40 = vmul.f32 %v1366_v24, %v1254_v12  ;;  %v1256_v42 = vadd.f32 %v2409_v62, %v1058_v19  ;;  %v1258_v22 = vadd.f32 %v2413_v63, %v1111_v8 }
 0x15a   :  { %v1383_v27 = vmul.f32 %v1367_v25, %v1255_v17  ;;  %v1385_v28 = vmul.f32 %v1369_v9, %v1257_v18  ;;  %v1378_v2 = vmul.f32 %v1880_v41, %v2390_v58 }
 0x15b   :  { %v1611_v30 = vpack.c.bf16 %v1380_v21, %v1379_v16  ;;  %v1612_v35 = vpack.c.bf16 %v1382_v40, %v1381_v38  ;;  %v1384_v37 = vmul.f32 %v1368_v32, %v1256_v42  ;;  %v1386_v39 = vmul.f32 %v1370_v33, %v1258_v22 }
 0x15d   :  { %1443 = vst [vmem:[%s2476_s5] sm:$0xff] %v1611_v30  ;;  %1444 = vst [vmem:[%s2476_s5 + $0x8] sm:$0xff] %v1612_v35  ;;  %v1613_v51 = vpack.c.bf16 %v1384_v37, %v1383_v27  ;;  %v1614_v53 = vpack.c.bf16 %v1386_v39, %v1385_v28  ;;  %v1062_v55 = vpop.f32.mrb[12].mxu0  ;;  %v1115_v57 = vpop.f32.mrb[12].mxu1 }
 0x15e   :  { %v1259_v48 = vadd.f32 %v2401_v59, %v1062_v55  ;;  %v1261_v50 = vadd.f32 %v2405_v60, %v1115_v57  ;;  %v1064_v61 = vpop.f32.mrb[13].mxu0  ;;  %v1117_v0 = vpop.f32.mrb[13].mxu1 }
 0x15f   :  { %1445 = vst [vmem:[%s2476_s5 + $0x10] sm:$0xff] %v1613_v51  ;;  %1446 = vst [vmem:[%s2476_s5 + $0x18] sm:$0xff] %v1614_v53  ;;  %v1260_v52 = vadd.f32 %v2409_v62, %v1064_v61  ;;  %v1262_v54 = vadd.f32 %v2413_v63, %v1117_v0  ;;  %v1066_v15 = vpop.f32.mrb[14].mxu0  ;;  %v1119_v4 = vpop.f32.mrb[14].mxu1 }
 0x160   :  { %v1387_v24 = vmul.f32 %v1371_v43, %v1259_v48  ;;  %v1389_v5 = vmul.f32 %v1373_v45, %v1261_v50  ;;  %v1263_v56 = vadd.f32 %v2401_v59, %v1066_v15  ;;  %v1265_v58 = vadd.f32 %v2405_v60, %v1119_v4  ;;  %v1068_v6 = vpop.f32.mrb[15].mxu0  ;;  %v1121_v7 = vpop.f32.mrb[15].mxu1 }
 0x161   :  { %v1388_v25 = vmul.f32 %v1372_v47, %v1260_v52  ;;  %v1390_v9 = vmul.f32 %v1374_v49, %v1262_v54  ;;  %v1264_v3 = vadd.f32 %v2409_v62, %v1068_v6  ;;  %v1266_v26 = vadd.f32 %v2413_v63, %v1121_v7 }
 0x162   :  { %v1391_v10 = vmul.f32 %v1375_v44, %v1263_v56  ;;  %v1393_v11 = vmul.f32 %v1377_v46, %v1265_v58 }
 0x163   :  { %v1615_v31 = vpack.c.bf16 %v1388_v25, %v1387_v24  ;;  %v1616_v32 = vpack.c.bf16 %v1390_v9, %v1389_v5  ;;  %v1392_v33 = vmul.f32 %v1376_v1, %v1264_v3  ;;  %v1394_v34 = vmul.f32 %v1378_v2, %v1266_v26 }
 0x165   :  { %1447 = vst [vmem:[%s2476_s5 + $0x20] sm:$0xff] %v1615_v31  ;;  %1448 = vst [vmem:[%s2476_s5 + $0x28] sm:$0xff] %v1616_v32  ;;  %v1617_v59 = vpack.c.bf16 %v1392_v33, %v1391_v10  ;;  %v1618_v60 = vpack.c.bf16 %v1394_v34, %v1393_v11 }
 0x167   :  { %1449 = vst [vmem:[%s2476_s5 + $0x30] sm:$0xff] %v1617_v59  ;;  %1450 = vst [vmem:[%s2476_s5 + $0x38] sm:$0xff] %v1618_v60 }

</bundles_post_ra>
